<compile_context>
chip_gen: v7x
topology: tpu7x:2x2x1
jax: 0.10.0
libtpu: 0.0.40
codegen_flags: <defaults>
</compile_context>

<pallas_src>
import functools

import numpy as np
import jax
import jax.numpy as jnp
from jax.experimental import pallas as pl
from jax.experimental.pallas import tpu as pltpu

_BN_EPS = 1e-5

_CONV_CHANNELS = [
    (1, 8), (8, 16), (16, 32), (32, 64),     # encoder convs 1-4
    (64, 32), (32, 16), (16, 8), (8, 4),     # decoder convs 5-8
    (4, 2),                                  # conv9
]


# ----------------------------------------------------------------------------
# Parameter construction (deterministic, synthetic — not a checkpoint load).
# Conv weights stored as (3, 3, Cin, Cout); biases as (Cout,).
# ----------------------------------------------------------------------------
def init_params(key):
    params = []
    for (cin, cout) in _CONV_CHANNELS:
        key, kw, kb = jax.random.split(key, 3)
        fan_in = cin * 9
        scale = 1.0 / jnp.sqrt(jnp.float32(fan_in))
        w = scale * jax.random.normal(kw, (3, 3, cin, cout), dtype=jnp.float32)
        b = scale * jax.random.normal(kb, (cout,), dtype=jnp.float32)
        params.append((w, b))
    return params


# ----------------------------------------------------------------------------
# Host-side operator construction (numpy, runs once at setup time).
# Activation layout inside the kernel:  A[(n*H + h), (w*C + c)] = x[n, h, w, c].
# ----------------------------------------------------------------------------
def _col_mix(w, cin, cout, wk_dy):
    """(W*Cin, W*Cout): folds the dx column shift AND the (Cin,Cout) weights."""
    m = np.zeros((w * cin, w * cout), np.float32)
    for col in range(w):
        for dx in range(3):
            src = col + dx - 1
            if 0 <= src < w:
                m[src * cin:(src + 1) * cin, col * cout:(col + 1) * cout] = wk_dy[dx]
    return m


def _row_shift(n, h, dy):
    """(N*H, N*H): output row (n,h) reads input row (n, h+dy-1), zero outside."""
    m = np.zeros((n * h, n * h), np.float32)
    for b in range(n):
        for r in range(h):
            src = r + dy - 1
            if 0 <= src < h:
                m[b * h + r, b * h + src] = 1.0
    return m


def _shift_masks(n, h):
    """Per-batch boundary masks (N*H, 1) for the roll-based dy row shifts."""
    dn = np.ones((n * h, 1), np.float32)
    up = np.ones((n * h, 1), np.float32)
    for b in range(n):
        dn[b * h, 0] = 0.0               # reading row h-1 is invalid at h == 0
        up[b * h + h - 1, 0] = 0.0       # reading row h+1 is invalid at h == H-1
    return dn, up


def _chan_spread(w, c):
    """(W*C, W*C) projector: per-channel sum over W column groups, spread back."""
    m = np.zeros((w * c, w * c), np.float32)
    for ch in range(c):
        idx = np.arange(w) * c + ch
        m[np.ix_(idx, idx)] = 1.0
    return m


def _pool_rows(n, h, i):
    m = np.zeros((n * (h // 2), n * h), np.float32)
    for b in range(n):
        for r in range(h // 2):
            m[b * (h // 2) + r, b * h + 2 * r + i] = 1.0
    return m


def _pool_cols(w, c, j):
    m = np.zeros((w * c, (w // 2) * c), np.float32)
    for col in range(w // 2):
        for ch in range(c):
            m[(2 * col + j) * c + ch, col * c + ch] = 1.0
    return m


def _up_rows(n, h):
    m = np.zeros((n * 2 * h, n * h), np.float32)
    for b in range(n):
        for r in range(2 * h):
            m[b * 2 * h + r, b * h + r // 2] = 1.0
    return m


def _up_cols(w, c):
    m = np.zeros((w * c, 2 * w * c), np.float32)
    for col in range(2 * w):
        for ch in range(c):
            m[(col // 2) * c + ch, col * c + ch] = 1.0
    return m


class _Packer:
    """Collects operator blocks and lays them out densely in one bf16 bank.

    Blocks wider than 128 lanes (the fused conv operators) get full-width shelves
    at the top; narrower blocks are shelf-packed into three 128-lane columns so
    every kernel-side slice starts at a vreg-aligned lane offset.  Row offsets are
    16-aligned (bf16 sublane tile)."""

    LANES = 384
    COL_W = 128
    ALIGN = 16

    def __init__(self):
        self._mats = []

    def add(self, mat):
        mat = np.asarray(mat, np.float32)
        assert mat.ndim == 2 and mat.shape[1] <= self.LANES, mat.shape
        self._mats.append(mat)
        return len(self._mats) - 1                      # handle

    @staticmethod
    def _pad(n, a):
        return -(-n // a) * a

    def finish(self):
        slots = [None] * len(self._mats)
        wide = [i for i, m in enumerate(self._mats) if m.shape[1] > self.COL_W]
        narrow = [i for i, m in enumerate(self._mats) if m.shape[1] <= self.COL_W]
        row = 0
        for i in wide:
            r, c = self._mats[i].shape
            slots[i] = (row, 0, r, c)
            row += self._pad(r, self.ALIGN)
        cols = [row] * (self.LANES // self.COL_W)
        for i in sorted(narrow, key=lambda j: -self._mats[j].shape[0]):
            r, c = self._mats[i].shape
            j = int(np.argmin(cols))
            slots[i] = (cols[j], j * self.COL_W, r, c)
            cols[j] += self._pad(r, self.ALIGN)
        total = self._pad(max(cols), self.ALIGN)
        bank = np.zeros((total, self.LANES), np.float32)
        for i, m in enumerate(self._mats):
            r0, c0, r, c = slots[i]
            bank[r0:r0 + r, c0:c0 + c] = m
        return jnp.asarray(bank, dtype=jnp.bfloat16), tuple(slots)


# ----------------------------------------------------------------------------
# Tiny on-device probes: detect pltpu.roll availability / direction so the plan
# can use XLU rolls where safe and fall back to exact 0/1 matmuls otherwise.
# ----------------------------------------------------------------------------
def _probe_sublane_roll():
    """+1 if pltpu.roll(x, 1, axis=0) matches jnp.roll, -1 if inverted, 0 if unusable."""
    def kern(o_ref):
        x = jax.lax.broadcasted_iota(jnp.int32, (16, 32), 0).astype(jnp.float32)
        o_ref[...] = pltpu.roll(x, 1, axis=0)

    try:
        out = np.asarray(jax.block_until_ready(pl.pallas_call(
            kern, out_shape=jax.ShapeDtypeStruct((16, 32), jnp.float32))()))
    except Exception:
        return 0
    col = out[:, 0]
    base = np.arange(16.0)
    if np.allclose(col, np.roll(base, 1)):
        return 1
    if np.allclose(col, np.roll(base, -1)):
        return -1
    return 0


def _probe_lane_roll():
    """True iff a cyclic lane roll of a sub-128-lane row lowers correctly."""
    def kern(o_ref):
        x = jax.lax.broadcasted_iota(jnp.int32, (1, 32), 1).astype(jnp.float32)
        o_ref[...] = pltpu.roll(x, 8, axis=1)

    try:
        out = np.asarray(jax.block_until_ready(pl.pallas_call(
            kern, out_shape=jax.ShapeDtypeStruct((1, 32), jnp.float32))()))[0]
    except Exception:
        return False
    base = np.arange(32.0)
    return bool(np.allclose(out, np.roll(base, 8)) or
                np.allclose(out, np.roll(base, -8)))


# ----------------------------------------------------------------------------
# Plan construction: fold weights / upsample replication into operators and pack
# everything into one bf16 bank.
# ----------------------------------------------------------------------------
def build_generator_program(params, *, batch, height, width, roll_sign,
                            lane_roll_ok):
    assert height % 16 == 0 and width % 16 == 0, "needs 4 levels of 2x2 pooling"
    pk = _Packer()
    layers = []
    h_in, w_in = height, width       # spatial size of the tensor feeding the conv
    needs_up = False                 # pending 2x nearest-upsample (decoder)
    for li, (wk, bk) in enumerate(params):
        cin, cout = int(wk.shape[2]), int(wk.shape[3])
        wk = np.asarray(wk, np.float32)
        bk = np.asarray(bk, np.float32)

        h, w = (2 * h_in, 2 * w_in) if needs_up else (h_in, w_in)
        nh, wc = batch * h, w * cout
        layer = {"nh": nh, "wc": wc, "chan": cout,
                 "inv_count": 1.0 / float(batch * h * w)}

        # Fused conv operator [U_dy0 | U_dy1 | U_dy2] (dx shift + weights).  Conv
        # biases of layers 1-8 are dropped (exactly cancelled by beta=0 train BN).
        tap_dys = (1,) if h == 1 else (0, 1, 2)
        u = np.concatenate([_col_mix(w, cin, cout, wk[dy]) for dy in tap_dys],
                           axis=1)
        if needs_up:
            # Fold nearest-upsample column replication into the operator so the
            # conv dot runs at the (smaller) pre-upsample row count.
            u = (_up_cols(w_in, cin).astype(np.float64)
                 @ u.astype(np.float64)).astype(np.float32)
            layer["pre_up_rows"] = pk.add(_up_rows(batch, h_in))
        else:
            layer["pre_up_rows"] = None
        layer["u"] = pk.add(u)

        # dy row-shift strategy.
        if len(tap_dys) == 1:
            layer["shift"] = "none"
        elif roll_sign != 0 and nh % 8 == 0:
            layer["shift"] = "roll"
            dn, up = _shift_masks(batch, h)
            layer["mask_dn"] = pk.add(dn)
            layer["mask_up"] = pk.add(up)
        else:
            layer["shift"] = "matmul"
            layer["r_dn"] = pk.add(_row_shift(batch, h, 0))
            layer["r_up"] = pk.add(_row_shift(batch, h, 2))

        # BN channel-reduction strategy / final bias.
        if li < 8:
            layer["kind"] = "bn_relu"
            if w == 1:
                layer["reduce"] = "none"
            elif lane_roll_ok and (w & (w - 1)) == 0:
                layer["reduce"] = "roll"
            else:
                layer["reduce"] = "matmul"
                layer["proj"] = pk.add(_chan_spread(w, cout))
        else:
            layer["kind"] = "tanh"
            layer["bias"] = pk.add(np.tile(bk, w)[None, :])      # (1, W*cout)

        # Spatial transition.
        if li < 4:                                   # encoder: 2x2 maxpool
            layer["post"] = "pool"
            layer["pr0"] = pk.add(_pool_rows(batch, h, 0))
            layer["pr1"] = pk.add(_pool_rows(batch, h, 1))
            layer["pc0"] = pk.add(_pool_cols(w, cout, 0))
            layer["pc1"] = pk.add(_pool_cols(w, cout, 1))
            h_in, w_in, needs_up = h // 2, w // 2, False
        else:                                        # decoder: upsample deferred
            layer["post"] = "none"
            h_in, w_in, needs_up = h, w, (li < 8)
        layers.append(layer)

    plan = {"layers": tuple(layers), "roll_sign": roll_sign,
            "out_h": h, "out_w": w, "out_c": _CONV_CHANNELS[-1][1]}
    return plan, pk


# ----------------------------------------------------------------------------
# The fused Pallas kernel: straight-line 9-layer program of bf16 MXU dots, XLU
# rolls/reductions and f32 VPU/EUP elementwise ops.  Everything stays in VMEM.
# ----------------------------------------------------------------------------
def _generator_kernel(x_ref, ops_ref, o_ref, *, plan, slots):
    def op(handle):                          # static slice into the operator bank
        r0, c0, r, c = slots[handle]
        return ops_ref[pl.ds(r0, r), pl.ds(c0, c)]

    def mxu(a, b):                           # bf16 MXU dot, f32 accumulate
        return jnp.dot(a.astype(jnp.bfloat16), b.astype(jnp.bfloat16),
                       preferred_element_type=jnp.float32)

    sgn = plan["roll_sign"]
    act = x_ref[...]                                        # f32 (N*H, W*Cin)
    for layer in plan["layers"]:
        nh, wc = layer["nh"], layer["wc"]

        # --- 3x3 conv: ONE fused MXU dot; decoder layers add one small dot for
        # the nearest-upsample row replication (column replication pre-folded).
        # (op() loads stay adjacent to their dots to limit vreg live ranges.)
        y = mxu(act, op(layer["u"]))
        if layer["pre_up_rows"] is not None:
            y = mxu(op(layer["pre_up_rows"]), y)

        # --- dy row shifts: XLU sublane rolls + 0/1 boundary masks (off-MXU);
        # tiny-row layers / no-roll hardware fall back to exact 0/1 matmuls.
        shift = layer["shift"]
        if shift == "none":
            conv = y
        else:
            y_dn, y_mid, y_up = y[:, :wc], y[:, wc:2 * wc], y[:, 2 * wc:]
            if shift == "roll":
                conv = (pltpu.roll(y_dn, sgn % nh, axis=0)
                        * op(layer["mask_dn"]).astype(jnp.float32)
                        + y_mid
                        + pltpu.roll(y_up, (-sgn) % nh, axis=0)
                        * op(layer["mask_up"]).astype(jnp.float32))
            else:
                conv = (mxu(op(layer["r_dn"]), y_dn) + y_mid
                        + mxu(op(layer["r_up"]), y_up))

        # --- training-mode BatchNorm(gamma=1, beta=0) + ReLU  /  bias + tanh.
        # Stats, one-pass variance (clamped) and rsqrt stay in f32.
        if layer["kind"] == "bn_relu":
            s1 = jnp.sum(conv, axis=0, keepdims=True)        # (1, W*C)
            s2 = jnp.sum(conv * conv, axis=0, keepdims=True)
            red = layer["reduce"]
            if red == "roll":
                # Per-channel sum over the W column groups via a cyclic lane-roll
                # doubling tree (direction-independent, exact).
                step = layer["chan"]
                while step < wc:
                    s1 = s1 + pltpu.roll(s1, step, axis=1)
                    s2 = s2 + pltpu.roll(s2, step, axis=1)
                    step *= 2
            elif red == "matmul":
                proj = op(layer["proj"]).astype(jnp.float32)  # exact 0/1
                s1 = jnp.dot(s1, proj, preferred_element_type=jnp.float32)
                s2 = jnp.dot(s2, proj, preferred_element_type=jnp.float32)
            inv_n = layer["inv_count"]
            mean = s1 * inv_n
            var = jnp.maximum(s2 * inv_n - mean * mean, 0.0)
            act = jnp.maximum((conv - mean) * jax.lax.rsqrt(var + _BN_EPS), 0.0)
        else:
            act = jnp.tanh(conv + op(layer["bias"]).astype(jnp.float32))

        # --- encoder 2x2 maxpool: 4 selection dots.  Pushing max through r0/r1
        # is valid ONLY because they are exact 0/1 single-entry row selections.
        if layer["post"] == "pool":
            d = jnp.maximum(mxu(act, op(layer["pc0"])), mxu(act, op(layer["pc1"])))
            act = jnp.maximum(mxu(op(layer["pr0"]), d), mxu(op(layer["pr1"]), d))

    o_ref[...] = act                                         # (N*H, W*2)


def make_generator_forward(params, *, batch, height, width):
    roll_sign = _probe_sublane_roll()
    lane_roll_ok = _probe_lane_roll()
    plan, pk = build_generator_program(params, batch=batch, height=height,
                                       width=width, roll_sign=roll_sign,
                                       lane_roll_ok=lane_roll_ok)
    ops, slots = pk.finish()

    m_out = batch * plan["out_h"]
    k_out = plan["out_w"] * plan["out_c"]

    # Gridless pallas_call: single VMEM residency, no pointless double-buffering.
    fused = pl.pallas_call(
        functools.partial(_generator_kernel, plan=plan, slots=slots),
        out_shape=jax.ShapeDtypeStruct((m_out, k_out), jnp.float32),
    )

    def forward(x_nchw, ops_arr):
        n, cin, h, w = x_nchw.shape
        # NCHW -> (N*H, W*Cin) layout; the only XLA glue in the whole forward.
        x2d = jnp.transpose(x_nchw, (0, 2, 3, 1)).astype(jnp.float32)
        x2d = x2d.reshape(n * h, w * cin)
        y2d = fused(x2d, ops_arr)
        y = y2d.reshape(n, plan["out_h"], plan["out_w"], plan["out_c"])
        return jnp.transpose(y, (0, 3, 1, 2))               # back to NCHW

    return forward, ops


# ----------------------------------------------------------------------------
# Pure-JAX reference (test-only) mirroring the PyTorch module.
# ----------------------------------------------------------------------------
def _reference_forward(x_nchw, params):
    hp = jax.lax.Precision.HIGHEST
    x = jnp.transpose(x_nchw, (0, 2, 3, 1)).astype(jnp.float32)

    def conv3x3(x, wk, bk):
        n, h, w, _ = x.shape
        xp = jnp.pad(x, ((0, 0), (1, 1), (1, 1), (0, 0)))
        taps = [xp[:, dy:dy + h, dx:dx + w, :] for dy in range(3) for dx in range(3)]
        patches = jnp.concatenate(taps, axis=-1)
        wmat = wk.reshape(9 * wk.shape[2], wk.shape[3])
        return jnp.einsum("nhwk,kc->nhwc", patches, wmat, precision=hp) + bk

    def bn_relu(x):
        mean = jnp.mean(x, axis=(0, 1, 2), keepdims=True)
        var = jnp.mean((x - mean) ** 2, axis=(0, 1, 2), keepdims=True)
        return jnp.maximum((x - mean) * jax.lax.rsqrt(var + _BN_EPS), 0.0)

    def maxpool(x):
        n, h, w, c = x.shape
        return jnp.max(x.reshape(n, h // 2, 2, w // 2, 2, c), axis=(2, 4))

    def upsample(x):
        return jnp.repeat(jnp.repeat(x, 2, axis=1), 2, axis=2)

    for li in range(4):
        wk, bk = params[li]
        x = maxpool(bn_relu(conv3x3(x, wk, bk)))
    for li in range(4, 8):
        wk, bk = params[li]
        x = upsample(bn_relu(conv3x3(x, wk, bk)))
    wk, bk = params[8]
    x = jnp.tanh(conv3x3(x, wk, bk))
    return jnp.transpose(x, (0, 3, 1, 2))


if __name__ == "__main__":
    key = jax.random.PRNGKey(0)
    key, kx = jax.random.split(key)

    # 1 input channel, spatial 16 (divisible by 2**4 for the four maxpools).
    x = jax.random.normal(kx, (2, 1, 16, 16), dtype=jnp.float32)
    params = init_params(key)

    forward, ops = make_generator_forward(params, batch=2, height=16, width=16)
    fwd = jax.jit(forward)
    out = jax.block_until_ready(fwd(x, ops))

    assert out.shape == (2, 2, 16, 16), out.shape
    assert bool(jnp.all(jnp.isfinite(out)))
    assert bool(jnp.all(jnp.abs(out) <= 1.0 + 1e-6))        # tanh output range

    ref = jax.block_until_ready(_reference_forward(x, params))
    max_err = float(jnp.max(jnp.abs(out - ref)))
    rel_err = float(jnp.linalg.norm(out - ref) / jnp.linalg.norm(ref))
    # bf16 MXU operands give ~1e-2-scale deviations vs the f32 reference, and the
    # 2-sample BN at the 1x1 bottleneck can amplify rounding on unlucky channels;
    # structural bugs produce O(1) errors, so these bounds still catch them.
    assert max_err < 2.5e-1, max_err
    assert rel_err < 8.0e-2, rel_err

    print("KERNEL_OK")
</pallas_src>

<mosaic_0001>
module attributes {stable_mosaic.version = 11 : i64} {
  func.func @_generator_kernel(%arg0: memref<32x16xf32, #tpu.memory_space<vmem>>, %arg1: memref<1008x384xbf16, #tpu.memory_space<vmem>>, %arg2: memref<32x32xf32, #tpu.memory_space<vmem>>) attributes {dimension_semantics = [], scalar_prefetch = 0 : i64, scratch_operands = 0 : i64, tpu.core_type = #tpu.core_type<tc>} {
    %c0 = arith.constant 0 : index
    %c0_0 = arith.constant 0 : index
    %0 = vector.load %arg0[%c0, %c0_0] : memref<32x16xf32, #tpu.memory_space<vmem>>, vector<32x16xf32>
    %c0_1 = arith.constant 0 : index
    %c0_2 = arith.constant 0 : index
    %1 = vector.load %arg1[%c0_1, %c0_2] : memref<1008x384xbf16, #tpu.memory_space<vmem>>, vector<16x384xbf16>
    %2 = arith.truncf %0 : vector<32x16xf32> to vector<32x16xbf16>
    %cst = arith.constant dense<0.000000e+00> : vector<32x384xf32>
    %3 = tpu.matmul %2, %1, %cst {dimension_numbers = #tpu.dot_dimension_numbers<[1], [0], [0], [1], [0, 0, 1, 1], [], []>} : vector<32x16xbf16>, vector<16x384xbf16>, vector<32x384xf32> -> vector<32x384xf32>
    %4 = vector.extract_strided_slice %3 {offsets = [0, 0], sizes = [32, 128], strides = [1, 1]} : vector<32x384xf32> to vector<32x128xf32>
    %5 = vector.extract_strided_slice %3 {offsets = [0, 128], sizes = [32, 128], strides = [1, 1]} : vector<32x384xf32> to vector<32x128xf32>
    %6 = vector.extract_strided_slice %3 {offsets = [0, 256], sizes = [32, 128], strides = [1, 1]} : vector<32x384xf32> to vector<32x128xf32>
    %c720 = arith.constant 720 : index
    %c128 = arith.constant 128 : index
    %7 = vector.load %arg1[%c720, %c128] : memref<1008x384xbf16, #tpu.memory_space<vmem>>, vector<32x32xbf16>
    %8 = arith.truncf %4 : vector<32x128xf32> to vector<32x128xbf16>
    %cst_3 = arith.constant dense<0.000000e+00> : vector<32x128xf32>
    %9 = tpu.matmul %7, %8, %cst_3 {dimension_numbers = #tpu.dot_dimension_numbers<[1], [0], [0], [1], [0, 0, 1, 1], [], []>} : vector<32x32xbf16>, vector<32x128xbf16>, vector<32x128xf32> -> vector<32x128xf32>
    %10 = arith.addf %9, %5 : vector<32x128xf32>
    %c720_4 = arith.constant 720 : index
    %c256 = arith.constant 256 : index
    %11 = vector.load %arg1[%c720_4, %c256] : memref<1008x384xbf16, #tpu.memory_space<vmem>>, vector<32x32xbf16>
    %12 = arith.truncf %6 : vector<32x128xf32> to vector<32x128xbf16>
    %cst_5 = arith.constant dense<0.000000e+00> : vector<32x128xf32>
    %13 = tpu.matmul %11, %12, %cst_5 {dimension_numbers = #tpu.dot_dimension_numbers<[1], [0], [0], [1], [0, 0, 1, 1], [], []>} : vector<32x32xbf16>, vector<32x128xbf16>, vector<32x128xf32> -> vector<32x128xf32>
    %14 = arith.addf %10, %13 : vector<32x128xf32>
    %cst_6 = arith.constant dense<0.000000e+00> : vector<128xf32>
    %15 = vector.multi_reduction <add>, %14, %cst_6 [0] : vector<32x128xf32> to vector<128xf32>
    %16 = vector.shape_cast %15 : vector<128xf32> to vector<1x128xf32>
    %17 = arith.mulf %14, %14 : vector<32x128xf32>
    %cst_7 = arith.constant dense<0.000000e+00> : vector<128xf32>
    %18 = vector.multi_reduction <add>, %17, %cst_7 [0] : vector<32x128xf32> to vector<128xf32>
    %19 = vector.shape_cast %18 : vector<128xf32> to vector<1x128xf32>
    %c208 = arith.constant 208 : index
    %c0_8 = arith.constant 0 : index
    %20 = vector.load %arg1[%c208, %c0_8] : memref<1008x384xbf16, #tpu.memory_space<vmem>>, vector<128x128xbf16>
    %21 = arith.extf %20 : vector<128x128xbf16> to vector<128x128xf32>
    %cst_9 = arith.constant dense<0.000000e+00> : vector<1x128xf32>
    %22 = tpu.matmul %16, %21, %cst_9 {dimension_numbers = #tpu.dot_dimension_numbers<[1], [0], [0], [1], [0, 0, 1, 1], [], []>} : vector<1x128xf32>, vector<128x128xf32>, vector<1x128xf32> -> vector<1x128xf32>
    %cst_10 = arith.constant dense<0.000000e+00> : vector<1x128xf32>
    %23 = tpu.matmul %19, %21, %cst_10 {dimension_numbers = #tpu.dot_dimension_numbers<[1], [0], [0], [1], [0, 0, 1, 1], [], []>} : vector<1x128xf32>, vector<128x128xf32>, vector<1x128xf32> -> vector<1x128xf32>
    %cst_11 = arith.constant 0.001953125 : f32
    %24 = vector.broadcast %cst_11 : f32 to vector<1x128xf32>
    %25 = arith.mulf %22, %24 : vector<1x128xf32>
    %cst_12 = arith.constant 0.001953125 : f32
    %26 = vector.broadcast %cst_12 : f32 to vector<1x128xf32>
    %27 = arith.mulf %23, %26 : vector<1x128xf32>
    %28 = arith.mulf %25, %25 : vector<1x128xf32>
    %29 = arith.subf %27, %28 : vector<1x128xf32>
    %cst_13 = arith.constant 0.000000e+00 : f32
    %30 = vector.broadcast %cst_13 : f32 to vector<1x128xf32>
    %31 = arith.maximumf %29, %30 : vector<1x128xf32>
    %32 = vector.broadcast %25 : vector<1x128xf32> to vector<32x128xf32>
    %33 = arith.subf %14, %32 : vector<32x128xf32>
    %cst_14 = arith.constant 9.99999974E-6 : f32
    %34 = vector.broadcast %cst_14 : f32 to vector<1x128xf32>
    %35 = arith.addf %31, %34 : vector<1x128xf32>
    %36 = math.rsqrt %35 : vector<1x128xf32>
    %37 = vector.broadcast %36 : vector<1x128xf32> to vector<32x128xf32>
    %38 = arith.mulf %33, %37 : vector<32x128xf32>
    %cst_15 = arith.constant 0.000000e+00 : f32
    %39 = vector.broadcast %cst_15 : f32 to vector<32x128xf32>
    %40 = arith.maximumf %38, %39 : vector<32x128xf32>
    %c208_16 = arith.constant 208 : index
    %c128_17 = arith.constant 128 : index
    %41 = vector.load %arg1[%c208_16, %c128_17] : memref<1008x384xbf16, #tpu.memory_space<vmem>>, vector<128x64xbf16>
    %42 = arith.truncf %40 : vector<32x128xf32> to vector<32x128xbf16>
    %cst_18 = arith.constant dense<0.000000e+00> : vector<32x64xf32>
    %43 = tpu.matmul %42, %41, %cst_18 {dimension_numbers = #tpu.dot_dimension_numbers<[1], [0], [0], [1], [0, 0, 1, 1], [], []>} : vector<32x128xbf16>, vector<128x64xbf16>, vector<32x64xf32> -> vector<32x64xf32>
    %c208_19 = arith.constant 208 : index
    %c256_20 = arith.constant 256 : index
    %44 = vector.load %arg1[%c208_19, %c256_20] : memref<1008x384xbf16, #tpu.memory_space<vmem>>, vector<128x64xbf16>
    %45 = arith.truncf %40 : vector<32x128xf32> to vector<32x128xbf16>
    %cst_21 = arith.constant dense<0.000000e+00> : vector<32x64xf32>
    %46 = tpu.matmul %45, %44, %cst_21 {dimension_numbers = #tpu.dot_dimension_numbers<[1], [0], [0], [1], [0, 0, 1, 1], [], []>} : vector<32x128xbf16>, vector<128x64xbf16>, vector<32x64xf32> -> vector<32x64xf32>
    %47 = arith.maximumf %43, %46 : vector<32x64xf32>
    %c848 = arith.constant 848 : index
    %c256_22 = arith.constant 256 : index
    %48 = vector.load %arg1[%c848, %c256_22] : memref<1008x384xbf16, #tpu.memory_space<vmem>>, vector<16x32xbf16>
    %49 = arith.truncf %47 : vector<32x64xf32> to vector<32x64xbf16>
    %cst_23 = arith.constant dense<0.000000e+00> : vector<16x64xf32>
    %50 = tpu.matmul %48, %49, %cst_23 {dimension_numbers = #tpu.dot_dimension_numbers<[1], [0], [0], [1], [0, 0, 1, 1], [], []>} : vector<16x32xbf16>, vector<32x64xbf16>, vector<16x64xf32> -> vector<16x64xf32>
    %c864 = arith.constant 864 : index
    %c256_24 = arith.constant 256 : index
    %51 = vector.load %arg1[%c864, %c256_24] : memref<1008x384xbf16, #tpu.memory_space<vmem>>, vector<16x32xbf16>
    %52 = arith.truncf %47 : vector<32x64xf32> to vector<32x64xbf16>
    %cst_25 = arith.constant dense<0.000000e+00> : vector<16x64xf32>
    %53 = tpu.matmul %51, %52, %cst_25 {dimension_numbers = #tpu.dot_dimension_numbers<[1], [0], [0], [1], [0, 0, 1, 1], [], []>} : vector<16x32xbf16>, vector<32x64xbf16>, vector<16x64xf32> -> vector<16x64xf32>
    %54 = arith.maximumf %50, %53 : vector<16x64xf32>
    %c16 = arith.constant 16 : index
    %c0_26 = arith.constant 0 : index
    %55 = vector.load %arg1[%c16, %c0_26] : memref<1008x384xbf16, #tpu.memory_space<vmem>>, vector<64x384xbf16>
    %56 = arith.truncf %54 : vector<16x64xf32> to vector<16x64xbf16>
    %cst_27 = arith.constant dense<0.000000e+00> : vector<16x384xf32>
    %57 = tpu.matmul %56, %55, %cst_27 {dimension_numbers = #tpu.dot_dimension_numbers<[1], [0], [0], [1], [0, 0, 1, 1], [], []>} : vector<16x64xbf16>, vector<64x384xbf16>, vector<16x384xf32> -> vector<16x384xf32>
    %58 = vector.extract_strided_slice %57 {offsets = [0, 0], sizes = [16, 128], strides = [1, 1]} : vector<16x384xf32> to vector<16x128xf32>
    %59 = vector.extract_strided_slice %57 {offsets = [0, 128], sizes = [16, 128], strides = [1, 1]} : vector<16x384xf32> to vector<16x128xf32>
    %60 = vector.extract_strided_slice %57 {offsets = [0, 256], sizes = [16, 128], strides = [1, 1]} : vector<16x384xf32> to vector<16x128xf32>
    %c880 = arith.constant 880 : index
    %c0_28 = arith.constant 0 : index
    %61 = vector.load %arg1[%c880, %c0_28] : memref<1008x384xbf16, #tpu.memory_space<vmem>>, vector<16x16xbf16>
    %62 = arith.truncf %58 : vector<16x128xf32> to vector<16x128xbf16>
    %cst_29 = arith.constant dense<0.000000e+00> : vector<16x128xf32>
    %63 = tpu.matmul %61, %62, %cst_29 {dimension_numbers = #tpu.dot_dimension_numbers<[1], [0], [0], [1], [0, 0, 1, 1], [], []>} : vector<16x16xbf16>, vector<16x128xbf16>, vector<16x128xf32> -> vector<16x128xf32>
    %64 = arith.addf %63, %59 : vector<16x128xf32>
    %c880_30 = arith.constant 880 : index
    %c128_31 = arith.constant 128 : index
    %65 = vector.load %arg1[%c880_30, %c128_31] : memref<1008x384xbf16, #tpu.memory_space<vmem>>, vector<16x16xbf16>
    %66 = arith.truncf %60 : vector<16x128xf32> to vector<16x128xbf16>
    %cst_32 = arith.constant dense<0.000000e+00> : vector<16x128xf32>
    %67 = tpu.matmul %65, %66, %cst_32 {dimension_numbers = #tpu.dot_dimension_numbers<[1], [0], [0], [1], [0, 0, 1, 1], [], []>} : vector<16x16xbf16>, vector<16x128xbf16>, vector<16x128xf32> -> vector<16x128xf32>
    %68 = arith.addf %64, %67 : vector<16x128xf32>
    %cst_33 = arith.constant dense<0.000000e+00> : vector<128xf32>
    %69 = vector.multi_reduction <add>, %68, %cst_33 [0] : vector<16x128xf32> to vector<128xf32>
    %70 = vector.shape_cast %69 : vector<128xf32> to vector<1x128xf32>
    %71 = arith.mulf %68, %68 : vector<16x128xf32>
    %cst_34 = arith.constant dense<0.000000e+00> : vector<128xf32>
    %72 = vector.multi_reduction <add>, %71, %cst_34 [0] : vector<16x128xf32> to vector<128xf32>
    %73 = vector.shape_cast %72 : vector<128xf32> to vector<1x128xf32>
    %c336 = arith.constant 336 : index
    %c0_35 = arith.constant 0 : index
    %74 = vector.load %arg1[%c336, %c0_35] : memref<1008x384xbf16, #tpu.memory_space<vmem>>, vector<128x128xbf16>
    %75 = arith.extf %74 : vector<128x128xbf16> to vector<128x128xf32>
    %cst_36 = arith.constant dense<0.000000e+00> : vector<1x128xf32>
    %76 = tpu.matmul %70, %75, %cst_36 {dimension_numbers = #tpu.dot_dimension_numbers<[1], [0], [0], [1], [0, 0, 1, 1], [], []>} : vector<1x128xf32>, vector<128x128xf32>, vector<1x128xf32> -> vector<1x128xf32>
    %cst_37 = arith.constant dense<0.000000e+00> : vector<1x128xf32>
    %77 = tpu.matmul %73, %75, %cst_37 {dimension_numbers = #tpu.dot_dimension_numbers<[1], [0], [0], [1], [0, 0, 1, 1], [], []>} : vector<1x128xf32>, vector<128x128xf32>, vector<1x128xf32> -> vector<1x128xf32>
    %cst_38 = arith.constant 7.812500e-03 : f32
    %78 = vector.broadcast %cst_38 : f32 to vector<1x128xf32>
    %79 = arith.mulf %76, %78 : vector<1x128xf32>
    %cst_39 = arith.constant 7.812500e-03 : f32
    %80 = vector.broadcast %cst_39 : f32 to vector<1x128xf32>
    %81 = arith.mulf %77, %80 : vector<1x128xf32>
    %82 = arith.mulf %79, %79 : vector<1x128xf32>
    %83 = arith.subf %81, %82 : vector<1x128xf32>
    %cst_40 = arith.constant 0.000000e+00 : f32
    %84 = vector.broadcast %cst_40 : f32 to vector<1x128xf32>
    %85 = arith.maximumf %83, %84 : vector<1x128xf32>
    %86 = vector.broadcast %79 : vector<1x128xf32> to vector<16x128xf32>
    %87 = arith.subf %68, %86 : vector<16x128xf32>
    %cst_41 = arith.constant 9.99999974E-6 : f32
    %88 = vector.broadcast %cst_41 : f32 to vector<1x128xf32>
    %89 = arith.addf %85, %88 : vector<1x128xf32>
    %90 = math.rsqrt %89 : vector<1x128xf32>
    %91 = vector.broadcast %90 : vector<1x128xf32> to vector<16x128xf32>
    %92 = arith.mulf %87, %91 : vector<16x128xf32>
    %cst_42 = arith.constant 0.000000e+00 : f32
    %93 = vector.broadcast %cst_42 : f32 to vector<16x128xf32>
    %94 = arith.maximumf %92, %93 : vector<16x128xf32>
    %c336_43 = arith.constant 336 : index
    %c128_44 = arith.constant 128 : index
    %95 = vector.load %arg1[%c336_43, %c128_44] : memref<1008x384xbf16, #tpu.memory_space<vmem>>, vector<128x64xbf16>
    %96 = arith.truncf %94 : vector<16x128xf32> to vector<16x128xbf16>
    %cst_45 = arith.constant dense<0.000000e+00> : vector<16x64xf32>
    %97 = tpu.matmul %96, %95, %cst_45 {dimension_numbers = #tpu.dot_dimension_numbers<[1], [0], [0], [1], [0, 0, 1, 1], [], []>} : vector<16x128xbf16>, vector<128x64xbf16>, vector<16x64xf32> -> vector<16x64xf32>
    %c336_46 = arith.constant 336 : index
    %c256_47 = arith.constant 256 : index
    %98 = vector.load %arg1[%c336_46, %c256_47] : memref<1008x384xbf16, #tpu.memory_space<vmem>>, vector<128x64xbf16>
    %99 = arith.truncf %94 : vector<16x128xf32> to vector<16x128xbf16>
    %cst_48 = arith.constant dense<0.000000e+00> : vector<16x64xf32>
    %100 = tpu.matmul %99, %98, %cst_48 {dimension_numbers = #tpu.dot_dimension_numbers<[1], [0], [0], [1], [0, 0, 1, 1], [], []>} : vector<16x128xbf16>, vector<128x64xbf16>, vector<16x64xf32> -> vector<16x64xf32>
    %101 = arith.maximumf %97, %100 : vector<16x64xf32>
    %c896 = arith.constant 896 : index
    %c256_49 = arith.constant 256 : index
    %102 = vector.load %arg1[%c896, %c256_49] : memref<1008x384xbf16, #tpu.memory_space<vmem>>, vector<8x16xbf16>
    %103 = arith.truncf %101 : vector<16x64xf32> to vector<16x64xbf16>
    %cst_50 = arith.constant dense<0.000000e+00> : vector<8x64xf32>
    %104 = tpu.matmul %102, %103, %cst_50 {dimension_numbers = #tpu.dot_dimension_numbers<[1], [0], [0], [1], [0, 0, 1, 1], [], []>} : vector<8x16xbf16>, vector<16x64xbf16>, vector<8x64xf32> -> vector<8x64xf32>
    %c912 = arith.constant 912 : index
    %c0_51 = arith.constant 0 : index
    %105 = vector.load %arg1[%c912, %c0_51] : memref<1008x384xbf16, #tpu.memory_space<vmem>>, vector<8x16xbf16>
    %106 = arith.truncf %101 : vector<16x64xf32> to vector<16x64xbf16>
    %cst_52 = arith.constant dense<0.000000e+00> : vector<8x64xf32>
    %107 = tpu.matmul %105, %106, %cst_52 {dimension_numbers = #tpu.dot_dimension_numbers<[1], [0], [0], [1], [0, 0, 1, 1], [], []>} : vector<8x16xbf16>, vector<16x64xbf16>, vector<8x64xf32> -> vector<8x64xf32>
    %108 = arith.maximumf %104, %107 : vector<8x64xf32>
    %c80 = arith.constant 80 : index
    %c0_53 = arith.constant 0 : index
    %109 = vector.load %arg1[%c80, %c0_53] : memref<1008x384xbf16, #tpu.memory_space<vmem>>, vector<64x384xbf16>
    %110 = arith.truncf %108 : vector<8x64xf32> to vector<8x64xbf16>
    %cst_54 = arith.constant dense<0.000000e+00> : vector<8x384xf32>
    %111 = tpu.matmul %110, %109, %cst_54 {dimension_numbers = #tpu.dot_dimension_numbers<[1], [0], [0], [1], [0, 0, 1, 1], [], []>} : vector<8x64xbf16>, vector<64x384xbf16>, vector<8x384xf32> -> vector<8x384xf32>
    %112 = vector.extract_strided_slice %111 {offsets = [0, 0], sizes = [8, 128], strides = [1, 1]} : vector<8x384xf32> to vector<8x128xf32>
    %113 = vector.extract_strided_slice %111 {offsets = [0, 128], sizes = [8, 128], strides = [1, 1]} : vector<8x384xf32> to vector<8x128xf32>
    %114 = vector.extract_strided_slice %111 {offsets = [0, 256], sizes = [8, 128], strides = [1, 1]} : vector<8x384xf32> to vector<8x128xf32>
    %c912_55 = arith.constant 912 : index
    %c128_56 = arith.constant 128 : index
    %115 = vector.load %arg1[%c912_55, %c128_56] : memref<1008x384xbf16, #tpu.memory_space<vmem>>, vector<8x8xbf16>
    %116 = arith.truncf %112 : vector<8x128xf32> to vector<8x128xbf16>
    %cst_57 = arith.constant dense<0.000000e+00> : vector<8x128xf32>
    %117 = tpu.matmul %115, %116, %cst_57 {dimension_numbers = #tpu.dot_dimension_numbers<[1], [0], [0], [1], [0, 0, 1, 1], [], []>} : vector<8x8xbf16>, vector<8x128xbf16>, vector<8x128xf32> -> vector<8x128xf32>
    %118 = arith.addf %117, %113 : vector<8x128xf32>
    %c912_58 = arith.constant 912 : index
    %c256_59 = arith.constant 256 : index
    %119 = vector.load %arg1[%c912_58, %c256_59] : memref<1008x384xbf16, #tpu.memory_space<vmem>>, vector<8x8xbf16>
    %120 = arith.truncf %114 : vector<8x128xf32> to vector<8x128xbf16>
    %cst_60 = arith.constant dense<0.000000e+00> : vector<8x128xf32>
    %121 = tpu.matmul %119, %120, %cst_60 {dimension_numbers = #tpu.dot_dimension_numbers<[1], [0], [0], [1], [0, 0, 1, 1], [], []>} : vector<8x8xbf16>, vector<8x128xbf16>, vector<8x128xf32> -> vector<8x128xf32>
    %122 = arith.addf %118, %121 : vector<8x128xf32>
    %cst_61 = arith.constant dense<0.000000e+00> : vector<128xf32>
    %123 = vector.multi_reduction <add>, %122, %cst_61 [0] : vector<8x128xf32> to vector<128xf32>
    %124 = vector.shape_cast %123 : vector<128xf32> to vector<1x128xf32>
    %125 = arith.mulf %122, %122 : vector<8x128xf32>
    %cst_62 = arith.constant dense<0.000000e+00> : vector<128xf32>
    %126 = vector.multi_reduction <add>, %125, %cst_62 [0] : vector<8x128xf32> to vector<128xf32>
    %127 = vector.shape_cast %126 : vector<128xf32> to vector<1x128xf32>
    %c464 = arith.constant 464 : index
    %c0_63 = arith.constant 0 : index
    %128 = vector.load %arg1[%c464, %c0_63] : memref<1008x384xbf16, #tpu.memory_space<vmem>>, vector<128x128xbf16>
    %129 = arith.extf %128 : vector<128x128xbf16> to vector<128x128xf32>
    %cst_64 = arith.constant dense<0.000000e+00> : vector<1x128xf32>
    %130 = tpu.matmul %124, %129, %cst_64 {dimension_numbers = #tpu.dot_dimension_numbers<[1], [0], [0], [1], [0, 0, 1, 1], [], []>} : vector<1x128xf32>, vector<128x128xf32>, vector<1x128xf32> -> vector<1x128xf32>
    %cst_65 = arith.constant dense<0.000000e+00> : vector<1x128xf32>
    %131 = tpu.matmul %127, %129, %cst_65 {dimension_numbers = #tpu.dot_dimension_numbers<[1], [0], [0], [1], [0, 0, 1, 1], [], []>} : vector<1x128xf32>, vector<128x128xf32>, vector<1x128xf32> -> vector<1x128xf32>
    %cst_66 = arith.constant 3.125000e-02 : f32
    %132 = vector.broadcast %cst_66 : f32 to vector<1x128xf32>
    %133 = arith.mulf %130, %132 : vector<1x128xf32>
    %cst_67 = arith.constant 3.125000e-02 : f32
    %134 = vector.broadcast %cst_67 : f32 to vector<1x128xf32>
    %135 = arith.mulf %131, %134 : vector<1x128xf32>
    %136 = arith.mulf %133, %133 : vector<1x128xf32>
    %137 = arith.subf %135, %136 : vector<1x128xf32>
    %cst_68 = arith.constant 0.000000e+00 : f32
    %138 = vector.broadcast %cst_68 : f32 to vector<1x128xf32>
    %139 = arith.maximumf %137, %138 : vector<1x128xf32>
    %140 = vector.broadcast %133 : vector<1x128xf32> to vector<8x128xf32>
    %141 = arith.subf %122, %140 : vector<8x128xf32>
    %cst_69 = arith.constant 9.99999974E-6 : f32
    %142 = vector.broadcast %cst_69 : f32 to vector<1x128xf32>
    %143 = arith.addf %139, %142 : vector<1x128xf32>
    %144 = math.rsqrt %143 : vector<1x128xf32>
    %145 = vector.broadcast %144 : vector<1x128xf32> to vector<8x128xf32>
    %146 = arith.mulf %141, %145 : vector<8x128xf32>
    %cst_70 = arith.constant 0.000000e+00 : f32
    %147 = vector.broadcast %cst_70 : f32 to vector<8x128xf32>
    %148 = arith.maximumf %146, %147 : vector<8x128xf32>
    %c464_71 = arith.constant 464 : index
    %c128_72 = arith.constant 128 : index
    %149 = vector.load %arg1[%c464_71, %c128_72] : memref<1008x384xbf16, #tpu.memory_space<vmem>>, vector<128x64xbf16>
    %150 = arith.truncf %148 : vector<8x128xf32> to vector<8x128xbf16>
    %cst_73 = arith.constant dense<0.000000e+00> : vector<8x64xf32>
    %151 = tpu.matmul %150, %149, %cst_73 {dimension_numbers = #tpu.dot_dimension_numbers<[1], [0], [0], [1], [0, 0, 1, 1], [], []>} : vector<8x128xbf16>, vector<128x64xbf16>, vector<8x64xf32> -> vector<8x64xf32>
    %c464_74 = arith.constant 464 : index
    %c256_75 = arith.constant 256 : index
    %152 = vector.load %arg1[%c464_74, %c256_75] : memref<1008x384xbf16, #tpu.memory_space<vmem>>, vector<128x64xbf16>
    %153 = arith.truncf %148 : vector<8x128xf32> to vector<8x128xbf16>
    %cst_76 = arith.constant dense<0.000000e+00> : vector<8x64xf32>
    %154 = tpu.matmul %153, %152, %cst_76 {dimension_numbers = #tpu.dot_dimension_numbers<[1], [0], [0], [1], [0, 0, 1, 1], [], []>} : vector<8x128xbf16>, vector<128x64xbf16>, vector<8x64xf32> -> vector<8x64xf32>
    %155 = arith.maximumf %151, %154 : vector<8x64xf32>
    %c944 = arith.constant 944 : index
    %c0_77 = arith.constant 0 : index
    %156 = vector.load %arg1[%c944, %c0_77] : memref<1008x384xbf16, #tpu.memory_space<vmem>>, vector<4x8xbf16>
    %157 = arith.truncf %155 : vector<8x64xf32> to vector<8x64xbf16>
    %cst_78 = arith.constant dense<0.000000e+00> : vector<4x64xf32>
    %158 = tpu.matmul %156, %157, %cst_78 {dimension_numbers = #tpu.dot_dimension_numbers<[1], [0], [0], [1], [0, 0, 1, 1], [], []>} : vector<4x8xbf16>, vector<8x64xbf16>, vector<4x64xf32> -> vector<4x64xf32>
    %c944_79 = arith.constant 944 : index
    %c128_80 = arith.constant 128 : index
    %159 = vector.load %arg1[%c944_79, %c128_80] : memref<1008x384xbf16, #tpu.memory_space<vmem>>, vector<4x8xbf16>
    %160 = arith.truncf %155 : vector<8x64xf32> to vector<8x64xbf16>
    %cst_81 = arith.constant dense<0.000000e+00> : vector<4x64xf32>
    %161 = tpu.matmul %159, %160, %cst_81 {dimension_numbers = #tpu.dot_dimension_numbers<[1], [0], [0], [1], [0, 0, 1, 1], [], []>} : vector<4x8xbf16>, vector<8x64xbf16>, vector<4x64xf32> -> vector<4x64xf32>
    %162 = arith.maximumf %158, %161 : vector<4x64xf32>
    %c144 = arith.constant 144 : index
    %c0_82 = arith.constant 0 : index
    %163 = vector.load %arg1[%c144, %c0_82] : memref<1008x384xbf16, #tpu.memory_space<vmem>>, vector<64x384xbf16>
    %164 = arith.truncf %162 : vector<4x64xf32> to vector<4x64xbf16>
    %cst_83 = arith.constant dense<0.000000e+00> : vector<4x384xf32>
    %165 = tpu.matmul %164, %163, %cst_83 {dimension_numbers = #tpu.dot_dimension_numbers<[1], [0], [0], [1], [0, 0, 1, 1], [], []>} : vector<4x64xbf16>, vector<64x384xbf16>, vector<4x384xf32> -> vector<4x384xf32>
    %166 = vector.extract_strided_slice %165 {offsets = [0, 0], sizes = [4, 128], strides = [1, 1]} : vector<4x384xf32> to vector<4x128xf32>
    %167 = vector.extract_strided_slice %165 {offsets = [0, 128], sizes = [4, 128], strides = [1, 1]} : vector<4x384xf32> to vector<4x128xf32>
    %168 = vector.extract_strided_slice %165 {offsets = [0, 256], sizes = [4, 128], strides = [1, 1]} : vector<4x384xf32> to vector<4x128xf32>
    %c944_84 = arith.constant 944 : index
    %c256_85 = arith.constant 256 : index
    %169 = vector.load %arg1[%c944_84, %c256_85] : memref<1008x384xbf16, #tpu.memory_space<vmem>>, vector<4x4xbf16>
    %170 = arith.truncf %166 : vector<4x128xf32> to vector<4x128xbf16>
    %cst_86 = arith.constant dense<0.000000e+00> : vector<4x128xf32>
    %171 = tpu.matmul %169, %170, %cst_86 {dimension_numbers = #tpu.dot_dimension_numbers<[1], [0], [0], [1], [0, 0, 1, 1], [], []>} : vector<4x4xbf16>, vector<4x128xbf16>, vector<4x128xf32> -> vector<4x128xf32>
    %172 = arith.addf %171, %167 : vector<4x128xf32>
    %c960 = arith.constant 960 : index
    %c0_87 = arith.constant 0 : index
    %173 = vector.load %arg1[%c960, %c0_87] : memref<1008x384xbf16, #tpu.memory_space<vmem>>, vector<4x4xbf16>
    %174 = arith.truncf %168 : vector<4x128xf32> to vector<4x128xbf16>
    %cst_88 = arith.constant dense<0.000000e+00> : vector<4x128xf32>
    %175 = tpu.matmul %173, %174, %cst_88 {dimension_numbers = #tpu.dot_dimension_numbers<[1], [0], [0], [1], [0, 0, 1, 1], [], []>} : vector<4x4xbf16>, vector<4x128xbf16>, vector<4x128xf32> -> vector<4x128xf32>
    %176 = arith.addf %172, %175 : vector<4x128xf32>
    %cst_89 = arith.constant dense<0.000000e+00> : vector<128xf32>
    %177 = vector.multi_reduction <add>, %176, %cst_89 [0] : vector<4x128xf32> to vector<128xf32>
    %178 = vector.shape_cast %177 : vector<128xf32> to vector<1x128xf32>
    %179 = arith.mulf %176, %176 : vector<4x128xf32>
    %cst_90 = arith.constant dense<0.000000e+00> : vector<128xf32>
    %180 = vector.multi_reduction <add>, %179, %cst_90 [0] : vector<4x128xf32> to vector<128xf32>
    %181 = vector.shape_cast %180 : vector<128xf32> to vector<1x128xf32>
    %c592 = arith.constant 592 : index
    %c0_91 = arith.constant 0 : index
    %182 = vector.load %arg1[%c592, %c0_91] : memref<1008x384xbf16, #tpu.memory_space<vmem>>, vector<128x128xbf16>
    %183 = arith.extf %182 : vector<128x128xbf16> to vector<128x128xf32>
    %cst_92 = arith.constant dense<0.000000e+00> : vector<1x128xf32>
    %184 = tpu.matmul %178, %183, %cst_92 {dimension_numbers = #tpu.dot_dimension_numbers<[1], [0], [0], [1], [0, 0, 1, 1], [], []>} : vector<1x128xf32>, vector<128x128xf32>, vector<1x128xf32> -> vector<1x128xf32>
    %cst_93 = arith.constant dense<0.000000e+00> : vector<1x128xf32>
    %185 = tpu.matmul %181, %183, %cst_93 {dimension_numbers = #tpu.dot_dimension_numbers<[1], [0], [0], [1], [0, 0, 1, 1], [], []>} : vector<1x128xf32>, vector<128x128xf32>, vector<1x128xf32> -> vector<1x128xf32>
    %cst_94 = arith.constant 1.250000e-01 : f32
    %186 = vector.broadcast %cst_94 : f32 to vector<1x128xf32>
    %187 = arith.mulf %184, %186 : vector<1x128xf32>
    %cst_95 = arith.constant 1.250000e-01 : f32
    %188 = vector.broadcast %cst_95 : f32 to vector<1x128xf32>
    %189 = arith.mulf %185, %188 : vector<1x128xf32>
    %190 = arith.mulf %187, %187 : vector<1x128xf32>
    %191 = arith.subf %189, %190 : vector<1x128xf32>
    %cst_96 = arith.constant 0.000000e+00 : f32
    %192 = vector.broadcast %cst_96 : f32 to vector<1x128xf32>
    %193 = arith.maximumf %191, %192 : vector<1x128xf32>
    %194 = vector.broadcast %187 : vector<1x128xf32> to vector<4x128xf32>
    %195 = arith.subf %176, %194 : vector<4x128xf32>
    %cst_97 = arith.constant 9.99999974E-6 : f32
    %196 = vector.broadcast %cst_97 : f32 to vector<1x128xf32>
    %197 = arith.addf %193, %196 : vector<1x128xf32>
    %198 = math.rsqrt %197 : vector<1x128xf32>
    %199 = vector.broadcast %198 : vector<1x128xf32> to vector<4x128xf32>
    %200 = arith.mulf %195, %199 : vector<4x128xf32>
    %cst_98 = arith.constant 0.000000e+00 : f32
    %201 = vector.broadcast %cst_98 : f32 to vector<4x128xf32>
    %202 = arith.maximumf %200, %201 : vector<4x128xf32>
    %c592_99 = arith.constant 592 : index
    %c128_100 = arith.constant 128 : index
    %203 = vector.load %arg1[%c592_99, %c128_100] : memref<1008x384xbf16, #tpu.memory_space<vmem>>, vector<128x64xbf16>
    %204 = arith.truncf %202 : vector<4x128xf32> to vector<4x128xbf16>
    %cst_101 = arith.constant dense<0.000000e+00> : vector<4x64xf32>
    %205 = tpu.matmul %204, %203, %cst_101 {dimension_numbers = #tpu.dot_dimension_numbers<[1], [0], [0], [1], [0, 0, 1, 1], [], []>} : vector<4x128xbf16>, vector<128x64xbf16>, vector<4x64xf32> -> vector<4x64xf32>
    %c592_102 = arith.constant 592 : index
    %c256_103 = arith.constant 256 : index
    %206 = vector.load %arg1[%c592_102, %c256_103] : memref<1008x384xbf16, #tpu.memory_space<vmem>>, vector<128x64xbf16>
    %207 = arith.truncf %202 : vector<4x128xf32> to vector<4x128xbf16>
    %cst_104 = arith.constant dense<0.000000e+00> : vector<4x64xf32>
    %208 = tpu.matmul %207, %206, %cst_104 {dimension_numbers = #tpu.dot_dimension_numbers<[1], [0], [0], [1], [0, 0, 1, 1], [], []>} : vector<4x128xbf16>, vector<128x64xbf16>, vector<4x64xf32> -> vector<4x64xf32>
    %209 = arith.maximumf %205, %208 : vector<4x64xf32>
    %c976 = arith.constant 976 : index
    %c128_105 = arith.constant 128 : index
    %210 = vector.load %arg1[%c976, %c128_105] : memref<1008x384xbf16, #tpu.memory_space<vmem>>, vector<2x4xbf16>
    %211 = arith.truncf %209 : vector<4x64xf32> to vector<4x64xbf16>
    %cst_106 = arith.constant dense<0.000000e+00> : vector<2x64xf32>
    %212 = tpu.matmul %210, %211, %cst_106 {dimension_numbers = #tpu.dot_dimension_numbers<[1], [0], [0], [1], [0, 0, 1, 1], [], []>} : vector<2x4xbf16>, vector<4x64xbf16>, vector<2x64xf32> -> vector<2x64xf32>
    %c976_107 = arith.constant 976 : index
    %c256_108 = arith.constant 256 : index
    %213 = vector.load %arg1[%c976_107, %c256_108] : memref<1008x384xbf16, #tpu.memory_space<vmem>>, vector<2x4xbf16>
    %214 = arith.truncf %209 : vector<4x64xf32> to vector<4x64xbf16>
    %cst_109 = arith.constant dense<0.000000e+00> : vector<2x64xf32>
    %215 = tpu.matmul %213, %214, %cst_109 {dimension_numbers = #tpu.dot_dimension_numbers<[1], [0], [0], [1], [0, 0, 1, 1], [], []>} : vector<2x4xbf16>, vector<4x64xbf16>, vector<2x64xf32> -> vector<2x64xf32>
    %216 = arith.maximumf %212, %215 : vector<2x64xf32>
    %c720_110 = arith.constant 720 : index
    %c0_111 = arith.constant 0 : index
    %217 = vector.load %arg1[%c720_110, %c0_111] : memref<1008x384xbf16, #tpu.memory_space<vmem>>, vector<64x32xbf16>
    %218 = arith.truncf %216 : vector<2x64xf32> to vector<2x64xbf16>
    %cst_112 = arith.constant dense<0.000000e+00> : vector<2x32xf32>
    %219 = tpu.matmul %218, %217, %cst_112 {dimension_numbers = #tpu.dot_dimension_numbers<[1], [0], [0], [1], [0, 0, 1, 1], [], []>} : vector<2x64xbf16>, vector<64x32xbf16>, vector<2x32xf32> -> vector<2x32xf32>
    %cst_113 = arith.constant dense<0.000000e+00> : vector<32xf32>
    %220 = vector.multi_reduction <add>, %219, %cst_113 [0] : vector<2x32xf32> to vector<32xf32>
    %221 = vector.shape_cast %220 : vector<32xf32> to vector<1x32xf32>
    %222 = arith.mulf %219, %219 : vector<2x32xf32>
    %cst_114 = arith.constant dense<0.000000e+00> : vector<32xf32>
    %223 = vector.multi_reduction <add>, %222, %cst_114 [0] : vector<2x32xf32> to vector<32xf32>
    %224 = vector.shape_cast %223 : vector<32xf32> to vector<1x32xf32>
    %cst_115 = arith.constant 5.000000e-01 : f32
    %225 = vector.broadcast %cst_115 : f32 to vector<1x32xf32>
    %226 = arith.mulf %221, %225 : vector<1x32xf32>
    %cst_116 = arith.constant 5.000000e-01 : f32
    %227 = vector.broadcast %cst_116 : f32 to vector<1x32xf32>
    %228 = arith.mulf %224, %227 : vector<1x32xf32>
    %229 = arith.mulf %226, %226 : vector<1x32xf32>
    %230 = arith.subf %228, %229 : vector<1x32xf32>
    %cst_117 = arith.constant 0.000000e+00 : f32
    %231 = vector.broadcast %cst_117 : f32 to vector<1x32xf32>
    %232 = arith.maximumf %230, %231 : vector<1x32xf32>
    %233 = vector.broadcast %226 : vector<1x32xf32> to vector<2x32xf32>
    %234 = arith.subf %219, %233 : vector<2x32xf32>
    %cst_118 = arith.constant 9.99999974E-6 : f32
    %235 = vector.broadcast %cst_118 : f32 to vector<1x32xf32>
    %236 = arith.addf %232, %235 : vector<1x32xf32>
    %237 = math.rsqrt %236 : vector<1x32xf32>
    %238 = vector.broadcast %237 : vector<1x32xf32> to vector<2x32xf32>
    %239 = arith.mulf %234, %238 : vector<2x32xf32>
    %cst_119 = arith.constant 0.000000e+00 : f32
    %240 = vector.broadcast %cst_119 : f32 to vector<2x32xf32>
    %241 = arith.maximumf %239, %240 : vector<2x32xf32>
    %c752 = arith.constant 752 : index
    %c128_120 = arith.constant 128 : index
    %242 = vector.load %arg1[%c752, %c128_120] : memref<1008x384xbf16, #tpu.memory_space<vmem>>, vector<32x96xbf16>
    %243 = arith.truncf %241 : vector<2x32xf32> to vector<2x32xbf16>
    %cst_121 = arith.constant dense<0.000000e+00> : vector<2x96xf32>
    %244 = tpu.matmul %243, %242, %cst_121 {dimension_numbers = #tpu.dot_dimension_numbers<[1], [0], [0], [1], [0, 0, 1, 1], [], []>} : vector<2x32xbf16>, vector<32x96xbf16>, vector<2x96xf32> -> vector<2x96xf32>
    %c960_122 = arith.constant 960 : index
    %c128_123 = arith.constant 128 : index
    %245 = vector.load %arg1[%c960_122, %c128_123] : memref<1008x384xbf16, #tpu.memory_space<vmem>>, vector<4x2xbf16>
    %246 = arith.truncf %244 : vector<2x96xf32> to vector<2x96xbf16>
    %cst_124 = arith.constant dense<0.000000e+00> : vector<4x96xf32>
    %247 = tpu.matmul %245, %246, %cst_124 {dimension_numbers = #tpu.dot_dimension_numbers<[1], [0], [0], [1], [0, 0, 1, 1], [], []>} : vector<4x2xbf16>, vector<2x96xbf16>, vector<4x96xf32> -> vector<4x96xf32>
    %248 = vector.extract_strided_slice %247 {offsets = [0, 0], sizes = [4, 32], strides = [1, 1]} : vector<4x96xf32> to vector<4x32xf32>
    %249 = vector.extract_strided_slice %247 {offsets = [0, 32], sizes = [4, 32], strides = [1, 1]} : vector<4x96xf32> to vector<4x32xf32>
    %250 = vector.extract_strided_slice %247 {offsets = [0, 64], sizes = [4, 32], strides = [1, 1]} : vector<4x96xf32> to vector<4x32xf32>
    %c960_125 = arith.constant 960 : index
    %c256_126 = arith.constant 256 : index
    %251 = vector.load %arg1[%c960_125, %c256_126] : memref<1008x384xbf16, #tpu.memory_space<vmem>>, vector<4x4xbf16>
    %252 = arith.truncf %248 : vector<4x32xf32> to vector<4x32xbf16>
    %cst_127 = arith.constant dense<0.000000e+00> : vector<4x32xf32>
    %253 = tpu.matmul %251, %252, %cst_127 {dimension_numbers = #tpu.dot_dimension_numbers<[1], [0], [0], [1], [0, 0, 1, 1], [], []>} : vector<4x4xbf16>, vector<4x32xbf16>, vector<4x32xf32> -> vector<4x32xf32>
    %254 = arith.addf %253, %249 : vector<4x32xf32>
    %c976_128 = arith.constant 976 : index
    %c0_129 = arith.constant 0 : index
    %255 = vector.load %arg1[%c976_128, %c0_129] : memref<1008x384xbf16, #tpu.memory_space<vmem>>, vector<4x4xbf16>
    %256 = arith.truncf %250 : vector<4x32xf32> to vector<4x32xbf16>
    %cst_130 = arith.constant dense<0.000000e+00> : vector<4x32xf32>
    %257 = tpu.matmul %255, %256, %cst_130 {dimension_numbers = #tpu.dot_dimension_numbers<[1], [0], [0], [1], [0, 0, 1, 1], [], []>} : vector<4x4xbf16>, vector<4x32xbf16>, vector<4x32xf32> -> vector<4x32xf32>
    %258 = arith.addf %254, %257 : vector<4x32xf32>
    %cst_131 = arith.constant dense<0.000000e+00> : vector<32xf32>
    %259 = vector.multi_reduction <add>, %258, %cst_131 [0] : vector<4x32xf32> to vector<32xf32>
    %260 = vector.shape_cast %259 : vector<32xf32> to vector<1x32xf32>
    %261 = arith.mulf %258, %258 : vector<4x32xf32>
    %cst_132 = arith.constant dense<0.000000e+00> : vector<32xf32>
    %262 = vector.multi_reduction <add>, %261, %cst_132 [0] : vector<4x32xf32> to vector<32xf32>
    %263 = vector.shape_cast %262 : vector<32xf32> to vector<1x32xf32>
    %c752_133 = arith.constant 752 : index
    %c256_134 = arith.constant 256 : index
    %264 = vector.load %arg1[%c752_133, %c256_134] : memref<1008x384xbf16, #tpu.memory_space<vmem>>, vector<32x32xbf16>
    %265 = arith.extf %264 : vector<32x32xbf16> to vector<32x32xf32>
    %cst_135 = arith.constant dense<0.000000e+00> : vector<1x32xf32>
    %266 = tpu.matmul %260, %265, %cst_135 {dimension_numbers = #tpu.dot_dimension_numbers<[1], [0], [0], [1], [0, 0, 1, 1], [], []>} : vector<1x32xf32>, vector<32x32xf32>, vector<1x32xf32> -> vector<1x32xf32>
    %cst_136 = arith.constant dense<0.000000e+00> : vector<1x32xf32>
    %267 = tpu.matmul %263, %265, %cst_136 {dimension_numbers = #tpu.dot_dimension_numbers<[1], [0], [0], [1], [0, 0, 1, 1], [], []>} : vector<1x32xf32>, vector<32x32xf32>, vector<1x32xf32> -> vector<1x32xf32>
    %cst_137 = arith.constant 1.250000e-01 : f32
    %268 = vector.broadcast %cst_137 : f32 to vector<1x32xf32>
    %269 = arith.mulf %266, %268 : vector<1x32xf32>
    %cst_138 = arith.constant 1.250000e-01 : f32
    %270 = vector.broadcast %cst_138 : f32 to vector<1x32xf32>
    %271 = arith.mulf %267, %270 : vector<1x32xf32>
    %272 = arith.mulf %269, %269 : vector<1x32xf32>
    %273 = arith.subf %271, %272 : vector<1x32xf32>
    %cst_139 = arith.constant 0.000000e+00 : f32
    %274 = vector.broadcast %cst_139 : f32 to vector<1x32xf32>
    %275 = arith.maximumf %273, %274 : vector<1x32xf32>
    %276 = vector.broadcast %269 : vector<1x32xf32> to vector<4x32xf32>
    %277 = arith.subf %258, %276 : vector<4x32xf32>
    %cst_140 = arith.constant 9.99999974E-6 : f32
    %278 = vector.broadcast %cst_140 : f32 to vector<1x32xf32>
    %279 = arith.addf %275, %278 : vector<1x32xf32>
    %280 = math.rsqrt %279 : vector<1x32xf32>
    %281 = vector.broadcast %280 : vector<1x32xf32> to vector<4x32xf32>
    %282 = arith.mulf %277, %281 : vector<4x32xf32>
    %cst_141 = arith.constant 0.000000e+00 : f32
    %283 = vector.broadcast %cst_141 : f32 to vector<4x32xf32>
    %284 = arith.maximumf %282, %283 : vector<4x32xf32>
    %c784 = arith.constant 784 : index
    %c0_142 = arith.constant 0 : index
    %285 = vector.load %arg1[%c784, %c0_142] : memref<1008x384xbf16, #tpu.memory_space<vmem>>, vector<32x96xbf16>
    %286 = arith.truncf %284 : vector<4x32xf32> to vector<4x32xbf16>
    %cst_143 = arith.constant dense<0.000000e+00> : vector<4x96xf32>
    %287 = tpu.matmul %286, %285, %cst_143 {dimension_numbers = #tpu.dot_dimension_numbers<[1], [0], [0], [1], [0, 0, 1, 1], [], []>} : vector<4x32xbf16>, vector<32x96xbf16>, vector<4x96xf32> -> vector<4x96xf32>
    %c928 = arith.constant 928 : index
    %c0_144 = arith.constant 0 : index
    %288 = vector.load %arg1[%c928, %c0_144] : memref<1008x384xbf16, #tpu.memory_space<vmem>>, vector<8x4xbf16>
    %289 = arith.truncf %287 : vector<4x96xf32> to vector<4x96xbf16>
    %cst_145 = arith.constant dense<0.000000e+00> : vector<8x96xf32>
    %290 = tpu.matmul %288, %289, %cst_145 {dimension_numbers = #tpu.dot_dimension_numbers<[1], [0], [0], [1], [0, 0, 1, 1], [], []>} : vector<8x4xbf16>, vector<4x96xbf16>, vector<8x96xf32> -> vector<8x96xf32>
    %291 = vector.extract_strided_slice %290 {offsets = [0, 0], sizes = [8, 32], strides = [1, 1]} : vector<8x96xf32> to vector<8x32xf32>
    %292 = vector.extract_strided_slice %290 {offsets = [0, 32], sizes = [8, 32], strides = [1, 1]} : vector<8x96xf32> to vector<8x32xf32>
    %293 = vector.extract_strided_slice %290 {offsets = [0, 64], sizes = [8, 32], strides = [1, 1]} : vector<8x96xf32> to vector<8x32xf32>
    %c928_146 = arith.constant 928 : index
    %c128_147 = arith.constant 128 : index
    %294 = vector.load %arg1[%c928_146, %c128_147] : memref<1008x384xbf16, #tpu.memory_space<vmem>>, vector<8x8xbf16>
    %295 = arith.truncf %291 : vector<8x32xf32> to vector<8x32xbf16>
    %cst_148 = arith.constant dense<0.000000e+00> : vector<8x32xf32>
    %296 = tpu.matmul %294, %295, %cst_148 {dimension_numbers = #tpu.dot_dimension_numbers<[1], [0], [0], [1], [0, 0, 1, 1], [], []>} : vector<8x8xbf16>, vector<8x32xbf16>, vector<8x32xf32> -> vector<8x32xf32>
    %297 = arith.addf %296, %292 : vector<8x32xf32>
    %c928_149 = arith.constant 928 : index
    %c256_150 = arith.constant 256 : index
    %298 = vector.load %arg1[%c928_149, %c256_150] : memref<1008x384xbf16, #tpu.memory_space<vmem>>, vector<8x8xbf16>
    %299 = arith.truncf %293 : vector<8x32xf32> to vector<8x32xbf16>
    %cst_151 = arith.constant dense<0.000000e+00> : vector<8x32xf32>
    %300 = tpu.matmul %298, %299, %cst_151 {dimension_numbers = #tpu.dot_dimension_numbers<[1], [0], [0], [1], [0, 0, 1, 1], [], []>} : vector<8x8xbf16>, vector<8x32xbf16>, vector<8x32xf32> -> vector<8x32xf32>
    %301 = arith.addf %297, %300 : vector<8x32xf32>
    %cst_152 = arith.constant dense<0.000000e+00> : vector<32xf32>
    %302 = vector.multi_reduction <add>, %301, %cst_152 [0] : vector<8x32xf32> to vector<32xf32>
    %303 = vector.shape_cast %302 : vector<32xf32> to vector<1x32xf32>
    %304 = arith.mulf %301, %301 : vector<8x32xf32>
    %cst_153 = arith.constant dense<0.000000e+00> : vector<32xf32>
    %305 = vector.multi_reduction <add>, %304, %cst_153 [0] : vector<8x32xf32> to vector<32xf32>
    %306 = vector.shape_cast %305 : vector<32xf32> to vector<1x32xf32>
    %c784_154 = arith.constant 784 : index
    %c128_155 = arith.constant 128 : index
    %307 = vector.load %arg1[%c784_154, %c128_155] : memref<1008x384xbf16, #tpu.memory_space<vmem>>, vector<32x32xbf16>
    %308 = arith.extf %307 : vector<32x32xbf16> to vector<32x32xf32>
    %cst_156 = arith.constant dense<0.000000e+00> : vector<1x32xf32>
    %309 = tpu.matmul %303, %308, %cst_156 {dimension_numbers = #tpu.dot_dimension_numbers<[1], [0], [0], [1], [0, 0, 1, 1], [], []>} : vector<1x32xf32>, vector<32x32xf32>, vector<1x32xf32> -> vector<1x32xf32>
    %cst_157 = arith.constant dense<0.000000e+00> : vector<1x32xf32>
    %310 = tpu.matmul %306, %308, %cst_157 {dimension_numbers = #tpu.dot_dimension_numbers<[1], [0], [0], [1], [0, 0, 1, 1], [], []>} : vector<1x32xf32>, vector<32x32xf32>, vector<1x32xf32> -> vector<1x32xf32>
    %cst_158 = arith.constant 3.125000e-02 : f32
    %311 = vector.broadcast %cst_158 : f32 to vector<1x32xf32>
    %312 = arith.mulf %309, %311 : vector<1x32xf32>
    %cst_159 = arith.constant 3.125000e-02 : f32
    %313 = vector.broadcast %cst_159 : f32 to vector<1x32xf32>
    %314 = arith.mulf %310, %313 : vector<1x32xf32>
    %315 = arith.mulf %312, %312 : vector<1x32xf32>
    %316 = arith.subf %314, %315 : vector<1x32xf32>
    %cst_160 = arith.constant 0.000000e+00 : f32
    %317 = vector.broadcast %cst_160 : f32 to vector<1x32xf32>
    %318 = arith.maximumf %316, %317 : vector<1x32xf32>
    %319 = vector.broadcast %312 : vector<1x32xf32> to vector<8x32xf32>
    %320 = arith.subf %301, %319 : vector<8x32xf32>
    %cst_161 = arith.constant 9.99999974E-6 : f32
    %321 = vector.broadcast %cst_161 : f32 to vector<1x32xf32>
    %322 = arith.addf %318, %321 : vector<1x32xf32>
    %323 = math.rsqrt %322 : vector<1x32xf32>
    %324 = vector.broadcast %323 : vector<1x32xf32> to vector<8x32xf32>
    %325 = arith.mulf %320, %324 : vector<8x32xf32>
    %cst_162 = arith.constant 0.000000e+00 : f32
    %326 = vector.broadcast %cst_162 : f32 to vector<8x32xf32>
    %327 = arith.maximumf %325, %326 : vector<8x32xf32>
    %c784_163 = arith.constant 784 : index
    %c256_164 = arith.constant 256 : index
    %328 = vector.load %arg1[%c784_163, %c256_164] : memref<1008x384xbf16, #tpu.memory_space<vmem>>, vector<32x96xbf16>
    %329 = arith.truncf %327 : vector<8x32xf32> to vector<8x32xbf16>
    %cst_165 = arith.constant dense<0.000000e+00> : vector<8x96xf32>
    %330 = tpu.matmul %329, %328, %cst_165 {dimension_numbers = #tpu.dot_dimension_numbers<[1], [0], [0], [1], [0, 0, 1, 1], [], []>} : vector<8x32xbf16>, vector<32x96xbf16>, vector<8x96xf32> -> vector<8x96xf32>
    %c880_166 = arith.constant 880 : index
    %c256_167 = arith.constant 256 : index
    %331 = vector.load %arg1[%c880_166, %c256_167] : memref<1008x384xbf16, #tpu.memory_space<vmem>>, vector<16x8xbf16>
    %332 = arith.truncf %330 : vector<8x96xf32> to vector<8x96xbf16>
    %cst_168 = arith.constant dense<0.000000e+00> : vector<16x96xf32>
    %333 = tpu.matmul %331, %332, %cst_168 {dimension_numbers = #tpu.dot_dimension_numbers<[1], [0], [0], [1], [0, 0, 1, 1], [], []>} : vector<16x8xbf16>, vector<8x96xbf16>, vector<16x96xf32> -> vector<16x96xf32>
    %334 = vector.extract_strided_slice %333 {offsets = [0, 0], sizes = [16, 32], strides = [1, 1]} : vector<16x96xf32> to vector<16x32xf32>
    %335 = vector.extract_strided_slice %333 {offsets = [0, 32], sizes = [16, 32], strides = [1, 1]} : vector<16x96xf32> to vector<16x32xf32>
    %336 = vector.extract_strided_slice %333 {offsets = [0, 64], sizes = [16, 32], strides = [1, 1]} : vector<16x96xf32> to vector<16x32xf32>
    %c896_169 = arith.constant 896 : index
    %c0_170 = arith.constant 0 : index
    %337 = vector.load %arg1[%c896_169, %c0_170] : memref<1008x384xbf16, #tpu.memory_space<vmem>>, vector<16x16xbf16>
    %338 = arith.truncf %334 : vector<16x32xf32> to vector<16x32xbf16>
    %cst_171 = arith.constant dense<0.000000e+00> : vector<16x32xf32>
    %339 = tpu.matmul %337, %338, %cst_171 {dimension_numbers = #tpu.dot_dimension_numbers<[1], [0], [0], [1], [0, 0, 1, 1], [], []>} : vector<16x16xbf16>, vector<16x32xbf16>, vector<16x32xf32> -> vector<16x32xf32>
    %340 = arith.addf %339, %335 : vector<16x32xf32>
    %c896_172 = arith.constant 896 : index
    %c128_173 = arith.constant 128 : index
    %341 = vector.load %arg1[%c896_172, %c128_173] : memref<1008x384xbf16, #tpu.memory_space<vmem>>, vector<16x16xbf16>
    %342 = arith.truncf %336 : vector<16x32xf32> to vector<16x32xbf16>
    %cst_174 = arith.constant dense<0.000000e+00> : vector<16x32xf32>
    %343 = tpu.matmul %341, %342, %cst_174 {dimension_numbers = #tpu.dot_dimension_numbers<[1], [0], [0], [1], [0, 0, 1, 1], [], []>} : vector<16x16xbf16>, vector<16x32xbf16>, vector<16x32xf32> -> vector<16x32xf32>
    %344 = arith.addf %340, %343 : vector<16x32xf32>
    %cst_175 = arith.constant dense<0.000000e+00> : vector<32xf32>
    %345 = vector.multi_reduction <add>, %344, %cst_175 [0] : vector<16x32xf32> to vector<32xf32>
    %346 = vector.shape_cast %345 : vector<32xf32> to vector<1x32xf32>
    %347 = arith.mulf %344, %344 : vector<16x32xf32>
    %cst_176 = arith.constant dense<0.000000e+00> : vector<32xf32>
    %348 = vector.multi_reduction <add>, %347, %cst_176 [0] : vector<16x32xf32> to vector<32xf32>
    %349 = vector.shape_cast %348 : vector<32xf32> to vector<1x32xf32>
    %c816 = arith.constant 816 : index
    %c0_177 = arith.constant 0 : index
    %350 = vector.load %arg1[%c816, %c0_177] : memref<1008x384xbf16, #tpu.memory_space<vmem>>, vector<32x32xbf16>
    %351 = arith.extf %350 : vector<32x32xbf16> to vector<32x32xf32>
    %cst_178 = arith.constant dense<0.000000e+00> : vector<1x32xf32>
    %352 = tpu.matmul %346, %351, %cst_178 {dimension_numbers = #tpu.dot_dimension_numbers<[1], [0], [0], [1], [0, 0, 1, 1], [], []>} : vector<1x32xf32>, vector<32x32xf32>, vector<1x32xf32> -> vector<1x32xf32>
    %cst_179 = arith.constant dense<0.000000e+00> : vector<1x32xf32>
    %353 = tpu.matmul %349, %351, %cst_179 {dimension_numbers = #tpu.dot_dimension_numbers<[1], [0], [0], [1], [0, 0, 1, 1], [], []>} : vector<1x32xf32>, vector<32x32xf32>, vector<1x32xf32> -> vector<1x32xf32>
    %cst_180 = arith.constant 7.812500e-03 : f32
    %354 = vector.broadcast %cst_180 : f32 to vector<1x32xf32>
    %355 = arith.mulf %352, %354 : vector<1x32xf32>
    %cst_181 = arith.constant 7.812500e-03 : f32
    %356 = vector.broadcast %cst_181 : f32 to vector<1x32xf32>
    %357 = arith.mulf %353, %356 : vector<1x32xf32>
    %358 = arith.mulf %355, %355 : vector<1x32xf32>
    %359 = arith.subf %357, %358 : vector<1x32xf32>
    %cst_182 = arith.constant 0.000000e+00 : f32
    %360 = vector.broadcast %cst_182 : f32 to vector<1x32xf32>
    %361 = arith.maximumf %359, %360 : vector<1x32xf32>
    %362 = vector.broadcast %355 : vector<1x32xf32> to vector<16x32xf32>
    %363 = arith.subf %344, %362 : vector<16x32xf32>
    %cst_183 = arith.constant 9.99999974E-6 : f32
    %364 = vector.broadcast %cst_183 : f32 to vector<1x32xf32>
    %365 = arith.addf %361, %364 : vector<1x32xf32>
    %366 = math.rsqrt %365 : vector<1x32xf32>
    %367 = vector.broadcast %366 : vector<1x32xf32> to vector<16x32xf32>
    %368 = arith.mulf %363, %367 : vector<16x32xf32>
    %cst_184 = arith.constant 0.000000e+00 : f32
    %369 = vector.broadcast %cst_184 : f32 to vector<16x32xf32>
    %370 = arith.maximumf %368, %369 : vector<16x32xf32>
    %c816_185 = arith.constant 816 : index
    %c256_186 = arith.constant 256 : index
    %371 = vector.load %arg1[%c816_185, %c256_186] : memref<1008x384xbf16, #tpu.memory_space<vmem>>, vector<32x96xbf16>
    %372 = arith.truncf %370 : vector<16x32xf32> to vector<16x32xbf16>
    %cst_187 = arith.constant dense<0.000000e+00> : vector<16x96xf32>
    %373 = tpu.matmul %372, %371, %cst_187 {dimension_numbers = #tpu.dot_dimension_numbers<[1], [0], [0], [1], [0, 0, 1, 1], [], []>} : vector<16x32xbf16>, vector<32x96xbf16>, vector<16x96xf32> -> vector<16x96xf32>
    %c816_188 = arith.constant 816 : index
    %c128_189 = arith.constant 128 : index
    %374 = vector.load %arg1[%c816_188, %c128_189] : memref<1008x384xbf16, #tpu.memory_space<vmem>>, vector<32x16xbf16>
    %375 = arith.truncf %373 : vector<16x96xf32> to vector<16x96xbf16>
    %cst_190 = arith.constant dense<0.000000e+00> : vector<32x96xf32>
    %376 = tpu.matmul %374, %375, %cst_190 {dimension_numbers = #tpu.dot_dimension_numbers<[1], [0], [0], [1], [0, 0, 1, 1], [], []>} : vector<32x16xbf16>, vector<16x96xbf16>, vector<32x96xf32> -> vector<32x96xf32>
    %377 = vector.extract_strided_slice %376 {offsets = [0, 0], sizes = [32, 32], strides = [1, 1]} : vector<32x96xf32> to vector<32x32xf32>
    %378 = vector.extract_strided_slice %376 {offsets = [0, 32], sizes = [32, 32], strides = [1, 1]} : vector<32x96xf32> to vector<32x32xf32>
    %379 = vector.extract_strided_slice %376 {offsets = [0, 64], sizes = [32, 32], strides = [1, 1]} : vector<32x96xf32> to vector<32x32xf32>
    %c848_191 = arith.constant 848 : index
    %c0_192 = arith.constant 0 : index
    %380 = vector.load %arg1[%c848_191, %c0_192] : memref<1008x384xbf16, #tpu.memory_space<vmem>>, vector<32x32xbf16>
    %381 = arith.truncf %377 : vector<32x32xf32> to vector<32x32xbf16>
    %cst_193 = arith.constant dense<0.000000e+00> : vector<32x32xf32>
    %382 = tpu.matmul %380, %381, %cst_193 {dimension_numbers = #tpu.dot_dimension_numbers<[1], [0], [0], [1], [0, 0, 1, 1], [], []>} : vector<32x32xbf16>, vector<32x32xbf16>, vector<32x32xf32> -> vector<32x32xf32>
    %383 = arith.addf %382, %378 : vector<32x32xf32>
    %c848_194 = arith.constant 848 : index
    %c128_195 = arith.constant 128 : index
    %384 = vector.load %arg1[%c848_194, %c128_195] : memref<1008x384xbf16, #tpu.memory_space<vmem>>, vector<32x32xbf16>
    %385 = arith.truncf %379 : vector<32x32xf32> to vector<32x32xbf16>
    %cst_196 = arith.constant dense<0.000000e+00> : vector<32x32xf32>
    %386 = tpu.matmul %384, %385, %cst_196 {dimension_numbers = #tpu.dot_dimension_numbers<[1], [0], [0], [1], [0, 0, 1, 1], [], []>} : vector<32x32xbf16>, vector<32x32xbf16>, vector<32x32xf32> -> vector<32x32xf32>
    %387 = arith.addf %383, %386 : vector<32x32xf32>
    %c992 = arith.constant 992 : index
    %c0_197 = arith.constant 0 : index
    %388 = vector.load %arg1[%c992, %c0_197] : memref<1008x384xbf16, #tpu.memory_space<vmem>>, vector<1x32xbf16>
    %389 = arith.extf %388 : vector<1x32xbf16> to vector<1x32xf32>
    %390 = vector.broadcast %389 : vector<1x32xf32> to vector<32x32xf32>
    %391 = arith.addf %387, %390 : vector<32x32xf32>
    %392 = math.tanh %391 : vector<32x32xf32>
    %c0_198 = arith.constant 0 : index
    %c0_199 = arith.constant 0 : index
    %393 = vector.load %arg2[%c0_198, %c0_199] : memref<32x32xf32, #tpu.memory_space<vmem>>, vector<32x32xf32>
    tpu.vector_store %arg2[%c0_198, %c0_199], %392 {strides = array<i32>} : memref<32x32xf32, #tpu.memory_space<vmem>>, vector<32x32xf32>,
    return
  }
}

</mosaic_0001>

<bundles_post_ra>
// kernel: forward.1
= control target key start
LH: loop header
LB: loop body
LE: loop exit
PB: predicated region body
PF: predicated region fallthrough
CT: control target
= control target key end

     0   :  { %7 = vsyncpa [#allocation3], 0  ;;  %s7267_s0 = inlined_call_operand.hbm [shape: f32[32,16], index: 0, kind: input, shape index: {}]   ;;  %s7268_s1 = inlined_call_operand.hbm [shape: bf16[1008,384], index: 1, kind: input, shape index: {}]   ;;  %s7269_s2 = inlined_call_operand.vmem [shape: f32[32,32], index: 2, kind: output, shape index: {}]  }
   0x1   :  { %8 = vsyncpa [#allocation5], 0  ;;  %s6756_s9 = smov [#allocation2]   ;;  %s6708_s13 = scalar_lea.hbm %s7267_s0, 512 }
   0x2   :  { %s14_s10 = sshll.u32 %s6756_s9, 4  ;;  %p6709_p0 = scmp.ne.s32.totalorder %s7267_s0, %s6708_s13  ;;  %s15_s10 = int_to_ptr.vmem [resolvable:$true] %s14_s10 }
   0x3   :  { %p6712_p1 = scmp.lt.u32.totalorder %s6708_s13, %s7267_s0 }
   0x5   :  { %p6714_p2 = pnand %p6712_p1, %p6709_p0 }
   0x7   :  { %6717 = shalt.err (!%p6714_p2)
}
   0x8   :  { %s6718_s18 = scalar_lea.vmem %s15_s10, 512  ;;  %p6723_p4 = scmp.lt.s32.totalorder %s15_s10, %s15_s10 }
   0x9   :  { %p6719_p3 = scmp.ne.s32.totalorder %s15_s10, %s6718_s18  ;;  %p6724_p5 = scmp.lt.s32.totalorder %s6718_s18, %s6718_s18 }
   0xb   :  { %p6725_p6 = por %p6724_p5, %p6723_p4 }
   0xd   :  { %p6726_p7 = pnand %p6725_p6, %p6719_p3 }
   0xf   :  { %6729 = shalt.err (!%p6726_p7)
}
  0x10   :  { %s6757_s19 = smov 128   ;;  %s6758_s20 = smov 8  }
  0x11   :  { %20 = dma.hbm_to_vmem [thread:$0]  %s7267_s0, 512, %s15_s10, [#allocation3], %s6757_s19, %s6757_s19, %s6758_s20  }
  0x12   :  { %s6759_s23 = smov [#allocation4]   ;;  %s6730_s27 = scalar_lea.hbm %s7268_s1, 24192 }
  0x13   :  { %s26_s24 = sshll.u32 %s6759_s23, 4  ;;  %p6731_p8 = scmp.ne.s32.totalorder %s7268_s1, %s6730_s27  ;;  %s27_s24 = int_to_ptr.vmem [resolvable:$true] %s26_s24 }
  0x14   :  { %p6734_p9 = scmp.lt.u32.totalorder %s6730_s27, %s7268_s1 }
  0x16   :  { %p6736_p10 = pnand %p6734_p9, %p6731_p8 }
  0x18   :  { %6739 = shalt.err (!%p6736_p10)
}
  0x19   :  { %s6740_s4 = scalar_lea.vmem %s27_s24, 24192  ;;  %p6745_p12 = scmp.lt.s32.totalorder %s27_s24, %s27_s24 }
  0x1a   :  { %p6741_p11 = scmp.ne.s32.totalorder %s27_s24, %s6740_s4  ;;  %p6746_p13 = scmp.lt.s32.totalorder %s6740_s4, %s6740_s4 }
  0x1c   :  { %p6747_p0 = por %p6746_p13, %p6745_p12 }
  0x1e   :  { %p6748_p1 = pnand %p6747_p0, %p6741_p11 }
  0x20   :  { %6751 = shalt.err (!%p6748_p1)
}
  0x21   :  { %s6760_s0 = smov 192   ;;  %s6761_s5 = smov 12  }
  0x22   :  { %32 = dma.hbm_to_vmem [thread:$0]  %s7268_s1, 24192, %s27_s24, [#allocation5], %s6760_s0, %s6760_s0, %s6761_s5  }
  0x23   :  { %6752 = dma.done.wait [#allocation3], 512  }
  0x24   :  { %6753 = vsyncadd [#allocation3], 4294966784 }
  0x25   :  { %6754 = dma.done.wait [#allocation5], 24192  }
  0x26   :  { %6755 = vsyncadd [#allocation5], 4294943104  ;;  %v6762_v0 = vmov 0   ;;  %v6501_v1 = vld [vmem:[#allocation4 + $0x4] ss:$12 sps:$4 sm:$0xff]   ;;  %v41_v4 = vld [vmem:[#allocation2 + $0x8] sm:$0xff] }
  0x27   :  { %105 = vmatprep.mubr.bf16.mxu0 %v6762_v0  ;;  %v6503_v2 = vld [vmem:[#allocation4] ss:$12 sps:$4 sm:$0xff]   ;;  %73 = vmatprep.subr.bf16.mxu0 %v6501_v1  ;;  %vm66_vm0 = vcmask 130048   ;;  %v6504_v6 = vld [vmem:[#allocation4 + $0x8] ss:$12 sps:$4 sm:$0xff]   ;;  %v43_v8 = vld [vmem:[#allocation2 + $0x18] sm:$0xff] }
  0x28   :  { %v40_v3 = vld [vmem:[#allocation2] sm:$0xff]  ;;  %74 = vmatpush1.bf16.msra.mxu0 %v6503_v2  ;;  %v42_v7 = vld [vmem:[#allocation2 + $0x10] sm:$0xff]  ;;  %v6505_v10 = vld [vmem:[#allocation4 + $0x43c] ss:$12 sps:$4 sm:$0xff]   ;;  %vm191_vm1 = vcmask 261120   ;;  %v6763_v31 = vmov 0.0|0.0  }
  0x29   :  { %v48_v5 = vpack.c.bf16 %v41_v4, %v40_v3  ;;  %5389 = vmatprep.subr.bf16.mxu0 %v6504_v6  ;;  %v49_v9 = vpack.c.bf16 %v43_v8, %v42_v7  ;;  %5399 = vmatprep.mubr.msk.bf16.mxu1 %vm191_vm1, %v6505_v10  ;;  %v6507_v11 = vld [vmem:[#allocation4 + $0x440] ss:$12 sps:$4 sm:$0xff]   ;;  %v6508_v29 = vld [vmem:[#allocation4 + $0x458] ss:$12 sps:$4 sm:$0xff]   ;;  %v6510_v32 = vld [vmem:[#allocation4 + $0x150] ss:$12 sps:$4 sm:$0xff]  }
  0x2a   :  { %v6506_v22 = vld [vmem:[#allocation4 + $0x454] ss:$12 sps:$4 sm:$0xff]   ;;  %v6509_v30 = vld [vmem:[#allocation4 + $0x138] ss:$12 sps:$4 sm:$0xff]   ;;  %v6514_v36 = vld [vmem:[#allocation4 + $0x1b0] ss:$12 sps:$4 sm:$0xff]  }
  0x2b   :  { %4864 = vmatmul.mubr.msk.bf16.vlgmr.msra.gmra.mrb[0].mxu0 %vm66_vm0, %v48_v5  ;;  %v6511_v33 = vld [vmem:[#allocation4 + $0x168] ss:$12 sps:$4 sm:$0xff]   ;;  %v6512_v34 = vld [vmem:[#allocation4 + $0x180] ss:$12 sps:$4 sm:$0xff]   ;;  %v6513_v35 = vld [vmem:[#allocation4 + $0x198] ss:$12 sps:$4 sm:$0xff]  }
  0x2c   :  { %115 = vmatprep.mubr.bf16.mxu0 %v6762_v0  ;;  %5390 = vmatpush3.bf16.msra.mxu0 %v6504_v6  ;;  %v6515_v37 = vld [vmem:[#allocation4 + $0x1c8] ss:$12 sps:$4 sm:$0xff]   ;;  %vm6764_vm2 = vmmov 0   ;;  %v6765_v38 = vmov 0.0   ;;  %v6516_v39 = vld [vmem:[#allocation4 + $0x1e0] ss:$12 sps:$4 sm:$0xff]  }
  0x2d   :  { %v6517_v40 = vld [vmem:[#allocation4 + $0x13c] ss:$12 sps:$4 sm:$0xff]   ;;  %v6518_v41 = vld [vmem:[#allocation4 + $0x140] ss:$12 sps:$4 sm:$0xff]   ;;  %vm962_vm3 = vcmask 523264   ;;  %vm1839_vm4 = vcmask 1043456  }
  0x2e   :  { %vm1835_vm5 = vcmask 64512   ;;  %vm2609_vm6 = vcmask 1041408   ;;  %vm2605_vm7 = vcmask 31744   ;;  %vm3286_vm8 = vcmask 254976   ;;  %s6766_s1 = smov 64   ;;  %s6767_s8 = smov 96  }
  0x2f   :  { %vm3378_vm9 = vcmask 1040384   ;;  %vm3374_vm10 = vcmask 15360   ;;  %vm3525_vm11 = vcmask 257024  }
  0x33   :  { %4865 = vmatmul.mubr.msk.bf16.gmra.mrb[4].mxu0 %vm66_vm0, %v49_v9 }
  0x34   :  { %5391 = vmatprep.mubr.msk.bf16.mxu0 %vm66_vm0, %v48_v5 }
  0x3b   :  { %5392 = vmatmul.mubr.msk.bf16.vlgmr.msra.gmra.mrb[8].mxu0 %vm66_vm0, %v49_v9 }
  0x3c   :  { %5407 = vmatprep.mubr.msk.bf16.mxu0 %vm191_vm1, %v6507_v11 }
  0xfe   :  { %v107_v12 = vpop.f32.mrb[0].mxu0 }
  0xff   :  { %v6815_v13 = vpop.f32.mrb[1].mxu0 }
 0x100   :  { %v111_v14 = vpop.f32.mrb[2].mxu0 }
 0x101   :  { %v179_v15 = vpack.c.bf16 %v111_v14, %v107_v12  ;;  %v6817_v16 = vpop.f32.mrb[3].mxu0 }
 0x103   :  { %5395 = vmatprep.subr.bf16.mxu1 %v179_v15 }
 0x104   :  { %5396 = vmatpush3.bf16.msra.mxu1 %v179_v15 }
 0x106   :  { %v117_v17 = vpop.f32.mrb[4].mxu0 }
 0x107   :  { %v6819_v18 = vpop.f32.mrb[5].mxu0 }
 0x108   :  { %v121_v19 = vpop.f32.mrb[6].mxu0 }
 0x109   :  { %v180_v20 = vpack.c.bf16 %v121_v19, %v117_v17  ;;  %v6821_v21 = vpop.f32.mrb[7].mxu0  ;;  %v6519_v17 = vld [vmem:[#allocation4 + $0x154] ss:$12 sps:$4 sm:$0xff]   ;;  %v6521_v19 = vld [vmem:[#allocation4 + $0x16c] ss:$12 sps:$4 sm:$0xff]  }
 0x10b   :  { %5397 = vmatprep.subr.bf16.mxu1 %v180_v20 }
 0x10c   :  { %5398 = vmatpush3.bf16.msra.mxu1 %v180_v20  ;;  %v6522_v20 = vld [vmem:[#allocation4 + $0x170] ss:$12 sps:$4 sm:$0xff]  }
 0x10d   :  { %6161 = vmatprep.subr.bf16.mxu1 %v6763_v31 }
 0x10e   :  { %v5393_v23 = vpop.f32.mrb[8].mxu0 }
 0x10f   :  { %v160_v24 = vpop.f32.mrb[9].mxu0  ;;  %5400 = vmatmul.mubr.msk.bf16.vlgmr.msra.gmra.mrb[0].mxu1 %vm191_vm1, %v6506_v22  ;;  %v6524_v22 = vld [vmem:[#allocation4 + $0x188] ss:$12 sps:$4 sm:$0xff]  }
 0x110   :  { %v5394_v25 = vpop.f32.mrb[10].mxu0  ;;  %6163 = vmatpush3.bf16.msra.mxu1 %v6509_v30  ;;  %5443 = vmatprep.mubr.msk.f32.mxu1 %vm6764_vm2, %v6765_v38 }
 0x111   :  { %v252_v26 = vpack.c.bf16 %v5394_v25, %v5393_v23  ;;  %v163_v27 = vpop.f32.mrb[11].mxu0  ;;  %6164 = vmatprep.subr.bf16.mxu1 %v6763_v31  ;;  %v6525_v23 = vld [vmem:[#allocation4 + $0x19c] ss:$12 sps:$4 sm:$0xff]   ;;  %v6527_v25 = vld [vmem:[#allocation4 + $0x1b4] ss:$12 sps:$4 sm:$0xff]  }
 0x112   :  { %v251_v28 = vpack.c.bf16 %v163_v27, %v160_v24  ;;  %v6526_v24 = vld [vmem:[#allocation4 + $0x1a0] ss:$12 sps:$4 sm:$0xff]  }
 0x113   :  { %v6529_v27 = vld [vmem:[#allocation4 + $0x1cc] ss:$12 sps:$4 sm:$0xff]  }
 0x114   :  { %5403 = vmatprep.subr.bf16.mxu0 %v251_v28  ;;  %6166 = vmatpush3.bf16.msra.mxu1 %v6510_v32 }
 0x115   :  { %5404 = vmatpush3.bf16.msra.mxu0 %v251_v28  ;;  %6167 = vmatprep.subr.bf16.mxu1 %v6763_v31  ;;  %v6530_v28 = vld [vmem:[#allocation4 + $0x1d0] ss:$12 sps:$4 sm:$0xff]  }
 0x116   :  { %5405 = vmatprep.subr.bf16.mxu0 %v252_v26 }
 0x118   :  { %6169 = vmatpush3.bf16.msra.mxu1 %v6511_v33 }
 0x119   :  { %5406 = vmatpush3.bf16.msra.mxu0 %v252_v26  ;;  %6170 = vmatprep.subr.bf16.mxu1 %v6763_v31  ;;  %v6528_v26 = vld [vmem:[#allocation4 + $0x1b8] ss:$12 sps:$4 sm:$0xff]  }
 0x11a   :  { %6185 = vmatprep.subr.bf16.mxu0 %v6763_v31 }
 0x11c   :  { %5408 = vmatmul.mubr.msk.bf16.vlgmr.msra.gmra.mrb[12].mxu0 %vm191_vm1, %v6508_v29  ;;  %6172 = vmatpush3.bf16.msra.mxu1 %v6512_v34  ;;  %v6531_v29 = vld [vmem:[#allocation4 + $0x1e4] ss:$12 sps:$4 sm:$0xff]  }
 0x11d   :  { %6187 = vmatpush3.bf16.msra.mxu0 %v6509_v30  ;;  %6173 = vmatprep.subr.bf16.mxu1 %v6763_v31  ;;  %v6532_v30 = vld [vmem:[#allocation4 + $0x1e8] ss:$12 sps:$4 sm:$0xff]  }
 0x11e   :  { %6188 = vmatprep.subr.bf16.mxu0 %v6763_v31  ;;  %5478 = vmatprep.mubr.msk.f32.mxu0 %vm6764_vm2, %v6765_v38 }
 0x120   :  { %6175 = vmatpush3.bf16.msra.mxu1 %v6513_v35 }
 0x121   :  { %6190 = vmatpush3.bf16.msra.mxu0 %v6510_v32  ;;  %6176 = vmatprep.subr.bf16.mxu1 %v6763_v31 }
 0x122   :  { %6191 = vmatprep.subr.bf16.mxu0 %v6763_v31 }
 0x124   :  { %6178 = vmatpush3.bf16.msra.mxu1 %v6514_v36 }
 0x125   :  { %6193 = vmatpush3.bf16.msra.mxu0 %v6511_v33  ;;  %6179 = vmatprep.subr.bf16.mxu1 %v6763_v31 }
 0x126   :  { %6194 = vmatprep.subr.bf16.mxu0 %v6763_v31 }
 0x128   :  { %6181 = vmatpush3.bf16.msra.mxu1 %v6515_v37 }
 0x129   :  { %6196 = vmatpush3.bf16.msra.mxu0 %v6512_v34  ;;  %6182 = vmatprep.subr.bf16.mxu1 %v6763_v31 }
 0x12a   :  { %6197 = vmatprep.subr.bf16.mxu0 %v6763_v31 }
 0x12c   :  { %6184 = vmatpush3.bf16.msra.mxu1 %v6516_v39 }
 0x12d   :  { %6199 = vmatpush3.bf16.msra.mxu0 %v6513_v35  ;;  %5481 = vmatprep.subr.bf16.mxu1 %v6517_v40 }
 0x12e   :  { %6200 = vmatprep.subr.bf16.mxu0 %v6763_v31 }
 0x131   :  { %6202 = vmatpush3.bf16.msra.mxu0 %v6514_v36 }
 0x132   :  { %6203 = vmatprep.subr.bf16.mxu0 %v6763_v31 }
 0x135   :  { %6205 = vmatpush3.bf16.msra.mxu0 %v6515_v37 }
 0x136   :  { %6206 = vmatprep.subr.bf16.mxu0 %v6763_v31 }
 0x139   :  { %6208 = vmatpush3.bf16.msra.mxu0 %v6516_v39 }
 0x13a   :  { %5501 = vmatprep.subr.bf16.mxu0 %v6518_v41 }
 0x1e2   :  { %v5401_v42 = vpop.f32.mrb[0].mxu1 }
 0x1e3   :  { %v241_v43 = vadd.f32 %v5401_v42, %v6819_v18  ;;  %v232_v44 = vpop.f32.mrb[1].mxu1  ;;  %v6520_v18 = vld [vmem:[#allocation4 + $0x158] ss:$12 sps:$4 sm:$0xff]  }
 0x1e4   :  { %v233_v45 = vadd.f32 %v232_v44, %v6815_v13  ;;  %v5402_v46 = vpop.f32.mrb[2].mxu1 }
 0x1e5   :  { %v244_v47 = vadd.f32 %v5402_v46, %v6821_v21  ;;  %v235_v48 = vpop.f32.mrb[3].mxu1  ;;  %v6523_v21 = vld [vmem:[#allocation4 + $0x184] ss:$12 sps:$4 sm:$0xff]  }
 0x1e6   :  { %v236_v49 = vadd.f32 %v235_v48, %v6817_v16 }
 0x1ef   :  { %v5409_v50 = vpop.f32.mrb[12].mxu0 }
 0x1f0   :  { %v6849_v51 = vadd.f32 %v5409_v50, %v241_v43  ;;  %v303_v52 = vpop.f32.mrb[13].mxu0 }
 0x1f1   :  { %v6851_v53 = vadd.f32 %v303_v52, %v233_v45  ;;  %v5410_v54 = vpop.f32.mrb[14].mxu0 }
 0x1f2   :  { %v6853_v55 = vadd.f32 %v5410_v54, %v244_v47  ;;  %v306_v56 = vpop.f32.mrb[15].mxu0  ;;  %v333_v61 = vmul.f32 %v6849_v51, %v6849_v51 }
 0x1f3   :  { %v6855_v57 = vadd.f32 %v306_v56, %v236_v49  ;;  %v331_v58 = vmul.f32 %v6851_v53, %v6851_v53 }
 0x1f4   :  { %v334_v1 = vmul.f32 %v6853_v55, %v6853_v55 }
 0x1f5   :  { %v322_v59 = vadd.f32 %v6855_v57, %v6851_v53  ;;  %v332_v60 = vmul.f32 %v6855_v57, %v6855_v57 }
 0x1f7   :  { %v323_v62 = vadd.f32 %v322_v59, %v6849_v51  ;;  %v335_v63 = vadd.f32 %v332_v60, %v331_v58 }
 0x1f9   :  { %v324_v2 = vadd.f32 %v323_v62, %v6853_v55  ;;  %v336_v3 = vadd.f32 %v335_v63, %v333_v61 }
 0x1fb   :  { %v325_v4 = vrot.slane %v324_v2, 4  ;;  %v337_v5 = vadd.f32 %v336_v3, %v334_v1 }
 0x1fd   :  { %v326_v6 = vadd.f32 %v325_v4, %v324_v2  ;;  %v338_v7 = vrot.slane %v337_v5, 4 }
 0x1ff   :  { %v327_v8 = vrot.slane %v326_v6, 2  ;;  %v339_v9 = vadd.f32 %v338_v7, %v337_v5 }
 0x201   :  { %v328_v10 = vadd.f32 %v327_v8, %v326_v6  ;;  %v340_v11 = vrot.slane %v339_v9, 2 }
 0x203   :  { %v329_v12 = vrot.slane %v328_v10, 1  ;;  %v341_v13 = vadd.f32 %v340_v11, %v339_v9 }
 0x205   :  { %v330_v14 = vadd.f32 %v329_v12, %v328_v10  ;;  %v342_v15 = vrot.slane %v341_v13, 1 }
 0x207   :  { %5444 = vmatmul.mubr.f32.vlgmr.msra.gmra.mrb[4].mxu1 %v330_v14  ;;  %v343_v16 = vadd.f32 %v342_v15, %v341_v13  ;;  %v6537_v14 = vld [vmem:[#allocation4 + $0x1c] ss:$12 sps:$4 sm:$0xff]   ;;  %v6533_v15 = vld [vmem:[#allocation4 + $0x500] ss:$12 sps:$4 sm:$0xff]  }
 0x208   :  { %5482 = vmatpush3.bf16.msra.mxu1 %v6517_v40  ;;  %v521_v40 = vlaneseq }
 0x209   :  { %5479 = vmatmul.mubr.f32.vlgmr.msra.gmra.mrb[16].mxu0 %v343_v16  ;;  %5483 = vmatprep.subr.bf16.mxu1 %v6519_v17  ;;  %v6534_v16 = vld [vmem:[#allocation4 + $0x518] ss:$12 sps:$4 sm:$0xff]  }
 0x20a   :  { %5502 = vmatpush3.bf16.msra.mxu0 %v6518_v41  ;;  %v522_v43 = vshrl.u32 %v521_v40, 7 }
 0x20b   :  { %5503 = vmatprep.subr.bf16.mxu0 %v6520_v18 }
 0x20c   :  { %5484 = vmatpush3.bf16.msra.mxu1 %v6519_v17  ;;  %v6871_v45 = vsub.s32 0, %v522_v43  ;;  %v6535_v17 = vld [vmem:[#allocation4 + $0x18] ss:$12 sps:$4 sm:$0xff]  }
 0x20d   :  { %5485 = vmatprep.subr.bf16.mxu1 %v6521_v19 }
 0x20e   :  { %5504 = vmatpush3.bf16.msra.mxu0 %v6520_v18  ;;  %v6538_v18 = vld [vmem:[#allocation4 + $0x20] ss:$12 sps:$4 sm:$0xff]  }
 0x20f   :  { %5505 = vmatprep.subr.bf16.mxu0 %v6522_v20 }
 0x210   :  { %5486 = vmatpush3.bf16.msra.mxu1 %v6521_v19  ;;  %v6541_v19 = vld [vmem:[#allocation4 + $0x34] ss:$12 sps:$4 sm:$0xff]  }
 0x211   :  { %5487 = vmatprep.subr.bf16.mxu1 %v6523_v21 }
 0x212   :  { %5506 = vmatpush3.bf16.msra.mxu0 %v6522_v20  ;;  %v6539_v20 = vld [vmem:[#allocation4 + $0x30] ss:$12 sps:$4 sm:$0xff]  }
 0x213   :  { %5507 = vmatprep.subr.bf16.mxu0 %v6524_v22 }
 0x214   :  { %5488 = vmatpush3.bf16.msra.mxu1 %v6523_v21  ;;  %v6542_v21 = vld [vmem:[#allocation4 + $0x38] ss:$12 sps:$4 sm:$0xff]  }
 0x215   :  { %5489 = vmatprep.subr.bf16.mxu1 %v6525_v23 }
 0x216   :  { %5508 = vmatpush3.bf16.msra.mxu0 %v6524_v22  ;;  %v6545_v22 = vld [vmem:[#allocation4 + $0x4c] ss:$12 sps:$4 sm:$0xff]  }
 0x217   :  { %5509 = vmatprep.subr.bf16.mxu0 %v6526_v24 }
 0x218   :  { %5490 = vmatpush3.bf16.msra.mxu1 %v6525_v23  ;;  %v6543_v23 = vld [vmem:[#allocation4 + $0x48] ss:$12 sps:$4 sm:$0xff]  }
 0x219   :  { %5491 = vmatprep.subr.bf16.mxu1 %v6527_v25 }
 0x21a   :  { %5510 = vmatpush3.bf16.msra.mxu0 %v6526_v24  ;;  %v6546_v24 = vld [vmem:[#allocation4 + $0x50] ss:$12 sps:$4 sm:$0xff]  }
 0x21b   :  { %5511 = vmatprep.subr.bf16.mxu0 %v6528_v26 }
 0x21c   :  { %5492 = vmatpush3.bf16.msra.mxu1 %v6527_v25  ;;  %v6549_v25 = vld [vmem:[#allocation4 + $0x64] ss:$12 sps:$4 sm:$0xff]  }
 0x21d   :  { %5493 = vmatprep.subr.bf16.mxu1 %v6529_v27 }
 0x21e   :  { %5512 = vmatpush3.bf16.msra.mxu0 %v6528_v26  ;;  %v6547_v26 = vld [vmem:[#allocation4 + $0x60] ss:$12 sps:$4 sm:$0xff]  }
 0x21f   :  { %5513 = vmatprep.subr.bf16.mxu0 %v6530_v28 }
 0x220   :  { %5494 = vmatpush3.bf16.msra.mxu1 %v6529_v27  ;;  %v6550_v27 = vld [vmem:[#allocation4 + $0x68] ss:$12 sps:$4 sm:$0xff]  }
 0x221   :  { %5495 = vmatprep.subr.bf16.mxu1 %v6531_v29 }
 0x222   :  { %5514 = vmatpush3.bf16.msra.mxu0 %v6530_v28 }
 0x223   :  { %5515 = vmatprep.subr.bf16.mxu0 %v6532_v30 }
 0x224   :  { %5496 = vmatpush3.bf16.msra.mxu1 %v6531_v29 }
 0x225   :  { %5521 = vmatprep.subr.bf16.mxu1 %v6765_v38 }
 0x226   :  { %5516 = vmatpush3.bf16.msra.mxu0 %v6532_v30 }
 0x227   :  { %5529 = vmatprep.subr.bf16.mxu0 %v6765_v38 }
 0x2da   :  { %v442_v32 = vpop.f32.mrb[4].mxu1 }
 0x2db   :  { %v516_v33 = vmul.f32 0.001953125, %v442_v32  ;;  %v5445_v34 = vpop.f32.mrb[5].mxu1 }
 0x2dc   :  { %v512_v35 = vpop.f32.mrb[16].mxu0 }
 0x2dd   :  { %v518_v36 = vmul.f32 %v516_v33, %v516_v33  ;;  %v517_v37 = vmul.f32 0.001953125, %v512_v35  ;;  %v5480_v39 = vpop.f32.mrb[17].mxu0  ;;  %v524_v46 = vrot.slane %v516_v33, %v6871_v45 }
 0x2df   :  { %v519_v41 = vsub.f32 %v517_v37, %v518_v36  ;;  %v527_v48 = vsub.f32 %v6849_v51, %v524_v46  ;;  %v528_v49 = vsub.f32 %v6853_v55, %v524_v46  ;;  %v525_v50 = vsub.f32 %v6851_v53, %v524_v46 }
 0x2e0   :  { %v526_v52 = vsub.f32 %v6855_v57, %v524_v46 }
 0x2e1   :  { %v520_v42 = vmax.f32 %v519_v41, 0.0 }
 0x2e3   :  { %v529_v44 = vadd.f32 1e-05, %v520_v42 }
 0x2e5   :  { %6684 = vrsqrt.f32 %v529_v44 }
 0x2ef   :  { %v6685_v47 = vpop.eup %6684 }
 0x2f0   :  { %v534_v54 = vrot.slane %v6685_v47, %v6871_v45 }
 0x2f2   :  { %v535_v56 = vmul.f32 %v534_v54, %v525_v50  ;;  %v536_v58 = vmul.f32 %v534_v54, %v526_v52  ;;  %v537_v59 = vmul.f32 %v534_v54, %v527_v48  ;;  %v538_v60 = vmul.f32 %v534_v54, %v528_v49  ;;  %v6551_v54 = vld [vmem:[#allocation4 + $0x528] ss:$12 sps:$4 sm:$0xff]  }
 0x2f4   :  { %v539_v61 = vmax.f32 %v535_v56, 0.0  ;;  %v540_v62 = vmax.f32 %v536_v58, 0.0  ;;  %v541_v63 = vmax.f32 %v537_v59, 0.0  ;;  %v542_v1 = vmax.f32 %v538_v60, 0.0  ;;  %v6552_v56 = vld [vmem:[#allocation4 + $0x52c] ss:$12 sps:$4 sm:$0xff]  }
 0x2f5   :  { %v6553_v58 = vld [vmem:[#allocation4 + $0x1f8] ss:$12 sps:$4 sm:$0xff]   ;;  %v6554_v59 = vld [vmem:[#allocation4 + $0x210] ss:$12 sps:$4 sm:$0xff]   ;;  %v6555_v60 = vld [vmem:[#allocation4 + $0x228] ss:$12 sps:$4 sm:$0xff]  }
 0x2f6   :  { %v559_v2 = vpack.c.bf16 %v540_v62, %v539_v61  ;;  %v560_v3 = vpack.c.bf16 %v542_v1, %v541_v63  ;;  %v6556_v61 = vld [vmem:[#allocation4 + $0x240] ss:$12 sps:$4 sm:$0xff]   ;;  %v6557_v62 = vld [vmem:[#allocation4 + $0x258] ss:$12 sps:$4 sm:$0xff]   ;;  %v6558_v63 = vld [vmem:[#allocation4 + $0x270] ss:$12 sps:$4 sm:$0xff]  }
 0x2f7   :  { %v6559_v1 = vld [vmem:[#allocation4 + $0x288] ss:$12 sps:$4 sm:$0xff]  }
 0x2f8   :  { %5497 = vmatprep.mubr.bf16.mxu1 %v559_v2  ;;  %5517 = vmatprep.mubr.bf16.mxu0 %v559_v2  ;;  %v6560_v2 = vld [vmem:[#allocation4 + $0x2a0] ss:$12 sps:$4 sm:$0xff]  }
 0x2f9   :  { %5498 = vmatmul.mubr.bf16.vlgmr.msra.gmra.mrb[8].mxu1 %v560_v3  ;;  %5518 = vmatmul.mubr.bf16.vlgmr.msra.gmra.mrb[20].mxu0 %v560_v3 }
 0x2fa   :  { %5525 = vmatprep.mubr.msk.bf16.mxu1 %vm6764_vm2, %v6765_v38  ;;  %5533 = vmatprep.mubr.msk.bf16.mxu0 %vm6764_vm2, %v6765_v38 }
 0x3cc   :  { %v5499_v51 = vpop.f32.mrb[8].mxu1  ;;  %v5519_v53 = vpop.f32.mrb[20].mxu0 }
 0x3cd   :  { %v773_v55 = vmax.f32 %v5499_v51, %v5519_v53  ;;  %v643_v57 = vpop.f32.mrb[9].mxu1  ;;  %v756_v4 = vpop.f32.mrb[21].mxu0 }
 0x3ce   :  { %v771_v5 = vmax.f32 %v643_v57, %v756_v4  ;;  %v5500_v6 = vpop.f32.mrb[10].mxu1  ;;  %v5520_v7 = vpop.f32.mrb[22].mxu0 }
 0x3cf   :  { %v774_v8 = vmax.f32 %v5500_v6, %v5520_v7  ;;  %v646_v9 = vpop.f32.mrb[11].mxu1  ;;  %v759_v10 = vpop.f32.mrb[23].mxu0 }
 0x3d0   :  { %v772_v11 = vmax.f32 %v646_v9, %v759_v10 }
 0x3d1   :  { %v778_v12 = vpack.c.bf16 %v774_v8, %v773_v55 }
 0x3d2   :  { %v777_v13 = vpack.c.bf16 %v772_v11, %v771_v5 }
 0x3d4   :  { %5522 = vmatpush3.bf16.msra.mxu1 %v777_v13  ;;  %5530 = vmatpush3.bf16.msra.mxu0 %v777_v13 }
 0x3d5   :  { %5523 = vmatprep.subr.bf16.mxu1 %v6765_v38  ;;  %5531 = vmatprep.subr.bf16.mxu0 %v6765_v38 }
 0x3d8   :  { %5524 = vmatpush3.bf16.msra.mxu1 %v778_v12  ;;  %5532 = vmatpush3.bf16.msra.mxu0 %v778_v12 }
 0x3d9   :  { %966 = vmatprep.subr.bf16.mxu1 %v6537_v14  ;;  %5537 = vmatprep.subr.bf16.mxu0 %v6765_v38 }
 0x3db   :  { %5526 = vmatmul.mubr.msk.bf16.vlgmr.msra.gmra.mrb[12].mxu1 %vm191_vm1, %v6533_v15  ;;  %5534 = vmatmul.mubr.msk.bf16.vlgmr.msra.gmra.mrb[24].mxu0 %vm191_vm1, %v6534_v16 }
 0x3dc   :  { %967 = vmatpush1.bf16.msra.mxu1 %v6535_v17  ;;  %5538 = vmatpush3.bf16.msra.mxu0 %v6538_v18 }
 0x3dd   :  { %968 = vmatprep.subr.bf16.mxu1 %v6541_v19  ;;  %5539 = vmatprep.subr.bf16.mxu0 %v6765_v38 }
 0x3de   :  { %998 = vmatprep.mubr.bf16.mxu1 %v6762_v0  ;;  %5545 = vmatprep.mubr.msk.bf16.mxu0 %vm6764_vm2, %v6765_v38 }
 0x3e0   :  { %969 = vmatpush1.bf16.msra.mxu1 %v6539_v20  ;;  %5540 = vmatpush3.bf16.msra.mxu0 %v6542_v21 }
 0x3e1   :  { %970 = vmatprep.subr.bf16.mxu1 %v6545_v22  ;;  %5541 = vmatprep.subr.bf16.mxu0 %v6765_v38 }
 0x3e4   :  { %971 = vmatpush1.bf16.msra.mxu1 %v6543_v23  ;;  %5542 = vmatpush3.bf16.msra.mxu0 %v6546_v24  ;;  %v6561_v24 = vld [vmem:[#allocation4 + $0x1fc] ss:$12 sps:$4 sm:$0xff]  }
 0x3e5   :  { %5543 = vmatprep.subr.bf16.mxu0 %v6765_v38  ;;  %972 = vmatprep.subr.bf16.mxu1 %v6549_v25 }
 0x3e8   :  { %973 = vmatpush1.bf16.msra.mxu1 %v6547_v26  ;;  %5544 = vmatpush3.bf16.msra.mxu0 %v6550_v27  ;;  %v6562_v27 = vld [vmem:[#allocation4 + $0x200] ss:$12 sps:$4 sm:$0xff]  }
 0x3e9   :  { %5549 = vmatprep.subr.bf16.mxu1 %v6765_v38  ;;  %5555 = vmatprep.subr.bf16.mxu0 %v6765_v38 }
 0x4ae   :  { %v821_v28 = vpop.f32.mrb[12].mxu1  ;;  %v872_v29 = vpop.f32.mrb[24].mxu0 }
 0x4af   :  { %v879_v30 = vmax.f32 %v821_v28, %v872_v29  ;;  %v5527_v32 = vpop.f32.mrb[13].mxu1  ;;  %v5535_v33 = vpop.f32.mrb[25].mxu0  ;;  %v6563_v29 = vld [vmem:[#allocation4 + $0x214] ss:$12 sps:$4 sm:$0xff]  }
 0x4b0   :  { %v824_v34 = vpop.f32.mrb[14].mxu1  ;;  %v875_v35 = vpop.f32.mrb[26].mxu0  ;;  %v6565_v32 = vld [vmem:[#allocation4 + $0x22c] ss:$12 sps:$4 sm:$0xff]   ;;  %v6566_v33 = vld [vmem:[#allocation4 + $0x230] ss:$12 sps:$4 sm:$0xff]  }
 0x4b1   :  { %v880_v36 = vmax.f32 %v824_v34, %v875_v35  ;;  %v5528_v37 = vpop.f32.mrb[15].mxu1  ;;  %v5536_v39 = vpop.f32.mrb[27].mxu0  ;;  %v6567_v34 = vld [vmem:[#allocation4 + $0x244] ss:$12 sps:$4 sm:$0xff]   ;;  %v6568_v35 = vld [vmem:[#allocation4 + $0x248] ss:$12 sps:$4 sm:$0xff]  }
 0x4b2   :  { %v6570_v37 = vld [vmem:[#allocation4 + $0x260] ss:$12 sps:$4 sm:$0xff]  }
 0x4b3   :  { %v897_v40 = vpack.c.bf16 %v880_v36, %v879_v30  ;;  %v6564_v30 = vld [vmem:[#allocation4 + $0x218] ss:$12 sps:$4 sm:$0xff]   ;;  %v6569_v36 = vld [vmem:[#allocation4 + $0x25c] ss:$12 sps:$4 sm:$0xff]   ;;  %v6571_v39 = vld [vmem:[#allocation4 + $0x274] ss:$12 sps:$4 sm:$0xff]  }
 0x4b5   :  { %4908 = vmatmul.mubr.msk.bf16.vlgmr.msra.gmra.mrb[16].mxu1 %vm962_vm3, %v897_v40  ;;  %5546 = vmatmul.mubr.msk.bf16.vlgmr.msra.gmra.mrb[28].mxu0 %vm962_vm3, %v897_v40  ;;  %v6572_v40 = vld [vmem:[#allocation4 + $0x278] ss:$12 sps:$4 sm:$0xff]  }
 0x4b6   :  { %5551 = vmatprep.mubr.msk.bf16.mxu1 %vm6764_vm2, %v6765_v38  ;;  %5557 = vmatprep.mubr.msk.bf16.mxu0 %vm6764_vm2, %v6765_v38 }
 0x588   :  { %v1000_v41 = vpop.f32.mrb[16].mxu1  ;;  %v1043_v42 = vpop.f32.mrb[28].mxu0 }
 0x589   :  { %v1002_v43 = vpop.f32.mrb[17].mxu1  ;;  %v5547_v44 = vpop.f32.mrb[29].mxu0 }
 0x58a   :  { %v1004_v46 = vpop.f32.mrb[18].mxu1  ;;  %v1046_v47 = vpop.f32.mrb[30].mxu0  ;;  %v6576_v44 = vld [vmem:[#allocation4 + $0x2a8] ss:$12 sps:$4 sm:$0xff]  }
 0x58b   :  { %v1052_v48 = vpack.c.bf16 %v1004_v46, %v1000_v41  ;;  %v1104_v49 = vpack.c.bf16 %v1046_v47, %v1043_v42  ;;  %v1006_v50 = vpop.f32.mrb[19].mxu1  ;;  %v5548_v52 = vpop.f32.mrb[31].mxu0  ;;  %v6573_v41 = vld [vmem:[#allocation4 + $0x28c] ss:$12 sps:$4 sm:$0xff]   ;;  %v6574_v42 = vld [vmem:[#allocation4 + $0x290] ss:$12 sps:$4 sm:$0xff]  }
 0x58d   :  { %5550 = vmatpush3.bf16.msra.mxu1 %v1052_v48  ;;  %5556 = vmatpush3.bf16.msra.mxu0 %v1104_v49 }
 0x58e   :  { %6209 = vmatprep.subr.bf16.mxu1 %v6763_v31  ;;  %6233 = vmatprep.subr.bf16.mxu0 %v6763_v31 }
 0x590   :  { %5552 = vmatmul.mubr.msk.bf16.vlgmr.msra.gmra.mrb[20].mxu1 %vm66_vm0, %v6551_v54  ;;  %5558 = vmatmul.mubr.msk.bf16.vlgmr.msra.gmra.mrb[32].mxu0 %vm66_vm0, %v6552_v56 }
 0x591   :  { %6211 = vmatpush3.bf16.msra.mxu1 %v6553_v58  ;;  %6235 = vmatpush3.bf16.msra.mxu0 %v6553_v58 }
 0x592   :  { %6212 = vmatprep.subr.bf16.mxu1 %v6763_v31  ;;  %6236 = vmatprep.subr.bf16.mxu0 %v6763_v31 }
 0x593   :  { %5593 = vmatprep.mubr.msk.f32.mxu1 %vm6764_vm2, %v6765_v38  ;;  %5628 = vmatprep.mubr.msk.f32.mxu0 %vm6764_vm2, %v6765_v38 }
 0x595   :  { %6214 = vmatpush3.bf16.msra.mxu1 %v6554_v59  ;;  %6238 = vmatpush3.bf16.msra.mxu0 %v6554_v59 }
 0x596   :  { %6215 = vmatprep.subr.bf16.mxu1 %v6763_v31  ;;  %6239 = vmatprep.subr.bf16.mxu0 %v6763_v31 }
 0x599   :  { %6217 = vmatpush3.bf16.msra.mxu1 %v6555_v60  ;;  %6241 = vmatpush3.bf16.msra.mxu0 %v6555_v60 }
 0x59a   :  { %6218 = vmatprep.subr.bf16.mxu1 %v6763_v31  ;;  %6242 = vmatprep.subr.bf16.mxu0 %v6763_v31 }
 0x59d   :  { %6220 = vmatpush3.bf16.msra.mxu1 %v6556_v61  ;;  %6244 = vmatpush3.bf16.msra.mxu0 %v6556_v61 }
 0x59e   :  { %6221 = vmatprep.subr.bf16.mxu1 %v6763_v31  ;;  %6245 = vmatprep.subr.bf16.mxu0 %v6763_v31 }
 0x5a1   :  { %6223 = vmatpush3.bf16.msra.mxu1 %v6557_v62  ;;  %6247 = vmatpush3.bf16.msra.mxu0 %v6557_v62 }
 0x5a2   :  { %6224 = vmatprep.subr.bf16.mxu1 %v6763_v31  ;;  %6248 = vmatprep.subr.bf16.mxu0 %v6763_v31 }
 0x5a5   :  { %6226 = vmatpush3.bf16.msra.mxu1 %v6558_v63  ;;  %6250 = vmatpush3.bf16.msra.mxu0 %v6558_v63 }
 0x5a6   :  { %6227 = vmatprep.subr.bf16.mxu1 %v6763_v31  ;;  %6251 = vmatprep.subr.bf16.mxu0 %v6763_v31 }
 0x5a9   :  { %6229 = vmatpush3.bf16.msra.mxu1 %v6559_v1  ;;  %6253 = vmatpush3.bf16.msra.mxu0 %v6559_v1 }
 0x5aa   :  { %6230 = vmatprep.subr.bf16.mxu1 %v6763_v31  ;;  %6254 = vmatprep.subr.bf16.mxu0 %v6763_v31 }
 0x5ad   :  { %6232 = vmatpush3.bf16.msra.mxu1 %v6560_v2  ;;  %6256 = vmatpush3.bf16.msra.mxu0 %v6560_v2 }
 0x5ae   :  { %5631 = vmatprep.subr.bf16.mxu1 %v6765_v38  ;;  %5651 = vmatprep.subr.bf16.mxu0 %v6765_v38 }
 0x663   :  { %v1095_v3 = vpop.f32.mrb[20].mxu1  ;;  %v1147_v51 = vpop.f32.mrb[32].mxu0 }
 0x664   :  { %v1096_v53 = vadd.f32 %v1095_v3, %v1002_v43  ;;  %v5553_v55 = vpop.f32.mrb[21].mxu1  ;;  %v5559_v57 = vpop.f32.mrb[33].mxu0  ;;  %v6575_v43 = vld [vmem:[#allocation4 + $0x2a4] ss:$12 sps:$4 sm:$0xff]  }
 0x665   :  { %v1098_v4 = vpop.f32.mrb[22].mxu1  ;;  %v1150_v5 = vpop.f32.mrb[34].mxu0 }
 0x666   :  { %v6926_v6 = vadd.f32 %v1147_v51, %v1096_v53  ;;  %v1099_v7 = vadd.f32 %v1098_v4, %v1006_v50  ;;  %v5554_v8 = vpop.f32.mrb[23].mxu1  ;;  %v5560_v9 = vpop.f32.mrb[35].mxu0 }
 0x668   :  { %v6928_v10 = vadd.f32 %v1150_v5, %v1099_v7  ;;  %v1163_v11 = vmul.f32 %v6926_v6, %v6926_v6 }
 0x66a   :  { %v1156_v12 = vadd.f32 %v6928_v10, %v6926_v6  ;;  %v1164_v13 = vmul.f32 %v6928_v10, %v6928_v10 }
 0x66c   :  { %v1157_v14 = vrot.slane %v1156_v12, 4  ;;  %v1165_v15 = vadd.f32 %v1164_v13, %v1163_v11  ;;  %v6579_v13 = vld [vmem:[#allocation4 + $0x7c] ss:$12 sps:$4 sm:$0xff]  }
 0x66e   :  { %v1158_v16 = vadd.f32 %v1157_v14, %v1156_v12  ;;  %v1166_v17 = vrot.slane %v1165_v15, 4 }
 0x670   :  { %v1159_v18 = vrot.slane %v1158_v16, 2  ;;  %v1167_v19 = vadd.f32 %v1166_v17, %v1165_v15  ;;  %v1578_v15 = vld [vmem:[#allocation4 + $0x548] sm:$0xf]  ;;  %v6577_v17 = vld [vmem:[#allocation4 + $0x78] ss:$12 sps:$4 sm:$0xff]  }
 0x672   :  { %v1160_v20 = vadd.f32 %v1159_v18, %v1158_v16  ;;  %v1168_v21 = vrot.slane %v1167_v19, 2  ;;  %v1623_v16 = vld [vmem:[#allocation4 + $0x558] sm:$0xf]  ;;  %v6580_v18 = vld [vmem:[#allocation4 + $0x80] ss:$12 sps:$4 sm:$0xff]  }
 0x674   :  { %v1161_v22 = vrot.slane %v1160_v20, 1  ;;  %v1169_v23 = vadd.f32 %v1168_v21, %v1167_v19  ;;  %v6583_v19 = vld [vmem:[#allocation4 + $0x94] ss:$12 sps:$4 sm:$0xff]   ;;  %v6584_v21 = vld [vmem:[#allocation4 + $0x98] ss:$12 sps:$4 sm:$0xff]  }
 0x676   :  { %v1162_v25 = vadd.f32 %v1161_v22, %v1160_v20  ;;  %v1170_v26 = vrot.slane %v1169_v23, 1  ;;  %v6581_v20 = vld [vmem:[#allocation4 + $0x90] ss:$12 sps:$4 sm:$0xff]   ;;  %v6587_v22 = vld [vmem:[#allocation4 + $0xac] ss:$12 sps:$4 sm:$0xff]  }
 0x678   :  { %5594 = vmatmul.mubr.f32.vlgmr.msra.gmra.mrb[6].mxu1 %v1162_v25  ;;  %v1171_v28 = vadd.f32 %v1170_v26, %v1169_v23  ;;  %v6585_v23 = vld [vmem:[#allocation4 + $0xa8] ss:$12 sps:$4 sm:$0xff]   ;;  %v6591_v25 = vld [vmem:[#allocation4 + $0xc4] ss:$12 sps:$4 sm:$0xff]   ;;  %v6589_v26 = vld [vmem:[#allocation4 + $0xc0] ss:$12 sps:$4 sm:$0xff]  }
 0x679   :  { %5632 = vmatpush3.bf16.msra.mxu1 %v6561_v24  ;;  %5647 = vmatprep.mubr.msk.bf16.mxu1 %vm6764_vm2, %v6765_v38  ;;  %v6588_v24 = vld [vmem:[#allocation4 + $0xb0] ss:$12 sps:$4 sm:$0xff]  }
 0x67a   :  { %5629 = vmatmul.mubr.f32.vlgmr.msra.gmra.mrb[18].mxu0 %v1171_v28  ;;  %5633 = vmatprep.subr.bf16.mxu1 %v6765_v38 }
 0x67b   :  { %5652 = vmatpush3.bf16.msra.mxu0 %v6562_v27  ;;  %5667 = vmatprep.mubr.msk.bf16.mxu0 %vm6764_vm2, %v6765_v38  ;;  %v6592_v27 = vld [vmem:[#allocation4 + $0xc8] ss:$12 sps:$4 sm:$0xff]  }
 0x67c   :  { %5653 = vmatprep.subr.bf16.mxu0 %v6765_v38 }
 0x67d   :  { %5634 = vmatpush3.bf16.msra.mxu1 %v6563_v29 }
 0x67e   :  { %5635 = vmatprep.subr.bf16.mxu1 %v6765_v38 }
 0x67f   :  { %5654 = vmatpush3.bf16.msra.mxu0 %v6564_v30 }
 0x680   :  { %5655 = vmatprep.subr.bf16.mxu0 %v6765_v38 }
 0x681   :  { %5636 = vmatpush3.bf16.msra.mxu1 %v6565_v32 }
 0x682   :  { %5637 = vmatprep.subr.bf16.mxu1 %v6765_v38 }
 0x683   :  { %5656 = vmatpush3.bf16.msra.mxu0 %v6566_v33 }
 0x684   :  { %5657 = vmatprep.subr.bf16.mxu0 %v6765_v38 }
 0x685   :  { %5638 = vmatpush3.bf16.msra.mxu1 %v6567_v34 }
 0x686   :  { %5639 = vmatprep.subr.bf16.mxu1 %v6765_v38 }
 0x687   :  { %5658 = vmatpush3.bf16.msra.mxu0 %v6568_v35 }
 0x688   :  { %5659 = vmatprep.subr.bf16.mxu0 %v6765_v38 }
 0x689   :  { %5640 = vmatpush3.bf16.msra.mxu1 %v6569_v36 }
 0x68a   :  { %5641 = vmatprep.subr.bf16.mxu1 %v6765_v38 }
 0x68b   :  { %5660 = vmatpush3.bf16.msra.mxu0 %v6570_v37 }
 0x68c   :  { %5661 = vmatprep.subr.bf16.mxu0 %v6765_v38 }
 0x68d   :  { %5642 = vmatpush3.bf16.msra.mxu1 %v6571_v39 }
 0x68e   :  { %5643 = vmatprep.subr.bf16.mxu1 %v6765_v38 }
 0x68f   :  { %5662 = vmatpush3.bf16.msra.mxu0 %v6572_v40 }
 0x690   :  { %5663 = vmatprep.subr.bf16.mxu0 %v6765_v38 }
 0x691   :  { %5644 = vmatpush3.bf16.msra.mxu1 %v6573_v41 }
 0x692   :  { %5645 = vmatprep.subr.bf16.mxu1 %v6765_v38 }
 0x693   :  { %5664 = vmatpush3.bf16.msra.mxu0 %v6574_v42 }
 0x694   :  { %5665 = vmatprep.subr.bf16.mxu0 %v6765_v38 }
 0x695   :  { %5646 = vmatpush3.bf16.msra.mxu1 %v6575_v43 }
 0x696   :  { %5671 = vmatprep.subr.bf16.mxu1 %v6765_v38 }
 0x697   :  { %5666 = vmatpush3.bf16.msra.mxu0 %v6576_v44 }
 0x698   :  { %5677 = vmatprep.subr.bf16.mxu0 %v6765_v38 }
 0x74b   :  { %v1270_v46 = vpop.f32.mrb[6].mxu1 }
 0x74c   :  { %v1344_v47 = vmul.f32 0.0078125, %v1270_v46  ;;  %v5595_v48 = vpop.f32.mrb[7].mxu1 }
 0x74d   :  { %v1340_v49 = vpop.f32.mrb[18].mxu0 }
 0x74e   :  { %v1346_v50 = vmul.f32 %v1344_v47, %v1344_v47  ;;  %v1345_v52 = vmul.f32 0.0078125, %v1340_v49  ;;  %v5630_v54 = vpop.f32.mrb[19].mxu0  ;;  %v1352_v60 = vrot.slane %v1344_v47, %v6871_v45 }
 0x750   :  { %v1347_v56 = vsub.f32 %v1345_v52, %v1346_v50  ;;  %v1353_v62 = vsub.f32 %v6926_v6, %v1352_v60  ;;  %v1354_v63 = vsub.f32 %v6928_v10, %v1352_v60  ;;  %v6594_v60 = vld [vmem:[#allocation4 + $0x2d0] ss:$12 sps:$4 sm:$0xff]  }
 0x752   :  { %v1348_v58 = vmax.f32 %v1347_v56, 0.0  ;;  %v1833_v56 = vld [vmem:[#allocation4 + $0x55c] sm:$0xf] }
 0x754   :  { %v1355_v59 = vadd.f32 1e-05, %v1348_v58  ;;  %v1883_v58 = vld [vmem:[#allocation4 + $0x560] sm:$0xf] }
 0x756   :  { %6686 = vrsqrt.f32 %v1355_v59  ;;  %v6593_v59 = vld [vmem:[#allocation4 + $0x2b8] ss:$12 sps:$4 sm:$0xff]  }
 0x760   :  { %v6687_v61 = vpop.eup %6686 }
 0x761   :  { %v1360_v1 = vrot.slane %v6687_v61, %v6871_v45  ;;  %v6595_v61 = vld [vmem:[#allocation4 + $0x2e8] ss:$12 sps:$4 sm:$0xff]  }
 0x763   :  { %v1361_v2 = vmul.f32 %v1360_v1, %v1353_v62  ;;  %v1362_v3 = vmul.f32 %v1360_v1, %v1354_v63  ;;  %v6596_v62 = vld [vmem:[#allocation4 + $0x300] ss:$12 sps:$4 sm:$0xff]   ;;  %v6597_v63 = vld [vmem:[#allocation4 + $0x318] ss:$12 sps:$4 sm:$0xff]   ;;  %v6598_v1 = vld [vmem:[#allocation4 + $0x330] ss:$12 sps:$4 sm:$0xff]  }
 0x765   :  { %v1363_v51 = vmax.f32 %v1361_v2, 0.0  ;;  %v1364_v53 = vmax.f32 %v1362_v3, 0.0  ;;  %v6599_v2 = vld [vmem:[#allocation4 + $0x348] ss:$12 sps:$4 sm:$0xff]   ;;  %v6600_v3 = vld [vmem:[#allocation4 + $0x360] ss:$12 sps:$4 sm:$0xff]  }
 0x767   :  { %v1381_v55 = vpack.c.bf16 %v1364_v53, %v1363_v51 }
 0x769   :  { %5648 = vmatmul.mubr.bf16.vlgmr.msra.gmra.mrb[24].mxu1 %v1381_v55  ;;  %5668 = vmatmul.mubr.bf16.vlgmr.msra.gmra.mrb[36].mxu0 %v1381_v55 }
 0x76a   :  { %5673 = vmatprep.mubr.msk.bf16.mxu1 %vm6764_vm2, %v6765_v38  ;;  %5679 = vmatprep.mubr.msk.bf16.mxu0 %vm6764_vm2, %v6765_v38 }
 0x83c   :  { %v1464_v57 = vpop.f32.mrb[24].mxu1  ;;  %v1569_v4 = vpop.f32.mrb[36].mxu0 }
 0x83d   :  { %v1576_v5 = vmax.f32 %v1464_v57, %v1569_v4  ;;  %v5649_v6 = vpop.f32.mrb[25].mxu1  ;;  %v5669_v7 = vpop.f32.mrb[37].mxu0 }
 0x83e   :  { %v1467_v8 = vpop.f32.mrb[26].mxu1  ;;  %v1572_v9 = vpop.f32.mrb[38].mxu0 }
 0x83f   :  { %v1577_v10 = vmax.f32 %v1467_v8, %v1572_v9  ;;  %v5650_v11 = vpop.f32.mrb[27].mxu1  ;;  %v5670_v12 = vpop.f32.mrb[39].mxu0 }
 0x841   :  { %v1579_v14 = vpack.c.bf16 %v1577_v10, %v1576_v5 }
 0x843   :  { %5672 = vmatpush3.bf16.msra.mxu1 %v1579_v14  ;;  %5678 = vmatpush3.bf16.msra.mxu0 %v1579_v14 }
 0x844   :  { %1752 = vmatprep.subr.bf16.mxu1 %v6579_v13  ;;  %5683 = vmatprep.subr.bf16.mxu0 %v6765_v38 }
 0x846   :  { %5674 = vmatmul.mubr.msk.bf16.vlgmr.msra.gmra.mrb[28].mxu1 %vm66_vm0, %v1578_v15  ;;  %5680 = vmatmul.mubr.msk.bf16.vlgmr.msra.gmra.mrb[40].mxu0 %vm66_vm0, %v1623_v16 }
 0x847   :  { %1753 = vmatpush1.bf16.msra.mxu1 %v6577_v17  ;;  %5684 = vmatpush3.bf16.msra.mxu0 %v6580_v18 }
 0x848   :  { %1754 = vmatprep.subr.bf16.mxu1 %v6583_v19  ;;  %5685 = vmatprep.subr.bf16.mxu0 %v6765_v38 }
 0x849   :  { %1784 = vmatprep.mubr.bf16.mxu1 %v6762_v0  ;;  %5691 = vmatprep.mubr.msk.bf16.mxu0 %vm6764_vm2, %v6765_v38 }
 0x84b   :  { %1755 = vmatpush1.bf16.msra.mxu1 %v6581_v20  ;;  %5686 = vmatpush3.bf16.msra.mxu0 %v6584_v21  ;;  %v6601_v20 = vld [vmem:[#allocation4 + $0x2bc] ss:$12 sps:$4 sm:$0xff]  }
 0x84c   :  { %1756 = vmatprep.subr.bf16.mxu1 %v6587_v22  ;;  %5687 = vmatprep.subr.bf16.mxu0 %v6765_v38 }
 0x84f   :  { %1757 = vmatpush1.bf16.msra.mxu1 %v6585_v23  ;;  %5688 = vmatpush3.bf16.msra.mxu0 %v6588_v24  ;;  %v6602_v23 = vld [vmem:[#allocation4 + $0x2c0] ss:$12 sps:$4 sm:$0xff]  }
 0x850   :  { %5689 = vmatprep.subr.bf16.mxu0 %v6765_v38  ;;  %1758 = vmatprep.subr.bf16.mxu1 %v6591_v25  ;;  %v6603_v25 = vld [vmem:[#allocation4 + $0x2d4] ss:$12 sps:$4 sm:$0xff]  }
 0x853   :  { %1759 = vmatpush1.bf16.msra.mxu1 %v6589_v26  ;;  %5690 = vmatpush3.bf16.msra.mxu0 %v6592_v27  ;;  %v6604_v26 = vld [vmem:[#allocation4 + $0x2d8] ss:$12 sps:$4 sm:$0xff]  }
 0x854   :  { %5695 = vmatprep.subr.bf16.mxu1 %v6765_v38  ;;  %5701 = vmatprep.subr.bf16.mxu0 %v6765_v38  ;;  %v6605_v27 = vld [vmem:[#allocation4 + $0x2ec] ss:$12 sps:$4 sm:$0xff]  }
 0x919   :  { %v1617_v28 = vpop.f32.mrb[28].mxu1  ;;  %v1661_v29 = vpop.f32.mrb[40].mxu0 }
 0x91a   :  { %v1667_v30 = vmax.f32 %v1617_v28, %v1661_v29  ;;  %v5675_v32 = vpop.f32.mrb[29].mxu1  ;;  %v5681_v33 = vpop.f32.mrb[41].mxu0  ;;  %v6606_v28 = vld [vmem:[#allocation4 + $0x2f0] ss:$12 sps:$4 sm:$0xff]  }
 0x91b   :  { %v1620_v34 = vpop.f32.mrb[30].mxu1  ;;  %v1664_v35 = vpop.f32.mrb[42].mxu0  ;;  %v6607_v29 = vld [vmem:[#allocation4 + $0x304] ss:$12 sps:$4 sm:$0xff]   ;;  %v6609_v32 = vld [vmem:[#allocation4 + $0x31c] ss:$12 sps:$4 sm:$0xff]  }
 0x91c   :  { %v1684_v36 = vpack.c.bf16 %v1667_v30, %v1667_v30  ;;  %v5676_v37 = vpop.f32.mrb[31].mxu1  ;;  %v5682_v39 = vpop.f32.mrb[43].mxu0  ;;  %v6608_v30 = vld [vmem:[#allocation4 + $0x308] ss:$12 sps:$4 sm:$0xff]   ;;  %v6610_v33 = vld [vmem:[#allocation4 + $0x320] ss:$12 sps:$4 sm:$0xff]  }
 0x91d   :  { %v6611_v34 = vld [vmem:[#allocation4 + $0x334] ss:$12 sps:$4 sm:$0xff]   ;;  %v6612_v35 = vld [vmem:[#allocation4 + $0x338] ss:$12 sps:$4 sm:$0xff]   ;;  %v6614_v37 = vld [vmem:[#allocation4 + $0x350] ss:$12 sps:$4 sm:$0xff]  }
 0x91e   :  { %4944 = vmatmul.mubr.msk.bf16.vlgmr.msra.gmra.mrb[32].mxu1 %vm962_vm3, %v1684_v36  ;;  %5692 = vmatmul.mubr.msk.bf16.vlgmr.msra.gmra.mrb[44].mxu0 %vm962_vm3, %v1684_v36  ;;  %v6613_v36 = vld [vmem:[#allocation4 + $0x34c] ss:$12 sps:$4 sm:$0xff]   ;;  %v6615_v39 = vld [vmem:[#allocation4 + $0x364] ss:$12 sps:$4 sm:$0xff]  }
 0x91f   :  { %5697 = vmatprep.mubr.msk.bf16.mxu1 %vm6764_vm2, %v6765_v38  ;;  %5703 = vmatprep.mubr.msk.bf16.mxu0 %vm6764_vm2, %v6765_v38 }
 0x9f1   :  { %v1786_v40 = vpop.f32.mrb[32].mxu1  ;;  %v1827_v41 = vpop.f32.mrb[44].mxu0 }
 0x9f2   :  { %v1834_v42 = vpack.c.bf16 %v1786_v40, %v1786_v40  ;;  %v1884_v43 = vpack.c.bf16 %v1827_v41, %v1827_v41  ;;  %v1788_v44 = vpop.f32.mrb[33].mxu1  ;;  %v5693_v46 = vpop.f32.mrb[45].mxu0  ;;  %v6616_v40 = vld [vmem:[#allocation4 + $0x368] ss:$12 sps:$4 sm:$0xff]  }
 0x9f3   :  { %v1790_v47 = vpop.f32.mrb[34].mxu1  ;;  %v1830_v48 = vpop.f32.mrb[46].mxu0 }
 0x9f4   :  { %v1841_v49 = vsel %vm1839_vm4, %v1834_v42, 0  ;;  %v1889_v50 = vsel %vm1839_vm4, %v1884_v43, 0  ;;  %v1791_v52 = vpop.f32.mrb[35].mxu1  ;;  %v5694_v54 = vpop.f32.mrb[47].mxu0 }
 0x9f5   :  { %5696 = vmatpush3.bf16.msra.mxu1 %v1841_v49  ;;  %5702 = vmatpush3.bf16.msra.mxu0 %v1889_v50 }
 0x9f6   :  { %6257 = vmatprep.subr.bf16.mxu1 %v6763_v31  ;;  %6281 = vmatprep.subr.bf16.mxu0 %v6763_v31 }
 0x9f8   :  { %5698 = vmatmul.mubr.msk.bf16.vlgmr.msra.gmra.mrb[36].mxu1 %vm1835_vm5, %v1833_v56  ;;  %5704 = vmatmul.mubr.msk.bf16.vlgmr.msra.gmra.mrb[48].mxu0 %vm1835_vm5, %v1883_v58 }
 0x9f9   :  { %6259 = vmatpush3.bf16.msra.mxu1 %v6593_v59  ;;  %6283 = vmatpush3.bf16.msra.mxu0 %v6593_v59 }
 0x9fa   :  { %6260 = vmatprep.subr.bf16.mxu1 %v6763_v31  ;;  %6284 = vmatprep.subr.bf16.mxu0 %v6763_v31 }
 0x9fb   :  { %5739 = vmatprep.mubr.msk.f32.mxu1 %vm6764_vm2, %v6765_v38  ;;  %5774 = vmatprep.mubr.msk.f32.mxu0 %vm6764_vm2, %v6765_v38 }
 0x9fd   :  { %6262 = vmatpush3.bf16.msra.mxu1 %v6594_v60  ;;  %6286 = vmatpush3.bf16.msra.mxu0 %v6594_v60 }
 0x9fe   :  { %6263 = vmatprep.subr.bf16.mxu1 %v6763_v31  ;;  %6287 = vmatprep.subr.bf16.mxu0 %v6763_v31 }
 0xa01   :  { %6265 = vmatpush3.bf16.msra.mxu1 %v6595_v61  ;;  %6289 = vmatpush3.bf16.msra.mxu0 %v6595_v61 }
 0xa02   :  { %6266 = vmatprep.subr.bf16.mxu1 %v6763_v31  ;;  %6290 = vmatprep.subr.bf16.mxu0 %v6763_v31 }
 0xa05   :  { %6268 = vmatpush3.bf16.msra.mxu1 %v6596_v62  ;;  %6292 = vmatpush3.bf16.msra.mxu0 %v6596_v62 }
 0xa06   :  { %6269 = vmatprep.subr.bf16.mxu1 %v6763_v31  ;;  %6293 = vmatprep.subr.bf16.mxu0 %v6763_v31 }
 0xa09   :  { %6271 = vmatpush3.bf16.msra.mxu1 %v6597_v63  ;;  %6295 = vmatpush3.bf16.msra.mxu0 %v6597_v63 }
 0xa0a   :  { %6272 = vmatprep.subr.bf16.mxu1 %v6763_v31  ;;  %6296 = vmatprep.subr.bf16.mxu0 %v6763_v31 }
 0xa0d   :  { %6274 = vmatpush3.bf16.msra.mxu1 %v6598_v1  ;;  %6298 = vmatpush3.bf16.msra.mxu0 %v6598_v1 }
 0xa0e   :  { %6275 = vmatprep.subr.bf16.mxu1 %v6763_v31  ;;  %6299 = vmatprep.subr.bf16.mxu0 %v6763_v31 }
 0xa11   :  { %6277 = vmatpush3.bf16.msra.mxu1 %v6599_v2  ;;  %6301 = vmatpush3.bf16.msra.mxu0 %v6599_v2 }
 0xa12   :  { %6278 = vmatprep.subr.bf16.mxu1 %v6763_v31  ;;  %6302 = vmatprep.subr.bf16.mxu0 %v6763_v31 }
 0xa15   :  { %6280 = vmatpush3.bf16.msra.mxu1 %v6600_v3  ;;  %6304 = vmatpush3.bf16.msra.mxu0 %v6600_v3 }
 0xa16   :  { %5777 = vmatprep.subr.bf16.mxu1 %v6765_v38  ;;  %5797 = vmatprep.subr.bf16.mxu0 %v6765_v38 }
 0xacb   :  { %v1877_v51 = vpop.f32.mrb[36].mxu1  ;;  %v1925_v53 = vpop.f32.mrb[48].mxu0 }
 0xacc   :  { %v1878_v55 = vadd.f32 %v1877_v51, %v1788_v44  ;;  %v5699_v57 = vpop.f32.mrb[37].mxu1  ;;  %v5705_v4 = vpop.f32.mrb[49].mxu0 }
 0xacd   :  { %v1880_v5 = vpop.f32.mrb[38].mxu1  ;;  %v1928_v6 = vpop.f32.mrb[50].mxu0 }
 0xace   :  { %v7007_v7 = vadd.f32 %v1925_v53, %v1878_v55  ;;  %v5700_v8 = vpop.f32.mrb[39].mxu1  ;;  %v5706_v9 = vpop.f32.mrb[51].mxu0  ;;  %v6619_v6 = vld [vmem:[#allocation4 + $0xdc] ss:$12 sps:$4 sm:$0xff]  }
 0xacf   :  { %v2345_v8 = vld [vmem:[#allocation4 + $0x588] sm:$0x3]  ;;  %v2393_v9 = vld [vmem:[#allocation4 + $0x58c] sm:$0x3] }
 0xad0   :  { %v1932_v10 = vrot.slane %v7007_v7, 4  ;;  %v1938_v11 = vmul.f32 %v7007_v7, %v7007_v7 }
 0xad2   :  { %v1933_v12 = vadd.f32 %v1932_v10, %v7007_v7  ;;  %v1939_v13 = vrot.slane %v1938_v11, 4  ;;  %v6617_v10 = vld [vmem:[#allocation4 + $0xd8] ss:$12 sps:$4 sm:$0xff]  }
 0xad4   :  { %v1934_v14 = vrot.slane %v1933_v12, 2  ;;  %v1940_v15 = vadd.f32 %v1939_v13, %v1938_v11  ;;  %v6620_v11 = vld [vmem:[#allocation4 + $0xe0] ss:$12 sps:$4 sm:$0xff]   ;;  %v6621_v13 = vld [vmem:[#allocation4 + $0xf0] ss:$12 sps:$4 sm:$0xff]  }
 0xad6   :  { %v1935_v16 = vadd.f32 %v1934_v14, %v1933_v12  ;;  %v1941_v17 = vrot.slane %v1940_v15, 2  ;;  %v6623_v12 = vld [vmem:[#allocation4 + $0xf4] ss:$12 sps:$4 sm:$0xff]   ;;  %v6624_v14 = vld [vmem:[#allocation4 + $0xf8] ss:$12 sps:$4 sm:$0xff]  }
 0xad8   :  { %v1936_v18 = vrot.slane %v1935_v16, 1  ;;  %v1942_v19 = vadd.f32 %v1941_v17, %v1940_v15  ;;  %v6627_v15 = vld [vmem:[#allocation4 + $0x10c] ss:$12 sps:$4 sm:$0xff]   ;;  %v6628_v17 = vld [vmem:[#allocation4 + $0x110] ss:$12 sps:$4 sm:$0xff]  }
 0xada   :  { %v1937_v21 = vadd.f32 %v1936_v18, %v1935_v16  ;;  %v1943_v22 = vrot.slane %v1942_v19, 1  ;;  %v6625_v16 = vld [vmem:[#allocation4 + $0x108] ss:$12 sps:$4 sm:$0xff]   ;;  %v6631_v18 = vld [vmem:[#allocation4 + $0x124] ss:$12 sps:$4 sm:$0xff]  }
 0xadc   :  { %5740 = vmatmul.mubr.f32.vlgmr.msra.gmra.mrb[40].mxu1 %v1937_v21  ;;  %v1944_v24 = vadd.f32 %v1943_v22, %v1942_v19  ;;  %v6629_v19 = vld [vmem:[#allocation4 + $0x120] ss:$12 sps:$4 sm:$0xff]  }
 0xadd   :  { %5778 = vmatpush3.bf16.msra.mxu1 %v6601_v20  ;;  %5793 = vmatprep.mubr.msk.bf16.mxu1 %vm6764_vm2, %v6765_v38  ;;  %v6632_v20 = vld [vmem:[#allocation4 + $0x128] ss:$12 sps:$4 sm:$0xff]  }
 0xade   :  { %5775 = vmatmul.mubr.f32.vlgmr.msra.gmra.mrb[52].mxu0 %v1944_v24  ;;  %5779 = vmatprep.subr.bf16.mxu1 %v6765_v38 }
 0xadf   :  { %5798 = vmatpush3.bf16.msra.mxu0 %v6602_v23  ;;  %5813 = vmatprep.mubr.msk.bf16.mxu0 %vm6764_vm2, %v6765_v38 }
 0xae0   :  { %5799 = vmatprep.subr.bf16.mxu0 %v6765_v38 }
 0xae1   :  { %5780 = vmatpush3.bf16.msra.mxu1 %v6603_v25 }
 0xae2   :  { %5781 = vmatprep.subr.bf16.mxu1 %v6765_v38 }
 0xae3   :  { %5800 = vmatpush3.bf16.msra.mxu0 %v6604_v26 }
 0xae4   :  { %5801 = vmatprep.subr.bf16.mxu0 %v6765_v38 }
 0xae5   :  { %5782 = vmatpush3.bf16.msra.mxu1 %v6605_v27 }
 0xae6   :  { %5783 = vmatprep.subr.bf16.mxu1 %v6765_v38 }
 0xae7   :  { %5802 = vmatpush3.bf16.msra.mxu0 %v6606_v28 }
 0xae8   :  { %5803 = vmatprep.subr.bf16.mxu0 %v6765_v38 }
 0xae9   :  { %5784 = vmatpush3.bf16.msra.mxu1 %v6607_v29 }
 0xaea   :  { %5785 = vmatprep.subr.bf16.mxu1 %v6765_v38 }
 0xaeb   :  { %5804 = vmatpush3.bf16.msra.mxu0 %v6608_v30 }
 0xaec   :  { %5805 = vmatprep.subr.bf16.mxu0 %v6765_v38 }
 0xaed   :  { %5786 = vmatpush3.bf16.msra.mxu1 %v6609_v32 }
 0xaee   :  { %5787 = vmatprep.subr.bf16.mxu1 %v6765_v38 }
 0xaef   :  { %5806 = vmatpush3.bf16.msra.mxu0 %v6610_v33 }
 0xaf0   :  { %5807 = vmatprep.subr.bf16.mxu0 %v6765_v38 }
 0xaf1   :  { %5788 = vmatpush3.bf16.msra.mxu1 %v6611_v34 }
 0xaf2   :  { %5789 = vmatprep.subr.bf16.mxu1 %v6765_v38 }
 0xaf3   :  { %5808 = vmatpush3.bf16.msra.mxu0 %v6612_v35 }
 0xaf4   :  { %5809 = vmatprep.subr.bf16.mxu0 %v6765_v38 }
 0xaf5   :  { %5790 = vmatpush3.bf16.msra.mxu1 %v6613_v36 }
 0xaf6   :  { %5791 = vmatprep.subr.bf16.mxu1 %v6765_v38 }
 0xaf7   :  { %5810 = vmatpush3.bf16.msra.mxu0 %v6614_v37 }
 0xaf8   :  { %5811 = vmatprep.subr.bf16.mxu0 %v6765_v38 }
 0xaf9   :  { %5792 = vmatpush3.bf16.msra.mxu1 %v6615_v39 }
 0xafa   :  { %5817 = vmatprep.subr.bf16.mxu1 %v6765_v38 }
 0xafb   :  { %5812 = vmatpush3.bf16.msra.mxu0 %v6616_v40 }
 0xafc   :  { %5823 = vmatprep.subr.bf16.mxu0 %v6765_v38 }
 0xbaf   :  { %v2043_v41 = vpop.f32.mrb[40].mxu1 }
 0xbb0   :  { %v2117_v42 = vmul.f32 0.03125, %v2043_v41  ;;  %v5741_v43 = vpop.f32.mrb[41].mxu1 }
 0xbb1   :  { %v2113_v44 = vpop.f32.mrb[52].mxu0 }
 0xbb2   :  { %v2119_v46 = vmul.f32 %v2117_v42, %v2117_v42  ;;  %v2118_v47 = vmul.f32 0.03125, %v2113_v44  ;;  %v5776_v48 = vpop.f32.mrb[53].mxu0  ;;  %v2125_v54 = vrot.slane %v2117_v42, %v6871_v45  ;;  %v2603_v44 = vld [vmem:[#allocation4 + $0x590] sm:$0x3] }
 0xbb3   :  { %v6634_v48 = vld [vmem:[#allocation4 + $0x390] ss:$12 sps:$4 sm:$0xff]  }
 0xbb4   :  { %v2120_v49 = vsub.f32 %v2118_v47, %v2119_v46  ;;  %v2126_v58 = vsub.f32 %v7007_v7, %v2125_v54  ;;  %v2653_v46 = vld [vmem:[#allocation4 + $0x5a0] sm:$0x3]  ;;  %v6633_v47 = vld [vmem:[#allocation4 + $0x378] ss:$12 sps:$4 sm:$0xff]   ;;  %v6638_v54 = vld [vmem:[#allocation4 + $0x3f0] ss:$12 sps:$4 sm:$0xff]  }
 0xbb6   :  { %v2121_v50 = vmax.f32 %v2120_v49, 0.0  ;;  %v6635_v49 = vld [vmem:[#allocation4 + $0x3a8] ss:$12 sps:$4 sm:$0xff]  }
 0xbb8   :  { %v2127_v52 = vadd.f32 1e-05, %v2121_v50  ;;  %v6636_v50 = vld [vmem:[#allocation4 + $0x3c0] ss:$12 sps:$4 sm:$0xff]  }
 0xbba   :  { %6688 = vrsqrt.f32 %v2127_v52  ;;  %v6637_v52 = vld [vmem:[#allocation4 + $0x3d8] ss:$12 sps:$4 sm:$0xff]  }
 0xbc4   :  { %v6689_v56 = vpop.eup %6688 }
 0xbc5   :  { %v2132_v59 = vrot.slane %v6689_v56, %v6871_v45  ;;  %v6639_v56 = vld [vmem:[#allocation4 + $0x408] ss:$12 sps:$4 sm:$0xff]  }
 0xbc7   :  { %v2133_v60 = vmul.f32 %v2132_v59, %v2126_v58  ;;  %v6640_v58 = vld [vmem:[#allocation4 + $0x420] ss:$12 sps:$4 sm:$0xff]  }
 0xbc9   :  { %v2134_v61 = vmax.f32 %v2133_v60, 0.0 }
 0xbcb   :  { %v2151_v62 = vpack.c.bf16 %v2134_v61, %v2134_v61 }
 0xbcd   :  { %5794 = vmatmul.mubr.bf16.vlgmr.msra.gmra.mrb[44].mxu1 %v2151_v62  ;;  %5814 = vmatmul.mubr.bf16.vlgmr.msra.gmra.mrb[56].mxu0 %v2151_v62 }
 0xbce   :  { %5819 = vmatprep.mubr.msk.bf16.mxu1 %vm6764_vm2, %v6765_v38  ;;  %5825 = vmatprep.mubr.msk.bf16.mxu0 %vm6764_vm2, %v6765_v38 }
 0xca0   :  { %v2234_v63 = vpop.f32.mrb[44].mxu1  ;;  %v2338_v1 = vpop.f32.mrb[56].mxu0 }
 0xca1   :  { %v2344_v2 = vmax.f32 %v2234_v63, %v2338_v1  ;;  %v5795_v3 = vpop.f32.mrb[45].mxu1  ;;  %v5815_v51 = vpop.f32.mrb[57].mxu0 }
 0xca2   :  { %v2237_v53 = vpop.f32.mrb[46].mxu1  ;;  %v2341_v55 = vpop.f32.mrb[58].mxu0 }
 0xca3   :  { %v2346_v57 = vpack.c.bf16 %v2344_v2, %v2344_v2  ;;  %v5796_v4 = vpop.f32.mrb[47].mxu1  ;;  %v5816_v5 = vpop.f32.mrb[59].mxu0 }
 0xca5   :  { %v2351_v7 = vsel %vm1839_vm4, %v2346_v57, 0 }
 0xca6   :  { %5818 = vmatpush3.bf16.msra.mxu1 %v2351_v7  ;;  %5824 = vmatpush3.bf16.msra.mxu0 %v2351_v7 }
 0xca7   :  { %2522 = vmatprep.subr.bf16.mxu1 %v6619_v6  ;;  %5829 = vmatprep.subr.bf16.mxu0 %v6765_v38 }
 0xca9   :  { %5820 = vmatmul.mubr.msk.bf16.vlgmr.msra.gmra.mrb[48].mxu1 %vm1835_vm5, %v2345_v8  ;;  %5826 = vmatmul.mubr.msk.bf16.vlgmr.msra.gmra.mrb[60].mxu0 %vm1835_vm5, %v2393_v9 }
 0xcaa   :  { %2523 = vmatpush1.bf16.msra.mxu1 %v6617_v10  ;;  %5830 = vmatpush3.bf16.msra.mxu0 %v6620_v11 }
 0xcab   :  { %2524 = vmatprep.subr.bf16.mxu1 %v6623_v12  ;;  %5831 = vmatprep.subr.bf16.mxu0 %v6765_v38 }
 0xcac   :  { %2554 = vmatprep.mubr.bf16.mxu1 %v6762_v0  ;;  %5837 = vmatprep.mubr.msk.bf16.mxu0 %vm6764_vm2, %v6765_v38 }
 0xcae   :  { %2525 = vmatpush1.bf16.msra.mxu1 %v6621_v13  ;;  %5832 = vmatpush3.bf16.msra.mxu0 %v6624_v14  ;;  %v6641_v14 = vld [vmem:[#allocation4 + $0x37c] ss:$12 sps:$4 sm:$0xff]  }
 0xcaf   :  { %2526 = vmatprep.subr.bf16.mxu1 %v6627_v15  ;;  %5833 = vmatprep.subr.bf16.mxu0 %v6765_v38 }
 0xcb2   :  { %2527 = vmatpush1.bf16.msra.mxu1 %v6625_v16  ;;  %5834 = vmatpush3.bf16.msra.mxu0 %v6628_v17  ;;  %v6642_v17 = vld [vmem:[#allocation4 + $0x380] ss:$12 sps:$4 sm:$0xff]  }
 0xcb3   :  { %5835 = vmatprep.subr.bf16.mxu0 %v6765_v38  ;;  %2528 = vmatprep.subr.bf16.mxu1 %v6631_v18 }
 0xcb6   :  { %2529 = vmatpush1.bf16.msra.mxu1 %v6629_v19  ;;  %5836 = vmatpush3.bf16.msra.mxu0 %v6632_v20  ;;  %v6643_v19 = vld [vmem:[#allocation4 + $0x394] ss:$12 sps:$4 sm:$0xff]   ;;  %v6644_v20 = vld [vmem:[#allocation4 + $0x398] ss:$12 sps:$4 sm:$0xff]  }
 0xcb7   :  { %5841 = vmatprep.subr.bf16.mxu1 %v6765_v38  ;;  %5847 = vmatprep.subr.bf16.mxu0 %v6765_v38 }
 0xd7c   :  { %v2387_v0 = vpop.f32.mrb[48].mxu1  ;;  %v2431_v21 = vpop.f32.mrb[60].mxu0 }
 0xd7d   :  { %v2437_v22 = vmax.f32 %v2387_v0, %v2431_v21  ;;  %v5821_v23 = vpop.f32.mrb[49].mxu1  ;;  %v5827_v24 = vpop.f32.mrb[61].mxu0  ;;  %v6645_v0 = vld [vmem:[#allocation4 + $0x3ac] ss:$12 sps:$4 sm:$0xff]   ;;  %v6646_v21 = vld [vmem:[#allocation4 + $0x3b0] ss:$12 sps:$4 sm:$0xff]  }
 0xd7e   :  { %v2390_v25 = vpop.f32.mrb[50].mxu1  ;;  %v2434_v26 = vpop.f32.mrb[62].mxu0  ;;  %v6648_v23 = vld [vmem:[#allocation4 + $0x3c8] ss:$12 sps:$4 sm:$0xff]  }
 0xd7f   :  { %v2454_v27 = vpack.c.bf16 %v2437_v22, %v2437_v22  ;;  %v5822_v28 = vpop.f32.mrb[51].mxu1  ;;  %v5828_v29 = vpop.f32.mrb[63].mxu0  ;;  %v6647_v22 = vld [vmem:[#allocation4 + $0x3c4] ss:$12 sps:$4 sm:$0xff]   ;;  %v6649_v24 = vld [vmem:[#allocation4 + $0x3dc] ss:$12 sps:$4 sm:$0xff]  }
 0xd80   :  { %v6650_v25 = vld [vmem:[#allocation4 + $0x3e0] ss:$12 sps:$4 sm:$0xff]   ;;  %v6654_v29 = vld [vmem:[#allocation4 + $0x410] ss:$12 sps:$4 sm:$0xff]  }
 0xd81   :  { %4978 = vmatmul.mubr.msk.bf16.vlgmr.msra.gmra.mrb[52].mxu1 %vm962_vm3, %v2454_v27  ;;  %5838 = vmatmul.mubr.msk.bf16.vlgmr.msra.gmra.mrb[64].mxu0 %vm962_vm3, %v2454_v27  ;;  %v6651_v26 = vld [vmem:[#allocation4 + $0x3f4] ss:$12 sps:$4 sm:$0xff]   ;;  %v6652_v27 = vld [vmem:[#allocation4 + $0x3f8] ss:$12 sps:$4 sm:$0xff]  }
 0xd82   :  { %5843 = vmatprep.mubr.msk.bf16.mxu1 %vm6764_vm2, %v6765_v38  ;;  %5849 = vmatprep.mubr.msk.bf16.mxu0 %vm6764_vm2, %v6765_v38  ;;  %v6653_v28 = vld [vmem:[#allocation4 + $0x40c] ss:$12 sps:$4 sm:$0xff]  }
 0xe54   :  { %v2556_v30 = vpop.f32.mrb[52].mxu1  ;;  %v2597_v32 = vpop.f32.mrb[64].mxu0 }
 0xe55   :  { %v2604_v33 = vpack.c.bf16 %v2556_v30, %v2556_v30  ;;  %v2654_v34 = vpack.c.bf16 %v2597_v32, %v2597_v32  ;;  %v2558_v35 = vpop.f32.mrb[53].mxu1  ;;  %v5839_v36 = vpop.f32.mrb[65].mxu0  ;;  %v6655_v30 = vld [vmem:[#allocation4 + $0x424] ss:$12 sps:$4 sm:$0xff]   ;;  %v6656_v32 = vld [vmem:[#allocation4 + $0x428] ss:$12 sps:$4 sm:$0xff]  }
 0xe56   :  { %v2560_v37 = vpop.f32.mrb[54].mxu1  ;;  %v2600_v39 = vpop.f32.mrb[66].mxu0 }
 0xe57   :  { %v2611_v40 = vsel %vm2609_vm6, %v2604_v33, 0  ;;  %v2659_v41 = vsel %vm2609_vm6, %v2654_v34, 0  ;;  %v2561_v42 = vpop.f32.mrb[55].mxu1  ;;  %v5840_v43 = vpop.f32.mrb[67].mxu0 }
 0xe58   :  { %5842 = vmatpush3.bf16.msra.mxu1 %v2611_v40  ;;  %5848 = vmatpush3.bf16.msra.mxu0 %v2659_v41 }
 0xe59   :  { %6305 = vmatprep.subr.bf16.mxu1 %v6763_v31  ;;  %6329 = vmatprep.subr.bf16.mxu0 %v6763_v31 }
 0xe5b   :  { %5844 = vmatmul.mubr.msk.bf16.vlgmr.msra.gmra.mrb[56].mxu1 %vm2605_vm7, %v2603_v44  ;;  %5850 = vmatmul.mubr.msk.bf16.vlgmr.msra.gmra.mrb[68].mxu0 %vm2605_vm7, %v2653_v46 }
 0xe5c   :  { %6307 = vmatpush3.bf16.msra.mxu1 %v6633_v47  ;;  %6331 = vmatpush3.bf16.msra.mxu0 %v6633_v47 }
 0xe5d   :  { %6308 = vmatprep.subr.bf16.mxu1 %v6763_v31  ;;  %6332 = vmatprep.subr.bf16.mxu0 %v6763_v31 }
 0xe5e   :  { %5885 = vmatprep.mubr.msk.f32.mxu1 %vm6764_vm2, %v6765_v38  ;;  %5920 = vmatprep.mubr.msk.f32.mxu0 %vm6764_vm2, %v6765_v38 }
 0xe60   :  { %6310 = vmatpush3.bf16.msra.mxu1 %v6634_v48  ;;  %6334 = vmatpush3.bf16.msra.mxu0 %v6634_v48 }
 0xe61   :  { %6311 = vmatprep.subr.bf16.mxu1 %v6763_v31  ;;  %6335 = vmatprep.subr.bf16.mxu0 %v6763_v31 }
 0xe64   :  { %6313 = vmatpush3.bf16.msra.mxu1 %v6635_v49  ;;  %6337 = vmatpush3.bf16.msra.mxu0 %v6635_v49 }
 0xe65   :  { %6314 = vmatprep.subr.bf16.mxu1 %v6763_v31  ;;  %6338 = vmatprep.subr.bf16.mxu0 %v6763_v31 }
 0xe68   :  { %6316 = vmatpush3.bf16.msra.mxu1 %v6636_v50  ;;  %6340 = vmatpush3.bf16.msra.mxu0 %v6636_v50 }
 0xe69   :  { %6317 = vmatprep.subr.bf16.mxu1 %v6763_v31  ;;  %6341 = vmatprep.subr.bf16.mxu0 %v6763_v31 }
 0xe6c   :  { %6319 = vmatpush3.bf16.msra.mxu1 %v6637_v52  ;;  %6343 = vmatpush3.bf16.msra.mxu0 %v6637_v52 }
 0xe6d   :  { %6320 = vmatprep.subr.bf16.mxu1 %v6763_v31  ;;  %6344 = vmatprep.subr.bf16.mxu0 %v6763_v31 }
 0xe70   :  { %6322 = vmatpush3.bf16.msra.mxu1 %v6638_v54  ;;  %6346 = vmatpush3.bf16.msra.mxu0 %v6638_v54 }
 0xe71   :  { %6323 = vmatprep.subr.bf16.mxu1 %v6763_v31  ;;  %6347 = vmatprep.subr.bf16.mxu0 %v6763_v31 }
 0xe74   :  { %6325 = vmatpush3.bf16.msra.mxu1 %v6639_v56  ;;  %6349 = vmatpush3.bf16.msra.mxu0 %v6639_v56 }
 0xe75   :  { %6326 = vmatprep.subr.bf16.mxu1 %v6763_v31  ;;  %6350 = vmatprep.subr.bf16.mxu0 %v6763_v31 }
 0xe78   :  { %6328 = vmatpush3.bf16.msra.mxu1 %v6640_v58  ;;  %6352 = vmatpush3.bf16.msra.mxu0 %v6640_v58 }
 0xe79   :  { %5923 = vmatprep.subr.bf16.mxu1 %v6765_v38  ;;  %5943 = vmatprep.subr.bf16.mxu0 %v6765_v38 }
 0xf2e   :  { %v2647_v59 = vpop.f32.mrb[56].mxu1  ;;  %v2695_v60 = vpop.f32.mrb[68].mxu0 }
 0xf2f   :  { %v2648_v61 = vadd.f32 %v2647_v59, %v2558_v35  ;;  %v5845_v62 = vpop.f32.mrb[57].mxu1  ;;  %v5851_v63 = vpop.f32.mrb[69].mxu0 }
 0xf30   :  { %v2650_v1 = vpop.f32.mrb[58].mxu1  ;;  %v2698_v2 = vpop.f32.mrb[70].mxu0 }
 0xf31   :  { %v7084_v3 = vadd.f32 %v2695_v60, %v2648_v61  ;;  %v5846_v51 = vpop.f32.mrb[59].mxu1  ;;  %v5852_v53 = vpop.f32.mrb[71].mxu0 }
 0xf32   :  { %v3117_v51 = vld [vmem:[#allocation4 + $0x5bc] sm:$0x1]  ;;  %v3165_v53 = vld [vmem:[#allocation4 + $0x5c0] sm:$0x1] }
 0xf33   :  { %v2702_v55 = vsel %vm1839_vm4, %v7084_v3, 0.0  ;;  %v2709_v57 = vmul.f32 %v7084_v3, %v7084_v3 }
 0xf34   :  { %v2703_v4 = vrot.slane %v2702_v55, 4 }
 0xf35   :  { %v2710_v5 = vsel %vm1839_vm4, %v2709_v57, 0.0  ;;  %v6658_v57 = vld [vmem:[#allocation4 + $0x450] ss:$12 sps:$4 sm:$0xff]  }
 0xf36   :  { %v2704_v6 = vadd.f32 %v2703_v4, %v2702_v55  ;;  %v2711_v7 = vrot.slane %v2710_v5, 4  ;;  %v6657_v55 = vld [vmem:[#allocation4 + $0x438] ss:$12 sps:$4 sm:$0xff]   ;;  %v6659_v4 = vld [vmem:[#allocation4 + $0x468] ss:$12 sps:$4 sm:$0xff]  }
 0xf38   :  { %v2705_v8 = vrot.slane %v2704_v6, 2  ;;  %v2712_v9 = vadd.f32 %v2711_v7, %v2710_v5  ;;  %v6660_v5 = vld [vmem:[#allocation4 + $0x480] ss:$12 sps:$4 sm:$0xff]  }
 0xf3a   :  { %v2706_v10 = vadd.f32 %v2705_v8, %v2704_v6  ;;  %v2713_v11 = vrot.slane %v2712_v9, 2 }
 0xf3c   :  { %v2707_v12 = vrot.slane %v2706_v10, 1  ;;  %v2714_v13 = vadd.f32 %v2713_v11, %v2712_v9 }
 0xf3e   :  { %v2708_v15 = vadd.f32 %v2707_v12, %v2706_v10  ;;  %v2715_v16 = vrot.slane %v2714_v13, 1 }
 0xf40   :  { %5886 = vmatmul.mubr.f32.vlgmr.msra.gmra.mrb[42].mxu1 %v2708_v15  ;;  %v2716_v18 = vadd.f32 %v2715_v16, %v2714_v13  ;;  %v6661_v16 = vld [vmem:[#allocation4 + $0x46c] ss:$12 sps:$4 sm:$0xff]  }
 0xf41   :  { %5924 = vmatpush3.bf16.msra.mxu1 %v6641_v14  ;;  %5939 = vmatprep.mubr.msk.bf16.mxu1 %vm6764_vm2, %v6765_v38 }
 0xf42   :  { %5921 = vmatmul.mubr.f32.vlgmr.msra.gmra.mrb[54].mxu0 %v2716_v18  ;;  %5925 = vmatprep.subr.bf16.mxu1 %v6765_v38 }
 0xf43   :  { %5944 = vmatpush3.bf16.msra.mxu0 %v6642_v17  ;;  %5959 = vmatprep.mubr.msk.bf16.mxu0 %vm6764_vm2, %v6765_v38  ;;  %v6662_v17 = vld [vmem:[#allocation4 + $0x484] ss:$12 sps:$4 sm:$0xff]  }
 0xf44   :  { %5945 = vmatprep.subr.bf16.mxu0 %v6765_v38 }
 0xf45   :  { %5926 = vmatpush3.bf16.msra.mxu1 %v6643_v19 }
 0xf46   :  { %5927 = vmatprep.subr.bf16.mxu1 %v6765_v38 }
 0xf47   :  { %5946 = vmatpush3.bf16.msra.mxu0 %v6644_v20 }
 0xf48   :  { %5947 = vmatprep.subr.bf16.mxu0 %v6765_v38 }
 0xf49   :  { %5928 = vmatpush3.bf16.msra.mxu1 %v6645_v0 }
 0xf4a   :  { %5929 = vmatprep.subr.bf16.mxu1 %v6765_v38 }
 0xf4b   :  { %5948 = vmatpush3.bf16.msra.mxu0 %v6646_v21 }
 0xf4c   :  { %5949 = vmatprep.subr.bf16.mxu0 %v6765_v38 }
 0xf4d   :  { %5930 = vmatpush3.bf16.msra.mxu1 %v6647_v22 }
 0xf4e   :  { %5931 = vmatprep.subr.bf16.mxu1 %v6765_v38 }
 0xf4f   :  { %5950 = vmatpush3.bf16.msra.mxu0 %v6648_v23 }
 0xf50   :  { %5951 = vmatprep.subr.bf16.mxu0 %v6765_v38 }
 0xf51   :  { %5932 = vmatpush3.bf16.msra.mxu1 %v6649_v24 }
 0xf52   :  { %5933 = vmatprep.subr.bf16.mxu1 %v6765_v38 }
 0xf53   :  { %5952 = vmatpush3.bf16.msra.mxu0 %v6650_v25 }
 0xf54   :  { %5953 = vmatprep.subr.bf16.mxu0 %v6765_v38 }
 0xf55   :  { %5934 = vmatpush3.bf16.msra.mxu1 %v6651_v26 }
 0xf56   :  { %5935 = vmatprep.subr.bf16.mxu1 %v6765_v38 }
 0xf57   :  { %5954 = vmatpush3.bf16.msra.mxu0 %v6652_v27 }
 0xf58   :  { %5955 = vmatprep.subr.bf16.mxu0 %v6765_v38 }
 0xf59   :  { %5936 = vmatpush3.bf16.msra.mxu1 %v6653_v28 }
 0xf5a   :  { %5937 = vmatprep.subr.bf16.mxu1 %v6765_v38 }
 0xf5b   :  { %5956 = vmatpush3.bf16.msra.mxu0 %v6654_v29 }
 0xf5c   :  { %5957 = vmatprep.subr.bf16.mxu0 %v6765_v38 }
 0xf5d   :  { %5938 = vmatpush3.bf16.msra.mxu1 %v6655_v30 }
 0xf5e   :  { %5963 = vmatprep.subr.bf16.mxu1 %v6765_v38 }
 0xf5f   :  { %5958 = vmatpush3.bf16.msra.mxu0 %v6656_v32 }
 0xf60   :  { %5969 = vmatprep.subr.bf16.mxu0 %v6765_v38 }
0x1013   :  { %v2815_v33 = vpop.f32.mrb[42].mxu1 }
0x1014   :  { %v2889_v34 = vmul.f32 0.125, %v2815_v33  ;;  %v5887_v35 = vpop.f32.mrb[43].mxu1 }
0x1015   :  { %v2885_v36 = vpop.f32.mrb[54].mxu0 }
0x1016   :  { %v2891_v37 = vmul.f32 %v2889_v34, %v2889_v34  ;;  %v2890_v39 = vmul.f32 0.125, %v2885_v36  ;;  %v5922_v40 = vpop.f32.mrb[55].mxu0  ;;  %v2897_v44 = vrot.slane %v2889_v34, %v6871_v45 }
0x1018   :  { %v2892_v41 = vsub.f32 %v2890_v39, %v2891_v37  ;;  %v2898_v47 = vsub.f32 %v7084_v3, %v2897_v44 }
0x101a   :  { %v2893_v42 = vmax.f32 %v2892_v41, 0.0 }
0x101c   :  { %v2899_v43 = vadd.f32 1e-05, %v2893_v42 }
0x101e   :  { %6690 = vrsqrt.f32 %v2899_v43 }
0x1028   :  { %v6691_v46 = vpop.eup %6690 }
0x1029   :  { %v2904_v48 = vrot.slane %v6691_v46, %v6871_v45 }
0x102b   :  { %v2905_v49 = vmul.f32 %v2904_v48, %v2898_v47 }
0x102d   :  { %v2906_v50 = vmax.f32 %v2905_v49, 0.0 }
0x102f   :  { %v2923_v52 = vpack.c.bf16 %v2906_v50, %v2906_v50 }
0x1031   :  { %5940 = vmatmul.mubr.bf16.vlgmr.msra.gmra.mrb[60].mxu1 %v2923_v52  ;;  %5960 = vmatmul.mubr.bf16.vlgmr.msra.gmra.mrb[72].mxu0 %v2923_v52 }
0x1032   :  { %5965 = vmatprep.mubr.msk.bf16.mxu1 %vm6764_vm2, %v6765_v38  ;;  %5971 = vmatprep.mubr.msk.bf16.mxu0 %vm6764_vm2, %v6765_v38 }
0x1104   :  { %v3006_v54 = vpop.f32.mrb[60].mxu1  ;;  %v3110_v56 = vpop.f32.mrb[72].mxu0 }
0x1105   :  { %v3116_v58 = vmax.f32 %v3006_v54, %v3110_v56  ;;  %v5941_v59 = vpop.f32.mrb[61].mxu1  ;;  %v5961_v60 = vpop.f32.mrb[73].mxu0 }
0x1106   :  { %v3009_v61 = vpop.f32.mrb[62].mxu1  ;;  %v3113_v62 = vpop.f32.mrb[74].mxu0  ;;  %v3372_v60 = vld [vmem:[#allocation4 + $0x5a4] sm:$0x3] }
0x1107   :  { %v3118_v63 = vpack.c.bf16 %v3116_v58, %v3116_v58  ;;  %v5942_v1 = vpop.f32.mrb[63].mxu1  ;;  %v5962_v2 = vpop.f32.mrb[75].mxu0 }
0x1109   :  { %v3123_v3 = vsel %vm2609_vm6, %v3118_v63, 0 }
0x110a   :  { %5964 = vmatpush3.bf16.msra.mxu1 %v3123_v3  ;;  %5970 = vmatpush3.bf16.msra.mxu0 %v3123_v3 }
0x110b   :  { %5975 = vmatprep.subr.bf16.mxu1 %v6765_v38  ;;  %5987 = vmatprep.subr.bf16.mxu0 %v6765_v38 }
0x110d   :  { %5966 = vmatmul.mubr.msk.bf16.vlgmr.msra.gmra.mrb[64].mxu1 %vm2605_vm7, %v3117_v51  ;;  %5972 = vmatmul.mubr.msk.bf16.vlgmr.msra.gmra.mrb[76].mxu0 %vm2605_vm7, %v3165_v53  ;;  %v3422_v51 = vld [vmem:[#allocation4 + $0x5a8] sm:$0x3] }
0x110e   :  { %5976 = vmatpush3.bf16.msra.mxu1 %v6657_v55  ;;  %5983 = vmatprep.mubr.msk.bf16.mxu1 %vm6764_vm2, %v6765_v38 }
0x110f   :  { %5977 = vmatprep.subr.bf16.mxu1 %v6765_v38  ;;  %5991 = vmatprep.mubr.msk.bf16.mxu0 %vm6764_vm2, %v6765_v38 }
0x1110   :  { %5988 = vmatpush3.bf16.msra.mxu0 %v6661_v16 }
0x1111   :  { %5989 = vmatprep.subr.bf16.mxu0 %v6765_v38 }
0x1112   :  { %5978 = vmatpush3.bf16.msra.mxu1 %v6658_v57  ;;  %v3474_v57 = vld [vmem:[#allocation4 + $0x5b8] sm:$0x3] }
0x1113   :  { %5979 = vmatprep.subr.bf16.mxu1 %v6765_v38 }
0x1114   :  { %5990 = vmatpush3.bf16.msra.mxu0 %v6662_v17 }
0x1115   :  { %5995 = vmatprep.subr.bf16.mxu0 %v6765_v38 }
0x1116   :  { %5980 = vmatpush3.bf16.msra.mxu1 %v6659_v4  ;;  %v6663_v4 = vld [vmem:[#allocation4 + $0x470] ss:$12 sps:$4 sm:$0xff]  }
0x1117   :  { %5981 = vmatprep.subr.bf16.mxu1 %v6765_v38 }
0x111a   :  { %5982 = vmatpush3.bf16.msra.mxu1 %v6660_v5  ;;  %v6664_v5 = vld [vmem:[#allocation4 + $0x488] ss:$12 sps:$4 sm:$0xff]  }
0x111b   :  { %6001 = vmatprep.subr.bf16.mxu1 %v6765_v38 }
0x11e0   :  { %v3159_v6 = vpop.f32.mrb[64].mxu1  ;;  %v3203_v7 = vpop.f32.mrb[76].mxu0 }
0x11e1   :  { %v3209_v8 = vmax.f32 %v3159_v6, %v3203_v7  ;;  %v5967_v9 = vpop.f32.mrb[65].mxu1  ;;  %v5973_v10 = vpop.f32.mrb[77].mxu0 }
0x11e2   :  { %v3162_v11 = vpop.f32.mrb[66].mxu1  ;;  %v3206_v12 = vpop.f32.mrb[78].mxu0 }
0x11e3   :  { %v3218_v13 = vpack.c.bf16 %v3209_v8, %v3209_v8  ;;  %v5968_v14 = vpop.f32.mrb[67].mxu1  ;;  %v5974_v15 = vpop.f32.mrb[79].mxu0 }
0x11e5   :  { %5984 = vmatmul.mubr.msk.bf16.vlgmr.msra.gmra.mrb[68].mxu1 %vm962_vm3, %v3218_v13 }
0x11e6   :  { %6003 = vmatprep.mubr.msk.bf16.mxu1 %vm6764_vm2, %v6765_v38 }
0x12b8   :  { %v3280_v18 = vpop.f32.mrb[68].mxu1 }
0x12b9   :  { %v3287_v19 = vsel %vm3286_vm8, %v3280_v18, 0.0  ;;  %v3294_v20 = vmul.f32 %v3280_v18, %v3280_v18  ;;  %v5985_v0 = vpop.f32.mrb[69].mxu1 }
0x12ba   :  { %v3288_v21 = vrot.slane %v3287_v19, 4  ;;  %v3283_v22 = vpop.f32.mrb[70].mxu1 }
0x12bb   :  { %v3295_v23 = vsel %vm3286_vm8, %v3294_v20, 0.0  ;;  %v5986_v24 = vpop.f32.mrb[71].mxu1 }
0x12bc   :  { %v3289_v25 = vadd.f32 %v3288_v21, %v3287_v19  ;;  %v3296_v26 = vrot.slane %v3295_v23, 4 }
0x12be   :  { %v3290_v27 = vrot.slane %v3289_v25, 2  ;;  %v3297_v28 = vadd.f32 %v3296_v26, %v3295_v23  ;;  %v6665_v26 = vld [vmem:[#allocation4 + $0x498] ss:$12 sps:$4 sm:$0xff]  }
0x12c0   :  { %v3291_v29 = vadd.f32 %v3290_v27, %v3289_v25  ;;  %v3298_v30 = vrot.slane %v3297_v28, 2  ;;  %v6666_v27 = vld [vmem:[#allocation4 + $0x4b0] ss:$12 sps:$4 sm:$0xff]  }
0x12c2   :  { %v3292_v32 = vrot.slane %v3291_v29, 1  ;;  %v3299_v33 = vadd.f32 %v3298_v30, %v3297_v28 }
0x12c4   :  { %v3293_v34 = vadd.f32 %v3292_v32, %v3291_v29  ;;  %v3300_v35 = vrot.slane %v3299_v33, 1 }
0x12c6   :  { %v3301_v36 = vadd.f32 %v3300_v35, %v3299_v33  ;;  %v3302_v37 = vmul.f32 0.5, %v3293_v34 }
0x12c8   :  { %v3303_v39 = vmul.f32 0.5, %v3301_v36  ;;  %v3304_v40 = vmul.f32 %v3302_v37, %v3302_v37  ;;  %v3307_v44 = vsub.f32 %v3280_v18, %v3302_v37 }
0x12ca   :  { %v3305_v41 = vsub.f32 %v3303_v39, %v3304_v40 }
0x12cc   :  { %v3306_v42 = vmax.f32 %v3305_v41, 0.0 }
0x12ce   :  { %v3308_v43 = vadd.f32 1e-05, %v3306_v42 }
0x12d0   :  { %6692 = vrsqrt.f32 %v3308_v43 }
0x12da   :  { %v6693_v46 = vpop.eup %6692 }
0x12db   :  { %v3310_v47 = vmul.f32 %v6693_v46, %v3307_v44 }
0x12dd   :  { %v3311_v48 = vmax.f32 %v3310_v47, 0.0 }
0x12df   :  { %v3316_v49 = vpack.c.bf16 %v3311_v48, %v3311_v48 }
0x12e1   :  { %5992 = vmatmul.mubr.msk.bf16.vlgmr.msra.gmra.mrb[80].mxu0 %vm191_vm1, %v3316_v49 }
0x12e2   :  { %5997 = vmatprep.mubr.msk.bf16.mxu0 %vm6764_vm2, %v6765_v38 }
0x13b4   :  { %v3366_v50 = vpop.f32.mrb[80].mxu0 }
0x13b5   :  { %v3373_v52 = vpack.c.bf16 %v3366_v50, %v3366_v50  ;;  %v5993_v54 = vpop.f32.mrb[81].mxu0 }
0x13b6   :  { %v3369_v56 = vpop.f32.mrb[82].mxu0 }
0x13b7   :  { %v3380_v58 = vsel %vm3378_vm9, %v3373_v52, 0  ;;  %v5994_v59 = vpop.f32.mrb[83].mxu0 }
0x13b8   :  { %5996 = vmatpush3.bf16.msra.mxu0 %v3380_v58  ;;  %v3773_v58 = vld [vmem:[#allocation4 + $0x570] sm:$0xf] }
0x13b9   :  { %6353 = vmatprep.subr.bf16.mxu0 %v6763_v31 }
0x13bb   :  { %5998 = vmatmul.mubr.msk.bf16.vlgmr.msra.gmra.mrb[84].mxu0 %vm3374_vm10, %v3372_v60 }
0x13bc   :  { %6021 = vmatprep.mubr.msk.f32.mxu0 %vm6764_vm2, %v6765_v38  ;;  %6355 = vmatpush3.bf16.msra.mxu0 %v6663_v4 }
0x13bd   :  { %6356 = vmatprep.subr.bf16.mxu0 %v6763_v31 }
0x13c0   :  { %6358 = vmatpush3.bf16.msra.mxu0 %v6664_v5 }
0x13c1   :  { %6359 = vmatprep.subr.bf16.mxu0 %v6763_v31 }
0x148e   :  { %v3416_v61 = vpop.f32.mrb[84].mxu0 }
0x148f   :  { %v5999_v62 = vpop.f32.mrb[85].mxu0  ;;  %v3423_v63 = vpack.c.bf16 %v3416_v61, %v3416_v61 }
0x1490   :  { %v3419_v1 = vpop.f32.mrb[86].mxu0 }
0x1491   :  { %3476 = vrot.lane.b32.xlu0 %v3423_v63, %s6766_s1  ;;  %v6000_v2 = vpop.f32.mrb[87].mxu0  ;;  %v3432_v3 = vsel %vm2609_vm6, %v3423_v63, 0 }
0x1492   :  { %6002 = vmatpush3.bf16.msra.mxu1 %v3432_v3  ;;  %v3821_v2 = vld [vmem:[#allocation4 + $0x574] sm:$0xf] }
0x1493   :  { %6007 = vmatprep.subr.bf16.mxu1 %v6765_v38 }
0x1495   :  { %3425 = vrot.lane.b32.xlu0 %v3416_v61, %s6767_s8  ;;  %6004 = vmatmul.mubr.msk.bf16.vlgmr.msra.gmra.mrb[72].mxu1 %vm2605_vm7, %v3422_v51 }
0x1496   :  { %6009 = vmatprep.mubr.msk.bf16.mxu1 %vm6764_vm2, %v6765_v38 }
0x1503   :  { %v3477_v53 = vpop.permute.xlu0 %3476 }
0x1504   :  { %v3482_v55 = vsel %vm2609_vm6, %v3477_v53, 0  ;;  %v3873_v53 = vld [vmem:[#allocation4 + $0x578] sm:$0xf] }
0x1505   :  { %6008 = vmatpush3.bf16.msra.mxu1 %v3482_v55  ;;  %v6667_v55 = vld [vmem:[#allocation4 + $0x49c] ss:$12 sps:$4 sm:$0xff]  }
0x1506   :  { %6035 = vmatprep.subr.bf16.mxu1 %v6765_v38 }
0x1507   :  { %v3426_v6 = vpop.permute.xlu0 %3425 }
0x1508   :  { %6010 = vmatmul.mubr.msk.bf16.vlgmr.msra.gmra.mrb[72].mxu1 %vm2605_vm7, %v3474_v57  ;;  %v6668_v57 = vld [vmem:[#allocation4 + $0x4b4] ss:$12 sps:$4 sm:$0xff]  }
0x1509   :  { %6039 = vmatprep.mubr.msk.bf16.mxu1 %vm6764_vm2, %v6765_v38  ;;  %6036 = vmatpush3.bf16.msra.mxu1 %v6665_v26 }
0x150a   :  { %6037 = vmatprep.subr.bf16.mxu1 %v6765_v38 }
0x150d   :  { %6038 = vmatpush3.bf16.msra.mxu1 %v6666_v27 }
0x150e   :  { %6049 = vmatprep.subr.bf16.mxu1 %v6765_v38 }
0x15db   :  { %v3518_v7 = vpop.f32.mrb[72].mxu1 }
0x15dc   :  { %v6389_v8 = vadd.f32 %v3518_v7, %v3426_v6  ;;  %v6011_v9 = vpop.f32.mrb[73].mxu1 }
0x15dd   :  { %v3521_v10 = vpop.f32.mrb[74].mxu1 }
0x15de   :  { %v3526_v11 = vsel %vm3525_vm11, %v6389_v8, 0.0  ;;  %v3533_v12 = vmul.f32 %v6389_v8, %v6389_v8  ;;  %v6012_v13 = vpop.f32.mrb[75].mxu1 }
0x15df   :  { %v3527_v14 = vrot.slane %v3526_v11, 4 }
0x15e0   :  { %v3534_v15 = vsel %vm3525_vm11, %v3533_v12, 0.0 }
0x15e1   :  { %v3528_v16 = vadd.f32 %v3527_v14, %v3526_v11  ;;  %v3535_v17 = vrot.slane %v3534_v15, 4 }
0x15e3   :  { %v3529_v18 = vrot.slane %v3528_v16, 2  ;;  %v3536_v19 = vadd.f32 %v3535_v17, %v3534_v15 }
0x15e5   :  { %v3530_v20 = vadd.f32 %v3529_v18, %v3528_v16  ;;  %v3537_v0 = vrot.slane %v3536_v19, 2 }
0x15e7   :  { %v3531_v21 = vrot.slane %v3530_v20, 1  ;;  %v3538_v23 = vadd.f32 %v3537_v0, %v3536_v19 }
0x15e9   :  { %v3532_v22 = vadd.f32 %v3531_v21, %v3530_v20  ;;  %v3539_v24 = vrot.slane %v3538_v23, 1 }
0x15eb   :  { %6022 = vmatmul.mubr.msk.f32.vlgmr.msra.gmra.mrb[88].mxu0 %vm191_vm1, %v3532_v22  ;;  %v3540_v25 = vadd.f32 %v3539_v24, %v3538_v23  ;;  %v6669_v24 = vld [vmem:[#allocation4 + $0x4a0] ss:$12 sps:$4 sm:$0xff]  }
0x15ec   :  { %6361 = vmatpush3.bf16.msra.mxu0 %v6663_v4  ;;  %6032 = vmatprep.mubr.msk.f32.mxu0 %vm6764_vm2, %v6765_v38 }
0x15ed   :  { %6362 = vmatprep.subr.bf16.mxu0 %v6763_v31 }
0x15f0   :  { %6364 = vmatpush3.bf16.msra.mxu0 %v6664_v5 }
0x15f1   :  { %6043 = vmatprep.subr.bf16.mxu0 %v6765_v38 }
0x15f3   :  { %6033 = vmatmul.mubr.msk.f32.vlgmr.msra.gmra.mrb[90].mxu0 %vm191_vm1, %v3540_v25  ;;  %v6670_v25 = vld [vmem:[#allocation4 + $0x4b8] ss:$12 sps:$4 sm:$0xff]  }
0x15f4   :  { %6045 = vmatprep.mubr.msk.bf16.mxu0 %vm6764_vm2, %v6765_v38 }
0x16be   :  { %v3618_v28 = vpop.f32.mrb[88].mxu0 }
0x16bf   :  { %v6023_v29 = vpop.f32.mrb[89].mxu0  ;;  %v3695_v30 = vmul.f32 0.125, %v3618_v28 }
0x16c1   :  { %v3697_v33 = vmul.f32 %v3695_v30, %v3695_v30  ;;  %v3703_v40 = vrot.slane %v3695_v30, %v6871_v45 }
0x16c3   :  { %v3704_v42 = vsub.f32 %v6389_v8, %v3703_v40 }
0x16c6   :  { %v3691_v32 = vpop.f32.mrb[90].mxu0 }
0x16c7   :  { %v3696_v34 = vmul.f32 0.125, %v3691_v32  ;;  %v6034_v35 = vpop.f32.mrb[91].mxu0 }
0x16c9   :  { %v3698_v36 = vsub.f32 %v3696_v34, %v3697_v33 }
0x16cb   :  { %v3699_v37 = vmax.f32 %v3698_v36, 0.0 }
0x16cd   :  { %v3705_v39 = vadd.f32 1e-05, %v3699_v37 }
0x16cf   :  { %6694 = vrsqrt.f32 %v3705_v39 }
0x16d9   :  { %v6695_v41 = vpop.eup %6694 }
0x16da   :  { %v3710_v43 = vrot.slane %v6695_v41, %v6871_v45 }
0x16dc   :  { %v3711_v44 = vmul.f32 %v3710_v43, %v3704_v42 }
0x16de   :  { %v3712_v46 = vmax.f32 %v3711_v44, 0.0 }
0x16e0   :  { %v3717_v47 = vpack.c.bf16 %v3712_v46, %v3712_v46 }
0x16e2   :  { %6040 = vmatmul.mubr.msk.bf16.vlgmr.msra.gmra.mrb[76].mxu1 %vm191_vm1, %v3717_v47 }
0x16e3   :  { %6051 = vmatprep.mubr.msk.bf16.mxu1 %vm6764_vm2, %v6765_v38 }
0x17b5   :  { %v3767_v48 = vpop.f32.mrb[76].mxu1 }
0x17b6   :  { %v3774_v49 = vpack.c.bf16 %v3767_v48, %v3767_v48  ;;  %v6041_v50 = vpop.f32.mrb[77].mxu1 }
0x17b7   :  { %v3770_v52 = vpop.f32.mrb[78].mxu1 }
0x17b8   :  { %v3779_v54 = vsel %vm2609_vm6, %v3774_v49, 0  ;;  %v6042_v56 = vpop.f32.mrb[79].mxu1 }
0x17b9   :  { %6044 = vmatpush3.bf16.msra.mxu0 %v3779_v54  ;;  %v6671_v54 = vld [vmem:[#allocation4 + $0x530] ss:$12 sps:$4 sm:$0xff]  }
0x17ba   :  { %6365 = vmatprep.subr.bf16.mxu0 %v6763_v31 }
0x17bc   :  { %6046 = vmatmul.mubr.msk.bf16.vlgmr.msra.gmra.mrb[92].mxu0 %vm2605_vm7, %v3773_v58 }
0x17bd   :  { %6069 = vmatprep.mubr.msk.f32.mxu0 %vm6764_vm2, %v6765_v38  ;;  %6367 = vmatpush3.bf16.msra.mxu0 %v6667_v55 }
0x17be   :  { %6368 = vmatprep.subr.bf16.mxu0 %v6763_v31 }
0x17c1   :  { %6370 = vmatpush3.bf16.msra.mxu0 %v6668_v57 }
0x17c2   :  { %6371 = vmatprep.subr.bf16.mxu0 %v6763_v31 }
0x188f   :  { %v3815_v59 = vpop.f32.mrb[92].mxu0 }
0x1890   :  { %v6047_v60 = vpop.f32.mrb[93].mxu0  ;;  %v3822_v61 = vpack.c.bf16 %v3815_v59, %v3815_v59 }
0x1891   :  { %v3818_v62 = vpop.f32.mrb[94].mxu0 }
0x1892   :  { %3875 = vrot.lane.b32.xlu1 %v3822_v61, %s6766_s1  ;;  %v6048_v63 = vpop.f32.mrb[95].mxu0  ;;  %v3831_v1 = vsel %vm1839_vm4, %v3822_v61, 0  ;;  %v6672_v62 = vld [vmem:[#allocation4 + $0x540] ss:$12 sps:$4 sm:$0xff]  }
0x1893   :  { %6050 = vmatpush3.bf16.msra.mxu1 %v3831_v1  ;;  %v6673_v1 = vld [vmem:[#allocation4 + $0x544] ss:$12 sps:$4 sm:$0xff]  }
0x1894   :  { %6055 = vmatprep.subr.bf16.mxu1 %v6765_v38 }
0x1896   :  { %3824 = vrot.lane.b32.xlu1 %v3815_v59, %s6767_s8  ;;  %6052 = vmatmul.mubr.msk.bf16.vlgmr.msra.gmra.mrb[80].mxu1 %vm1835_vm5, %v3821_v2  ;;  %v6674_v2 = vld [vmem:[#allocation4 + $0x4c8] ss:$12 sps:$4 sm:$0xff]  }
0x1897   :  { %6057 = vmatprep.mubr.msk.bf16.mxu1 %vm6764_vm2, %v6765_v38 }
0x1904   :  { %v3876_v3 = vpop.permute.xlu1 %3875 }
0x1905   :  { %v3881_v51 = vsel %vm1839_vm4, %v3876_v3, 0  ;;  %v6675_v3 = vld [vmem:[#allocation4 + $0x4e0] ss:$12 sps:$4 sm:$0xff]  }
0x1906   :  { %6056 = vmatpush3.bf16.msra.mxu1 %v3881_v51 }
0x1907   :  { %6083 = vmatprep.subr.bf16.mxu1 %v6765_v38 }
0x1908   :  { %v3825_v4 = vpop.permute.xlu1 %3824 }
0x1909   :  { %6058 = vmatmul.mubr.msk.bf16.vlgmr.msra.gmra.mrb[80].mxu1 %vm1835_vm5, %v3873_v53 }
0x190a   :  { %6087 = vmatprep.mubr.msk.bf16.mxu1 %vm6764_vm2, %v6765_v38  ;;  %6084 = vmatpush3.bf16.msra.mxu1 %v6669_v24 }
0x190b   :  { %6085 = vmatprep.subr.bf16.mxu1 %v6765_v38 }
0x190e   :  { %6086 = vmatpush3.bf16.msra.mxu1 %v6670_v25 }
0x190f   :  { %6377 = vmatprep.subr.bf16.mxu1 %v6763_v31 }
0x19dc   :  { %v3917_v5 = vpop.f32.mrb[80].mxu1 }
0x19dd   :  { %v6390_v6 = vadd.f32 %v3917_v5, %v3825_v4  ;;  %v6059_v7 = vpop.f32.mrb[81].mxu1 }
0x19de   :  { %v3920_v8 = vpop.f32.mrb[82].mxu1 }
0x19df   :  { %v3924_v9 = vsel %vm191_vm1, %v6390_v6, 0.0  ;;  %v3931_v10 = vmul.f32 %v6390_v6, %v6390_v6  ;;  %v6060_v11 = vpop.f32.mrb[83].mxu1 }
0x19e0   :  { %v3925_v12 = vrot.slane %v3924_v9, 4 }
0x19e1   :  { %v3932_v13 = vsel %vm191_vm1, %v3931_v10, 0.0 }
0x19e2   :  { %v3926_v14 = vadd.f32 %v3925_v12, %v3924_v9  ;;  %v3933_v15 = vrot.slane %v3932_v13, 4 }
0x19e4   :  { %v3927_v16 = vrot.slane %v3926_v14, 2  ;;  %v3934_v17 = vadd.f32 %v3933_v15, %v3932_v13 }
0x19e6   :  { %v3928_v18 = vadd.f32 %v3927_v16, %v3926_v14  ;;  %v3935_v19 = vrot.slane %v3934_v17, 2 }
0x19e8   :  { %v3929_v20 = vrot.slane %v3928_v18, 1  ;;  %v3936_v21 = vadd.f32 %v3935_v19, %v3934_v17 }
0x19ea   :  { %v3930_v0 = vadd.f32 %v3929_v20, %v3928_v18  ;;  %v3937_v22 = vrot.slane %v3936_v21, 1 }
0x19ec   :  { %6070 = vmatmul.mubr.msk.f32.vlgmr.msra.gmra.mrb[96].mxu0 %vm191_vm1, %v3930_v0  ;;  %v3938_v23 = vadd.f32 %v3937_v22, %v3936_v21 }
0x19ed   :  { %6373 = vmatpush3.bf16.msra.mxu0 %v6667_v55  ;;  %6080 = vmatprep.mubr.msk.f32.mxu0 %vm6764_vm2, %v6765_v38 }
0x19ee   :  { %6374 = vmatprep.subr.bf16.mxu0 %v6763_v31 }
0x19f1   :  { %6376 = vmatpush3.bf16.msra.mxu0 %v6668_v57 }
0x19f2   :  { %6091 = vmatprep.subr.bf16.mxu0 %v6765_v38 }
0x19f4   :  { %6081 = vmatmul.mubr.msk.f32.vlgmr.msra.gmra.mrb[98].mxu0 %vm191_vm1, %v3938_v23 }
0x19f5   :  { %6093 = vmatprep.mubr.msk.bf16.mxu0 %vm6764_vm2, %v6765_v38 }
0x1abf   :  { %v4016_v26 = vpop.f32.mrb[96].mxu0 }
0x1ac0   :  { %v6071_v27 = vpop.f32.mrb[97].mxu0  ;;  %v4093_v28 = vmul.f32 0.03125, %v4016_v26 }
0x1ac1   :  { %v6676_v27 = vld [vmem:[#allocation4 + $0x4d0] ss:$12 sps:$4 sm:$0xff]  }
0x1ac2   :  { %v4095_v30 = vmul.f32 %v4093_v28, %v4093_v28  ;;  %v4101_v37 = vrot.slane %v4093_v28, %v6871_v45  ;;  %v6677_v28 = vld [vmem:[#allocation4 + $0x4e8] ss:$12 sps:$4 sm:$0xff]  }
0x1ac4   :  { %v4102_v40 = vsub.f32 %v6390_v6, %v4101_v37 }
0x1ac7   :  { %v4089_v29 = vpop.f32.mrb[98].mxu0 }
0x1ac8   :  { %v4094_v32 = vmul.f32 0.03125, %v4089_v29  ;;  %v6082_v33 = vpop.f32.mrb[99].mxu0 }
0x1aca   :  { %v4096_v34 = vsub.f32 %v4094_v32, %v4095_v30 }
0x1acc   :  { %v4097_v35 = vmax.f32 %v4096_v34, 0.0 }
0x1ace   :  { %v4103_v36 = vadd.f32 1e-05, %v4097_v35 }
0x1ad0   :  { %6696 = vrsqrt.f32 %v4103_v36 }
0x1ada   :  { %v6697_v39 = vpop.eup %6696 }
0x1adb   :  { %v4108_v41 = vrot.slane %v6697_v39, %v6871_v45 }
0x1add   :  { %v4109_v42 = vmul.f32 %v4108_v41, %v4102_v40 }
0x1adf   :  { %v4110_v43 = vmax.f32 %v4109_v42, 0.0 }
0x1ae1   :  { %v4115_v44 = vpack.c.bf16 %v4110_v43, %v4110_v43 }
0x1ae3   :  { %6088 = vmatmul.mubr.msk.bf16.vlgmr.msra.gmra.mrb[84].mxu1 %vm191_vm1, %v4115_v44 }
0x1ae4   :  { %6117 = vmatprep.mubr.msk.f32.mxu1 %vm6764_vm2, %v6765_v38  ;;  %6379 = vmatpush3.bf16.msra.mxu1 %v6674_v2 }
0x1ae5   :  { %6380 = vmatprep.subr.bf16.mxu1 %v6763_v31 }
0x1ae8   :  { %6382 = vmatpush3.bf16.msra.mxu1 %v6675_v3 }
0x1ae9   :  { %6383 = vmatprep.subr.bf16.mxu1 %v6763_v31 }
0x1bb6   :  { %v4165_v46 = vpop.f32.mrb[84].mxu1 }
0x1bb7   :  { %v4173_v47 = vpack.c.bf16 %v4165_v46, %v4165_v46  ;;  %v6089_v48 = vpop.f32.mrb[85].mxu1 }
0x1bb8   :  { %v4168_v49 = vpop.f32.mrb[86].mxu1 }
0x1bb9   :  { %v4183_v50 = vsel %vm1839_vm4, %v4173_v47, 0  ;;  %v6090_v52 = vpop.f32.mrb[87].mxu1 }
0x1bba   :  { %6092 = vmatpush3.bf16.msra.mxu0 %v4183_v50  ;;  %v6678_v50 = vld [vmem:[#allocation4 + $0x4cc] ss:$12 sps:$4 sm:$0xff]  }
0x1bbb   :  { %6097 = vmatprep.subr.bf16.mxu0 %v6765_v38 }
0x1bbd   :  { %6094 = vmatmul.mubr.msk.bf16.vlgmr.msra.gmra.mrb[100].mxu0 %vm1835_vm5, %v6671_v54 }
0x1bbe   :  { %6099 = vmatprep.mubr.msk.bf16.mxu0 %vm6764_vm2, %v6765_v38 }
0x1c90   :  { %v4219_v56 = vpop.f32.mrb[100].mxu0 }
0x1c91   :  { %4236 = vrot.lane.b32.xlu1 %v4219_v56, %s6767_s8  ;;  %v6095_v58 = vpop.f32.mrb[101].mxu0 }
0x1c92   :  { %v4222_v59 = vpop.f32.mrb[102].mxu0 }
0x1c93   :  { %v4228_v60 = vpack.c.bf16 %v4222_v59, %v4219_v56  ;;  %v6096_v61 = vpop.f32.mrb[103].mxu0 }
0x1c94   :  { %v6680_v61 = vld [vmem:[#allocation4 + $0x4f8] ss:$12 sps:$4 sm:$0xff]  }
0x1c95   :  { %4294 = vrot.lane.b32.xlu0 %v4228_v60, %s6766_s1  ;;  %6098 = vmatpush3.bf16.msra.mxu0 %v4228_v60  ;;  %v6679_v60 = vld [vmem:[#allocation4 + $0x4e4] ss:$12 sps:$4 sm:$0xff]  }
0x1c96   :  { %6103 = vmatprep.subr.bf16.mxu0 %v6765_v38 }
0x1c98   :  { %6100 = vmatmul.mubr.msk.bf16.vlgmr.msra.gmra.mrb[104].mxu0 %vm66_vm0, %v6672_v62 }
0x1c99   :  { %4238 = vrot.lane.b32.xlu0 %v4222_v59, %s6767_s8  ;;  %6105 = vmatprep.mubr.msk.bf16.mxu0 %vm6764_vm2, %v6765_v38 }
0x1d03   :  { %v4237_v51 = vpop.permute.xlu1 %4236 }
0x1d07   :  { %v4295_v63 = vpop.permute.xlu0 %4294 }
0x1d08   :  { %6104 = vmatpush3.bf16.msra.mxu0 %v4295_v63 }
0x1d09   :  { %6131 = vmatprep.subr.bf16.mxu0 %v6765_v38 }
0x1d0b   :  { %6106 = vmatmul.mubr.msk.bf16.vlgmr.msra.gmra.mrb[104].mxu0 %vm66_vm0, %v6673_v1  ;;  %v4239_v4 = vpop.permute.xlu0 %4238 }
0x1d0c   :  { %6135 = vmatprep.mubr.msk.bf16.mxu0 %vm6764_vm2, %v6765_v38  ;;  %6132 = vmatpush3.bf16.msra.mxu0 %v6676_v27 }
0x1d0d   :  { %6133 = vmatprep.subr.bf16.mxu0 %v6765_v38 }
0x1d10   :  { %6134 = vmatpush3.bf16.msra.mxu0 %v6677_v28 }
0x1dde   :  { %v4334_v53 = vpop.f32.mrb[104].mxu0 }
0x1ddf   :  { %v6391_v55 = vadd.f32 %v4334_v53, %v4237_v51  ;;  %v6107_v57 = vpop.f32.mrb[105].mxu0  ;;  %v6681_v53 = vld [vmem:[#allocation4 + $0x510] ss:$12 sps:$4 sm:$0xff]  }
0x1de0   :  { %v4337_v5 = vpop.f32.mrb[106].mxu0 }
0x1de1   :  { %v4352_v6 = vmul.f32 %v6391_v55, %v6391_v55  ;;  %v6392_v7 = vadd.f32 %v4337_v5, %v4239_v4  ;;  %v6108_v8 = vpop.f32.mrb[107].mxu0  ;;  %v4343_v9 = vsel %vm191_vm1, %v6391_v55, 0.0  ;;  %v6683_v5 = vld [vmem:[#allocation4 + $0x514] ss:$12 sps:$4 sm:$0xff]  }
0x1de3   :  { %v4344_v10 = vsel %vm191_vm1, %v6392_v7, 0.0  ;;  %v4353_v11 = vmul.f32 %v6392_v7, %v6392_v7  ;;  %v4354_v13 = vsel %vm191_vm1, %v4352_v6, 0.0  ;;  %v4837_v6 = vld [vmem:[#allocation4 + $0x5d0] sm:$0x1] }
0x1de4   :  { %v4345_v12 = vadd.f32 %v4344_v10, %v4343_v9  ;;  %v4838_v8 = vunpack.c.l.bf16 %v4837_v6 }
0x1de5   :  { %v4355_v14 = vsel %vm191_vm1, %v4353_v11, 0.0 }
0x1de6   :  { %v4346_v15 = vrot.slane %v4345_v12, 4  ;;  %v4356_v16 = vadd.f32 %v4355_v14, %v4354_v13  ;;  %v4842_v10 = vrot.slane %v4838_v8, %v6871_v45 }
0x1de8   :  { %v4347_v17 = vadd.f32 %v4346_v15, %v4345_v12  ;;  %v4357_v18 = vrot.slane %v4356_v16, 4 }
0x1dea   :  { %v4348_v19 = vrot.slane %v4347_v17, 2  ;;  %v4358_v20 = vadd.f32 %v4357_v18, %v4356_v16 }
0x1dec   :  { %v4349_v0 = vadd.f32 %v4348_v19, %v4347_v17  ;;  %v4359_v21 = vrot.slane %v4358_v20, 2 }
0x1dee   :  { %v4350_v22 = vrot.slane %v4349_v0, 1  ;;  %v4360_v23 = vadd.f32 %v4359_v21, %v4358_v20 }
0x1df0   :  { %v4351_v24 = vadd.f32 %v4350_v22, %v4349_v0  ;;  %v4361_v25 = vrot.slane %v4360_v23, 1 }
0x1df2   :  { %6118 = vmatmul.mubr.msk.f32.vlgmr.msra.gmra.mrb[88].mxu1 %vm191_vm1, %v4351_v24  ;;  %v4362_v26 = vadd.f32 %v4361_v25, %v4360_v23 }
0x1df3   :  { %6385 = vmatpush3.bf16.msra.mxu1 %v6674_v2  ;;  %6128 = vmatprep.mubr.msk.f32.mxu1 %vm6764_vm2, %v6765_v38 }
0x1df4   :  { %6386 = vmatprep.subr.bf16.mxu1 %v6763_v31 }
0x1df7   :  { %6388 = vmatpush3.bf16.msra.mxu1 %v6675_v3 }
0x1dfa   :  { %6129 = vmatmul.mubr.msk.f32.vlgmr.msra.gmra.mrb[90].mxu1 %vm191_vm1, %v4362_v26 }
0x1dfb   :  { %6141 = vmatprep.mubr.msk.bf16.mxu1 %vm66_vm0, %v6678_v50 }
0x1ec5   :  { %v4440_v29 = vpop.f32.mrb[88].mxu1 }
0x1ec6   :  { %v6119_v30 = vpop.f32.mrb[89].mxu1  ;;  %v4517_v32 = vmul.f32 0.0078125, %v4440_v29 }
0x1ec8   :  { %v4519_v34 = vmul.f32 %v4517_v32, %v4517_v32  ;;  %v4525_v40 = vrot.slane %v4517_v32, %v6871_v45 }
0x1eca   :  { %v4526_v42 = vsub.f32 %v6391_v55, %v4525_v40  ;;  %v4527_v43 = vsub.f32 %v6392_v7, %v4525_v40  ;;  %v6682_v55 = vld [vmem:[#allocation4 + $0x4fc] ss:$12 sps:$4 sm:$0xff]  }
0x1ecd   :  { %v4513_v33 = vpop.f32.mrb[90].mxu1 }
0x1ece   :  { %v4518_v35 = vmul.f32 0.0078125, %v4513_v33  ;;  %v6130_v36 = vpop.f32.mrb[91].mxu1 }
0x1ed0   :  { %v4520_v37 = vsub.f32 %v4518_v35, %v4519_v34 }
0x1ed2   :  { %v4521_v31 = vmax.f32 %v4520_v37, 0.0 }
0x1ed4   :  { %v4528_v39 = vadd.f32 1e-05, %v4521_v31 }
0x1ed6   :  { %6698 = vrsqrt.f32 %v4528_v39 }
0x1ee0   :  { %v6699_v41 = vpop.eup %6698 }
0x1ee1   :  { %v4533_v44 = vrot.slane %v6699_v41, %v6871_v45 }
0x1ee3   :  { %v4534_v38 = vmul.f32 %v4533_v44, %v4526_v42  ;;  %v4535_v46 = vmul.f32 %v4533_v44, %v4527_v43 }
0x1ee5   :  { %v4536_v47 = vmax.f32 %v4534_v38, 0.0  ;;  %v4537_v48 = vmax.f32 %v4535_v46, 0.0 }
0x1ee7   :  { %v4542_v49 = vpack.c.bf16 %v4537_v48, %v4536_v47 }
0x1ee9   :  { %6136 = vmatmul.mubr.msk.bf16.vlgmr.msra.gmra.mrb[108].mxu0 %vm191_vm1, %v4542_v49 }
0x1fbc   :  { %v4592_v52 = vpop.f32.mrb[108].mxu0 }
0x1fbd   :  { %v6137_v54 = vpop.f32.mrb[109].mxu0 }
0x1fbe   :  { %v4595_v56 = vpop.f32.mrb[110].mxu0 }
0x1fbf   :  { %v4603_v58 = vpack.c.bf16 %v4595_v56, %v4592_v52  ;;  %v6138_v59 = vpop.f32.mrb[111].mxu0 }
0x1fc1   :  { %6139 = vmatprep.subr.bf16.mxu1 %v4603_v58 }
0x1fc2   :  { %6140 = vmatpush3.bf16.msra.mxu1 %v4603_v58 }
0x1fc5   :  { %6142 = vmatmul.mubr.msk.bf16.vlgmr.msra.gmra.mrb[92].mxu1 %vm66_vm0, %v6679_v60 }
0x1fc6   :  { %6149 = vmatprep.mubr.msk.bf16.mxu1 %vm191_vm1, %v6680_v61 }
0x2098   :  { %v6143_v62 = vpop.f32.mrb[92].mxu1 }
0x2099   :  { %v4654_v63 = vpop.f32.mrb[93].mxu1 }
0x209a   :  { %v6144_v1 = vpop.f32.mrb[94].mxu1 }
0x209b   :  { %v4674_v2 = vpack.c.bf16 %v6144_v1, %v6143_v62  ;;  %v4657_v3 = vpop.f32.mrb[95].mxu1 }
0x209c   :  { %v4673_v51 = vpack.c.bf16 %v4657_v3, %v4654_v63 }
0x209d   :  { %4774 = vrot.lane.b32.xlu0 %v4674_v2, %s6766_s1 }
0x209e   :  { %4772 = vrot.lane.b32.xlu1 %v4673_v51, %s6766_s1  ;;  %6145 = vmatprep.subr.bf16.mxu1 %v4673_v51 }
0x209f   :  { %6146 = vmatpush3.bf16.msra.mxu1 %v4673_v51 }
0x20a0   :  { %6147 = vmatprep.subr.bf16.mxu1 %v4674_v2 }
0x20a1   :  { %4691 = vrot.lane.b32.xlu0 %v4657_v3, %s6767_s8 }
0x20a2   :  { %4689 = vrot.lane.b32.xlu1 %v4654_v63, %s6767_s8 }
0x20a3   :  { %6148 = vmatpush3.bf16.msra.mxu1 %v4674_v2 }
0x20a5   :  { %4695 = vrot.lane.b32.xlu0 %v6144_v1, %s6767_s8 }
0x20a6   :  { %4693 = vrot.lane.b32.xlu1 %v6143_v62, %s6767_s8  ;;  %6150 = vmatmul.mubr.msk.bf16.vlgmr.msra.gmra.mrb[96].mxu1 %vm191_vm1, %v6681_v53 }
0x20a7   :  { %6157 = vmatprep.mubr.msk.bf16.mxu1 %vm191_vm1, %v6682_v55 }
0x210f   :  { %v4775_v4 = vpop.permute.xlu0 %4774 }
0x2110   :  { %v4773_v57 = vpop.permute.xlu1 %4772 }
0x2111   :  { %6153 = vmatprep.subr.bf16.mxu1 %v4773_v57 }
0x2112   :  { %6154 = vmatpush3.bf16.msra.mxu1 %v4773_v57 }
0x2113   :  { %6155 = vmatprep.subr.bf16.mxu1 %v4775_v4  ;;  %v4692_v9 = vpop.permute.xlu0 %4691 }
0x2114   :  { %v4690_v7 = vpop.permute.xlu1 %4689 }
0x2116   :  { %6156 = vmatpush3.bf16.msra.mxu1 %v4775_v4 }
0x2117   :  { %v4696_v15 = vpop.permute.xlu0 %4695 }
0x2118   :  { %v4694_v11 = vpop.permute.xlu1 %4693 }
0x2119   :  { %6158 = vmatmul.mubr.msk.bf16.vlgmr.msra.gmra.mrb[96].mxu1 %vm191_vm1, %v6683_v5 }
0x21ec   :  { %v6159_v12 = vpop.f32.mrb[96].mxu1 }
0x21ed   :  { %v6393_v13 = vadd.f32 %v6159_v12, %v4694_v11  ;;  %v4818_v14 = vpop.f32.mrb[97].mxu1 }
0x21ee   :  { %v6394_v16 = vadd.f32 %v4818_v14, %v4690_v7  ;;  %v6160_v17 = vpop.f32.mrb[98].mxu1 }
0x21ef   :  { %v4845_v18 = vadd.f32 %v6393_v13, %v4842_v10  ;;  %v6395_v19 = vadd.f32 %v6160_v17, %v4696_v15  ;;  %v4821_v20 = vpop.f32.mrb[99].mxu1 }
0x21f0   :  { %v4843_v0 = vadd.f32 %v6394_v16, %v4842_v10  ;;  %v6396_v21 = vadd.f32 %v4821_v20, %v4692_v9 }
0x21f1   :  { %6700 = vtanh.f32 %v4845_v18  ;;  %v4846_v22 = vadd.f32 %v6395_v19, %v4842_v10 }
0x21f2   :  { %6702 = vtanh.f32 %v4843_v0  ;;  %v4844_v23 = vadd.f32 %v6396_v21, %v4842_v10 }
0x21f3   :  { %6704 = vtanh.f32 %v4846_v22 }
0x21f4   :  { %6706 = vtanh.f32 %v4844_v23 }
0x21fb   :  { %v6701_v24 = vpop.eup %6700 }
0x21fc   :  { %v6703_v45 = vpop.eup %6702  ;;  %4853 = vst.msk [vmem:[%s7269_s2 + $0x10] sm:$0xff] %vm191_vm1, %v6701_v24 }
0x21fd   :  { %v6705_v25 = vpop.eup %6704  ;;  %4851 = vst.msk [vmem:[%s7269_s2] sm:$0xff] %vm191_vm1, %v6703_v45 }
0x21fe   :  { %v6707_v26 = vpop.eup %6706  ;;  %4854 = vst.msk [vmem:[%s7269_s2 + $0x18] sm:$0xff] %vm191_vm1, %v6705_v25 }
0x21ff   :  { %4852 = vst.msk [vmem:[%s7269_s2 + $0x8] sm:$0xff] %vm191_vm1, %v6707_v26 }
0x2200   :  { %4859 = vsyncpa [#allocation3], 1 }
0x2201   :  { %4860 = vsyncpa [#allocation5], 1 }

</bundles_post_ra>
